<compile_context>
chip_gen: v6e
topology: v6e:2x2x1
jax: 0.10.0
libtpu: 0.0.40
codegen_flags: <defaults>
</compile_context>

<pallas_src>
import jax
import jax.numpy as jnp
import numpy as np
from jax.experimental import pallas as pl
from jax.experimental.pallas import tpu as pltpu

H_DIM, Z_DIM = 256, 32
UNFLATTEN = (16, 4, 4)      # (C, H, W) fed to the decoder
K_TAPS = 4                  # kernel size of every conv / conv-transpose


# ----------------------------------------------------------------------------
# Host-side constant builders (all weight prep hoisted to init)
# ----------------------------------------------------------------------------
def _conv_selection_matrices(weight, n, h_in, c_in, h_out, c_out, k, stride, pad,
                             transposed):
    """Constants R_i / M_i so that conv(X) == sum_i R_i @ (X @ M_i) on the
    [N*H, W*C] activation layout (square spatial dims)."""
    wt = np.asarray(weight).astype(np.float32)

    def in_of(out_idx, tap):
        if not transposed:                      # conv:  in = s*out + tap - p
            return stride * out_idx + tap - pad
        v = out_idx + pad - tap                 # convT: out = s*in + tap - p
        if v % stride != 0:
            return -1
        return v // stride

    def tap_cc(i, j):                           # -> [Cin, Cout]
        return wt[:, :, i, j].T if not transposed else wt[:, :, i, j]

    R = np.zeros((k, n * h_out, n * h_in), np.float32)
    M = np.zeros((k, h_in * c_in, h_out * c_out), np.float32)
    for i in range(k):
        for b in range(n):
            for oh in range(h_out):
                hh = in_of(oh, i)
                if 0 <= hh < h_in:
                    R[i, b * h_out + oh, b * h_in + hh] = 1.0
        for ow in range(h_out):
            for j in range(k):
                ww = in_of(ow, j)
                if 0 <= ww < h_in:
                    M[i, ww * c_in:(ww + 1) * c_in,
                      ow * c_out:(ow + 1) * c_out] += tap_cc(i, j)
    return R, M


def _bn_tiled(gamma, beta, c, ow):
    """A: per-channel averaging+broadcast matrix on the [*, OW*C] layout;
    gamma/beta pre-tiled to [1, OW*C]."""
    A = np.kron(np.ones((ow, ow), np.float32), np.eye(c, dtype=np.float32))
    g = np.asarray(gamma).astype(np.float32).reshape(-1)
    b = np.asarray(beta).astype(np.float32).reshape(-1)
    return A, np.tile(g, ow)[None, :], np.tile(b, ow)[None, :]


def build_vae_constants(params, n):
    """Packs every precomputed constant into 12 buffers (12 DMAs).

    Returned order (must match the kernel signature):
      rin [4,32,128], minc [16,256], r_all [16,32,32], mcat_all [4,64,256],
      a_all [4,64,64], gb_all [8,1,64], fc_all [96,256], bias_all [16,64],
      s_pack [4,2,8], p_pack [4,8,2], rout [4,128,32], moutc [64,64]
    """
    f32 = np.float32
    LAYERS = [  # (w_name, bn_name, h_in, c_in, h_out, c_out, transposed)
        ("enc_w0", "bn_e0", 16, 4, 8, 8, False),
        ("enc_w1", "bn_e1", 8, 8, 4, 16, False),
        ("dec_w0", "bn_d0", 4, 16, 8, 8, True),
        ("dec_w1", "bn_d1", 8, 8, 16, 4, True),
    ]

    # ----- conv layers: R taps padded+stacked, M taps lane-concatenated ------
    max_r = max(n * ho for _, _, _, _, ho, _, _ in LAYERS)     # 32
    max_c = max(n * hi for _, _, hi, _, _, _, _ in LAYERS)     # 32
    r_all = np.zeros((len(LAYERS) * K_TAPS, max_r, max_c), f32)
    mcat_list, a_list = [], []
    gb_all = np.zeros((2 * len(LAYERS), 1, 64), f32)
    for li, (wn, bn, hi, ci, ho, co, tr) in enumerate(LAYERS):
        R, M = _conv_selection_matrices(params[wn], n, hi, ci, ho, co,
                                        k=K_TAPS, stride=2, pad=1, transposed=tr)
        for i in range(K_TAPS):
            r_all[li * K_TAPS + i, :R.shape[1], :R.shape[2]] = R[i]
        mcat_list.append(np.concatenate([M[i] for i in range(K_TAPS)], axis=1))
        A, gt, bt = _bn_tiled(params[bn + "_g"], params[bn + "_b"], co, ho)
        a_list.append(A)
        gb_all[li] = gt
        gb_all[len(LAYERS) + li] = bt
    mcat_all = np.stack(mcat_list)        # [4, 64, 256]
    a_all = np.stack(a_list)              # [4, 64, 64]

    # ----- bottleneck: fold flatten/unflatten permutations into fc weights ---
    ce, hs = UNFLATTEN[0], UNFLATTEN[1]                  # 16 channels, 4x4 spatial
    idx = np.empty((hs, hs * ce), np.int64)              # (w*C + c) -> c*H*W + h*W + w
    for h in range(hs):
        for w in range(hs):
            for c in range(ce):
                idx[h, w * ce + c] = c * hs * hs + h * hs + w

    w12 = np.concatenate([np.asarray(params["fc1_w"]).astype(f32),
                          np.asarray(params["fc2_w"]).astype(f32)], axis=1)   # [256, 64]
    b12 = np.concatenate([np.asarray(params["fc1_b"]).astype(f32),
                          np.asarray(params["fc2_b"]).astype(f32)])           # [64]
    w12cat = np.concatenate([w12[idx[h]] for h in range(hs)], axis=1)         # [64, 256]

    w3 = np.asarray(params["fc3_w"]).astype(f32)                              # [32, 256]
    b3 = np.asarray(params["fc3_b"]).astype(f32)                              # [256]
    w3cat = np.concatenate([w3[:, idx[h]] for h in range(hs)], axis=1)        # [32, 256]

    fc_all = np.concatenate([w12cat, w3cat], axis=0)                          # [96, 256]

    bias_all = np.zeros((16, 64), f32)        # row 0: fc1||fc2 bias; rows 8:16: placed fc3 bias
    bias_all[0] = b12
    for b in range(n):
        for h in range(hs):
            bias_all[8 + b * hs + h] = b3[idx[h]]

    s_pack = np.zeros((hs, n, n * hs), f32)   # picks row b*hs + h
    p_pack = np.zeros((hs, n * hs, n), f32)   # places row b*hs + h
    for h in range(hs):
        for b in range(n):
            s_pack[h, b, b * hs + h] = 1.0
            p_pack[h, b * hs + h, b] = 1.0

    # ----- I/O layout permutations folded into the kernel as selection mats ---
    C0, H0, W0 = 4, 16, 16                    # NCHW dims of input == output
    rin = np.zeros((C0, n * H0, n * C0 * H0), f32)        # [4, 32, 128]
    minc = np.zeros((W0, C0 * W0 * C0), f32)              # [16, 256]
    rout = np.zeros((C0, n * C0 * H0, n * H0), f32)       # [4, 128, 32]
    moutc = np.zeros((W0 * C0, C0 * W0), f32)             # [64, 64]
    for c in range(C0):
        for b in range(n):
            for h in range(H0):
                rin[c, b * H0 + h, b * C0 * H0 + c * H0 + h] = 1.0
                rout[c, b * C0 * H0 + c * H0 + h, b * H0 + h] = 1.0
        for w in range(W0):
            minc[w, c * (W0 * C0) + w * C0 + c] = 1.0
            moutc[w * C0 + c, c * W0 + w] = 1.0

    consts = (rin, minc, r_all, mcat_all, a_all, gb_all, fc_all, bias_all,
              s_pack, p_pack, rout, moutc)
    return tuple(jnp.asarray(c) for c in consts)


# ----------------------------------------------------------------------------
# Fused Pallas kernel
# ----------------------------------------------------------------------------
def _vae_fused_kernel(
    x_ref, eps_ref,
    rin_ref, minc_ref, rall_ref, mcat_ref, a_ref, gb_ref,
    fc_ref, bias_ref, sp_ref, pp_ref, rout_ref, moutc_ref,
    recon_ref, mlv_ref,
):
    def wdot(a, b):
        return jnp.dot(a, b, preferred_element_type=jnp.float32)

    # ---------- input layout permutation: [N*C*H, W] -> [N*H, W*C] ----------
    x1 = x_ref[...]                                         # [128, 16]
    t = wdot(x1, minc_ref[...])                             # [128, 256]
    h = wdot(rin_ref[0], t[:, 0:64])
    for c in range(1, 4):
        h = h + wdot(rin_ref[c], t[:, c * 64:(c + 1) * 64])  # [32, 64]

    # --------- (conv | conv-transpose) + training-mode BN + activation --------
    def conv_bn_act(xin, layer, n_hin, n_hout, ow, act):
        # One wide matmul over the lane-concatenated taps, then 4 small R dots.
        xm = wdot(xin, mcat_ref[layer])                      # [n_hin, 4*64]
        acc = wdot(rall_ref[4 * layer][:n_hout, :n_hin], xm[:, 0:64])
        for i in range(1, 4):
            acc = acc + wdot(rall_ref[4 * layer + i][:n_hout, :n_hin],
                             xm[:, i * 64:(i + 1) * 64])     # [n_hout, 64]

        # BatchNorm over (N, H, W) per channel; single stacked-stat matmul.
        st = jnp.concatenate([acc, acc * acc], axis=0)       # [2*n_hout, 64]
        sa = wdot(st, a_ref[layer])                          # [2*n_hout, 64]
        inv_count = 1.0 / (n_hout * ow)
        mean = jnp.sum(sa[:n_hout], axis=0, keepdims=True) * inv_count
        msq = jnp.sum(sa[n_hout:], axis=0, keepdims=True) * inv_count
        var = msq - mean * mean
        scale = gb_ref[layer] * jax.lax.rsqrt(var + 1e-5)    # gamma tiled [1, 64]
        shift = gb_ref[4 + layer] - mean * scale             # beta  tiled [1, 64]
        y = acc * scale + shift

        if act == "lrelu":
            y = jnp.where(y >= 0.0, y, 0.2 * y)
        elif act == "relu":
            y = jnp.maximum(y, 0.0)
        elif act == "sigmoid":
            y = jax.nn.sigmoid(y)
        return y

    # ------------------------------- encoder --------------------------------
    h = conv_bn_act(h, 0, 32, 16, 8, "lrelu")                # [N*8,  8*8]
    h = conv_bn_act(h, 1, 16, 8, 4, None)                    # [N*4,  4*16]

    # ---------- bottleneck: flatten + merged fc1/fc2 + reparam + fc3 ---------
    fc = fc_ref[...]                                         # [96, 256]
    bias = bias_ref[...]                                     # [16, 64]

    u = wdot(h, fc[0:64])                                    # [N*4, 4*64]
    ml = wdot(sp_ref[0], u[:, 0:64])
    for hh in range(1, 4):
        ml = ml + wdot(sp_ref[hh], u[:, hh * 64:(hh + 1) * 64])  # [N, 64]
    ml = ml + bias[0:1]                                      # mu || logvar
    mlv_ref[...] = ml

    mu = ml[:, :Z_DIM]
    logvar = ml[:, Z_DIM:]
    z = mu + jnp.exp(0.5 * logvar) * eps_ref[...]            # [N, Z]  (eps is an input)

    zc = wdot(z, fc[64:96])                                  # [N, 4*64]
    d = wdot(pp_ref[0], zc[:, 0:64])
    for hh in range(1, 4):
        d = d + wdot(pp_ref[hh], zc[:, hh * 64:(hh + 1) * 64])   # [N*4, 64]
    d = d + bias[8:16]                                       # precomputed placed fc3 bias

    # ------------------------------- decoder --------------------------------
    d = conv_bn_act(d, 2, 8, 16, 8, "relu")                  # [N*8,  8*8]
    d = conv_bn_act(d, 3, 16, 32, 16, "sigmoid")             # [N*16, 16*4]

    # --------- output layout permutation: [N*H, W*C] -> [N*C*H, W] ----------
    t2 = wdot(d, moutc_ref[...])                             # [32, 64]
    o = wdot(rout_ref[0], t2[:, 0:16])
    for c in range(1, 4):
        o = o + wdot(rout_ref[c], t2[:, c * 16:(c + 1) * 16])  # [128, 16]
    recon_ref[...] = o


def vae_forward_pallas(consts, x, eps_noise):
    n, c, hgt, wid = x.shape
    # Only a contiguous (free) reshape outside the kernel; the NCHW<->[N*H, W*C]
    # permutations are done inside the kernel via constant selection matmuls.
    x1 = x.reshape(n * c * hgt, wid).astype(jnp.float32)

    vmem = pl.BlockSpec(memory_space=pltpu.MemorySpace.VMEM)
    n_inputs = 2 + len(consts)

    recon1, mlv = pl.pallas_call(
        _vae_fused_kernel,
        out_shape=(
            jax.ShapeDtypeStruct((n * c * hgt, wid), jnp.float32),   # recon, NCHW-flat
            jax.ShapeDtypeStruct((n, 2 * Z_DIM), jnp.float32),        # mu || logvar
        ),
        in_specs=[vmem] * n_inputs,
        out_specs=(vmem, vmem),
    )(x1, eps_noise.astype(jnp.float32), *consts)

    recon = recon1.reshape(n, c, hgt, wid)          # free contiguous reshape back to NCHW
    mu = mlv[:, :Z_DIM]
    logvar = mlv[:, Z_DIM:]
    return recon, mu, logvar


# ----------------------------------------------------------------------------
# Parameters (canonical PyTorch-style storage, deterministic synthetic init)
# ----------------------------------------------------------------------------
def init_params(key):
    ks = jax.random.split(key, 11)
    s = 0.1

    def nrm(k, shape):
        return (s * jax.random.normal(k, shape)).astype(jnp.float32)

    p = {
        # encoder convs (Conv2d, bias=False): [Cout, Cin, KH, KW]
        "enc_w0": nrm(ks[0], (8, 4, 4, 4)),
        "enc_w1": nrm(ks[1], (16, 8, 4, 4)),
        # decoder transposed convs (ConvTranspose2d, bias=False): [Cin, Cout, KH, KW]
        "dec_w0": nrm(ks[2], (16, 8, 4, 4)),
        "dec_w1": nrm(ks[3], (8, 4, 4, 4)),
        # fc layers stored as [in, out], bias [out]
        "fc1_w": nrm(ks[4], (H_DIM, Z_DIM)), "fc1_b": nrm(ks[5], (Z_DIM,)),
        "fc2_w": nrm(ks[6], (H_DIM, Z_DIM)), "fc2_b": nrm(ks[7], (Z_DIM,)),
        "fc3_w": nrm(ks[8], (Z_DIM, H_DIM)), "fc3_b": nrm(ks[9], (H_DIM,)),
    }
    kk = jax.random.split(ks[10], 8)
    for t, (name, c) in enumerate([("bn_e0", 8), ("bn_e1", 16), ("bn_d0", 8), ("bn_d1", 4)]):
        p[name + "_g"] = (1.0 + 0.1 * jax.random.normal(kk[2 * t], (c,))).astype(jnp.float32)
        p[name + "_b"] = (0.1 * jax.random.normal(kk[2 * t + 1], (c,))).astype(jnp.float32)
    return p


# ----------------------------------------------------------------------------
# Pure-JAX (XLA) reference with the exact module semantics (for validation)
# ----------------------------------------------------------------------------
def reference_forward(params, x, eps_noise):
    prec = jax.lax.Precision.HIGHEST

    def bn(h, g, b):
        mean = jnp.mean(h, axis=(0, 2, 3), keepdims=True)
        var = jnp.mean((h - mean) ** 2, axis=(0, 2, 3), keepdims=True)
        return (h - mean) / jnp.sqrt(var + 1e-5) * g.reshape(1, -1, 1, 1) + b.reshape(1, -1, 1, 1)

    def conv(h, w):
        return jax.lax.conv_general_dilated(
            h, w, window_strides=(2, 2), padding=[(1, 1), (1, 1)],
            dimension_numbers=("NCHW", "OIHW", "NCHW"), precision=prec)

    def convt(h, w):  # dilate + flip + swap in/out channels -> stride-1 conv
        wf = jnp.flip(w, axis=(2, 3)).transpose(1, 0, 2, 3)
        return jax.lax.conv_general_dilated(
            h, wf, window_strides=(1, 1), padding=[(2, 2), (2, 2)],
            lhs_dilation=(2, 2), dimension_numbers=("NCHW", "OIHW", "NCHW"),
            precision=prec)

    h = bn(conv(x, params["enc_w0"]), params["bn_e0_g"], params["bn_e0_b"])
    h = jnp.where(h >= 0.0, h, 0.2 * h)
    h = bn(conv(h, params["enc_w1"]), params["bn_e1_g"], params["bn_e1_b"])
    hf = h.reshape(h.shape[0], -1)
    mu = jnp.dot(hf, params["fc1_w"], precision=prec) + params["fc1_b"]
    logvar = jnp.dot(hf, params["fc2_w"], precision=prec) + params["fc2_b"]
    z = mu + jnp.exp(0.5 * logvar) * eps_noise
    d = (jnp.dot(z, params["fc3_w"], precision=prec) + params["fc3_b"]).reshape(
        z.shape[0], *UNFLATTEN)
    d = bn(convt(d, params["dec_w0"]), params["bn_d0_g"], params["bn_d0_b"])
    d = jnp.maximum(d, 0.0)
    d = bn(convt(d, params["dec_w1"]), params["bn_d1_g"], params["bn_d1_b"])
    return jax.nn.sigmoid(d), mu, logvar


# ----------------------------------------------------------------------------
# Main
# ----------------------------------------------------------------------------
if __name__ == "__main__":
    key = jax.random.PRNGKey(0)
    k_params, k_x, k_eps = jax.random.split(key, 3)

    params = init_params(k_params)
    x = jax.random.normal(k_x, (2, 4, 16, 16), dtype=jnp.float32)
    # TODO(synk): torch.randn inside reparametrize() is replaced by an explicit
    # deterministic eps input so the kernel matches the reference exactly.
    eps_noise = jax.random.normal(k_eps, (2, Z_DIM), dtype=jnp.float32)

    # Hoisted weight prep: conv->matmul selection matrices (lane-concatenated
    # taps), BN averaging matrices, merged/permuted fc weights and the folded
    # NCHW<->[N*H, W*C] permutation matrices, all built once outside the hot path.
    consts = build_vae_constants(params, n=x.shape[0])

    fwd = jax.jit(vae_forward_pallas)
    recon, mu, logvar = fwd(consts, x, eps_noise)
    jax.block_until_ready((recon, mu, logvar))

    assert recon.shape == (2, 4, 16, 16), recon.shape
    assert mu.shape == (2, Z_DIM) and logvar.shape == (2, Z_DIM)
    assert bool(jnp.all(jnp.isfinite(recon)))
    assert bool(jnp.all(recon >= 0.0)) and bool(jnp.all(recon <= 1.0))   # sigmoid output

    # Validate against the pure-JAX reference of the same module.
    r_ref, mu_r, lv_r = jax.jit(reference_forward)(params, x, eps_noise)
    jax.block_until_ready((r_ref, mu_r, lv_r))
    TOL = 5e-2
    d_recon = float(jnp.max(jnp.abs(recon - r_ref)))
    d_mu = float(jnp.max(jnp.abs(mu - mu_r)))
    d_lv = float(jnp.max(jnp.abs(logvar - lv_r)))
    assert d_recon < TOL, f"recon mismatch {d_recon}"
    assert d_mu < TOL, f"mu mismatch {d_mu}"
    assert d_lv < TOL, f"logvar mismatch {d_lv}"

    print("KERNEL_OK")
</pallas_src>

<mosaic_0001>
module attributes {stable_mosaic.version = 11 : i64} {
  func.func @_vae_fused_kernel(%arg0: memref<128x16xf32, #tpu.memory_space<vmem>>, %arg1: memref<2x32xf32, #tpu.memory_space<vmem>>, %arg2: memref<4x32x128xf32, #tpu.memory_space<vmem>>, %arg3: memref<16x256xf32, #tpu.memory_space<vmem>>, %arg4: memref<16x32x32xf32, #tpu.memory_space<vmem>>, %arg5: memref<4x64x256xf32, #tpu.memory_space<vmem>>, %arg6: memref<4x64x64xf32, #tpu.memory_space<vmem>>, %arg7: memref<8x1x64xf32, #tpu.memory_space<vmem>>, %arg8: memref<96x256xf32, #tpu.memory_space<vmem>>, %arg9: memref<16x64xf32, #tpu.memory_space<vmem>>, %arg10: memref<4x2x8xf32, #tpu.memory_space<vmem>>, %arg11: memref<4x8x2xf32, #tpu.memory_space<vmem>>, %arg12: memref<4x128x32xf32, #tpu.memory_space<vmem>>, %arg13: memref<64x64xf32, #tpu.memory_space<vmem>>, %arg14: memref<128x16xf32, #tpu.memory_space<vmem>>, %arg15: memref<2x64xf32, #tpu.memory_space<vmem>>) attributes {dimension_semantics = [], scalar_prefetch = 0 : i64, scratch_operands = 0 : i64, tpu.core_type = #tpu.core_type<tc>} {
    %c0 = arith.constant 0 : index
    %c0_0 = arith.constant 0 : index
    %0 = vector.load %arg0[%c0, %c0_0] : memref<128x16xf32, #tpu.memory_space<vmem>>, vector<128x16xf32>
    %c0_1 = arith.constant 0 : index
    %c0_2 = arith.constant 0 : index
    %1 = vector.load %arg3[%c0_1, %c0_2] : memref<16x256xf32, #tpu.memory_space<vmem>>, vector<16x256xf32>
    %cst = arith.constant dense<0.000000e+00> : vector<128x256xf32>
    %2 = tpu.matmul %0, %1, %cst {dimension_numbers = #tpu.dot_dimension_numbers<[1], [0], [0], [1], [0, 0, 1, 1], [], []>} : vector<128x16xf32>, vector<16x256xf32>, vector<128x256xf32> -> vector<128x256xf32>
    %c0_3 = arith.constant 0 : index
    %c0_4 = arith.constant 0 : index
    %c0_5 = arith.constant 0 : index
    %3 = vector.load %arg2[%c0_3, %c0_4, %c0_5] : memref<4x32x128xf32, #tpu.memory_space<vmem>>, vector<1x32x128xf32>
    %4 = vector.shape_cast %3 : vector<1x32x128xf32> to vector<32x128xf32>
    %5 = vector.extract_strided_slice %2 {offsets = [0, 0], sizes = [128, 64], strides = [1, 1]} : vector<128x256xf32> to vector<128x64xf32>
    %cst_6 = arith.constant dense<0.000000e+00> : vector<32x64xf32>
    %6 = tpu.matmul %4, %5, %cst_6 {dimension_numbers = #tpu.dot_dimension_numbers<[1], [0], [0], [1], [0, 0, 1, 1], [], []>} : vector<32x128xf32>, vector<128x64xf32>, vector<32x64xf32> -> vector<32x64xf32>
    %c1 = arith.constant 1 : index
    %c0_7 = arith.constant 0 : index
    %c0_8 = arith.constant 0 : index
    %7 = vector.load %arg2[%c1, %c0_7, %c0_8] : memref<4x32x128xf32, #tpu.memory_space<vmem>>, vector<1x32x128xf32>
    %8 = vector.shape_cast %7 : vector<1x32x128xf32> to vector<32x128xf32>
    %9 = vector.extract_strided_slice %2 {offsets = [0, 64], sizes = [128, 64], strides = [1, 1]} : vector<128x256xf32> to vector<128x64xf32>
    %cst_9 = arith.constant dense<0.000000e+00> : vector<32x64xf32>
    %10 = tpu.matmul %8, %9, %cst_9 {dimension_numbers = #tpu.dot_dimension_numbers<[1], [0], [0], [1], [0, 0, 1, 1], [], []>} : vector<32x128xf32>, vector<128x64xf32>, vector<32x64xf32> -> vector<32x64xf32>
    %11 = arith.addf %6, %10 : vector<32x64xf32>
    %c2 = arith.constant 2 : index
    %c0_10 = arith.constant 0 : index
    %c0_11 = arith.constant 0 : index
    %12 = vector.load %arg2[%c2, %c0_10, %c0_11] : memref<4x32x128xf32, #tpu.memory_space<vmem>>, vector<1x32x128xf32>
    %13 = vector.shape_cast %12 : vector<1x32x128xf32> to vector<32x128xf32>
    %14 = vector.extract_strided_slice %2 {offsets = [0, 128], sizes = [128, 64], strides = [1, 1]} : vector<128x256xf32> to vector<128x64xf32>
    %cst_12 = arith.constant dense<0.000000e+00> : vector<32x64xf32>
    %15 = tpu.matmul %13, %14, %cst_12 {dimension_numbers = #tpu.dot_dimension_numbers<[1], [0], [0], [1], [0, 0, 1, 1], [], []>} : vector<32x128xf32>, vector<128x64xf32>, vector<32x64xf32> -> vector<32x64xf32>
    %16 = arith.addf %11, %15 : vector<32x64xf32>
    %c3 = arith.constant 3 : index
    %c0_13 = arith.constant 0 : index
    %c0_14 = arith.constant 0 : index
    %17 = vector.load %arg2[%c3, %c0_13, %c0_14] : memref<4x32x128xf32, #tpu.memory_space<vmem>>, vector<1x32x128xf32>
    %18 = vector.shape_cast %17 : vector<1x32x128xf32> to vector<32x128xf32>
    %19 = vector.extract_strided_slice %2 {offsets = [0, 192], sizes = [128, 64], strides = [1, 1]} : vector<128x256xf32> to vector<128x64xf32>
    %cst_15 = arith.constant dense<0.000000e+00> : vector<32x64xf32>
    %20 = tpu.matmul %18, %19, %cst_15 {dimension_numbers = #tpu.dot_dimension_numbers<[1], [0], [0], [1], [0, 0, 1, 1], [], []>} : vector<32x128xf32>, vector<128x64xf32>, vector<32x64xf32> -> vector<32x64xf32>
    %21 = arith.addf %16, %20 : vector<32x64xf32>
    %c0_16 = arith.constant 0 : index
    %c0_17 = arith.constant 0 : index
    %c0_18 = arith.constant 0 : index
    %22 = vector.load %arg5[%c0_16, %c0_17, %c0_18] : memref<4x64x256xf32, #tpu.memory_space<vmem>>, vector<1x64x256xf32>
    %23 = vector.shape_cast %22 : vector<1x64x256xf32> to vector<64x256xf32>
    %cst_19 = arith.constant dense<0.000000e+00> : vector<32x256xf32>
    %24 = tpu.matmul %21, %23, %cst_19 {dimension_numbers = #tpu.dot_dimension_numbers<[1], [0], [0], [1], [0, 0, 1, 1], [], []>} : vector<32x64xf32>, vector<64x256xf32>, vector<32x256xf32> -> vector<32x256xf32>
    %c0_20 = arith.constant 0 : index
    %c0_21 = arith.constant 0 : index
    %c0_22 = arith.constant 0 : index
    %25 = vector.load %arg4[%c0_20, %c0_21, %c0_22] : memref<16x32x32xf32, #tpu.memory_space<vmem>>, vector<1x32x32xf32>
    %26 = vector.shape_cast %25 : vector<1x32x32xf32> to vector<32x32xf32>
    %27 = vector.extract_strided_slice %26 {offsets = [0, 0], sizes = [16, 32], strides = [1, 1]} : vector<32x32xf32> to vector<16x32xf32>
    %28 = vector.extract_strided_slice %24 {offsets = [0, 0], sizes = [32, 64], strides = [1, 1]} : vector<32x256xf32> to vector<32x64xf32>
    %cst_23 = arith.constant dense<0.000000e+00> : vector<16x64xf32>
    %29 = tpu.matmul %27, %28, %cst_23 {dimension_numbers = #tpu.dot_dimension_numbers<[1], [0], [0], [1], [0, 0, 1, 1], [], []>} : vector<16x32xf32>, vector<32x64xf32>, vector<16x64xf32> -> vector<16x64xf32>
    %c1_24 = arith.constant 1 : index
    %c0_25 = arith.constant 0 : index
    %c0_26 = arith.constant 0 : index
    %30 = vector.load %arg4[%c1_24, %c0_25, %c0_26] : memref<16x32x32xf32, #tpu.memory_space<vmem>>, vector<1x32x32xf32>
    %31 = vector.shape_cast %30 : vector<1x32x32xf32> to vector<32x32xf32>
    %32 = vector.extract_strided_slice %31 {offsets = [0, 0], sizes = [16, 32], strides = [1, 1]} : vector<32x32xf32> to vector<16x32xf32>
    %33 = vector.extract_strided_slice %24 {offsets = [0, 64], sizes = [32, 64], strides = [1, 1]} : vector<32x256xf32> to vector<32x64xf32>
    %cst_27 = arith.constant dense<0.000000e+00> : vector<16x64xf32>
    %34 = tpu.matmul %32, %33, %cst_27 {dimension_numbers = #tpu.dot_dimension_numbers<[1], [0], [0], [1], [0, 0, 1, 1], [], []>} : vector<16x32xf32>, vector<32x64xf32>, vector<16x64xf32> -> vector<16x64xf32>
    %35 = arith.addf %29, %34 : vector<16x64xf32>
    %c2_28 = arith.constant 2 : index
    %c0_29 = arith.constant 0 : index
    %c0_30 = arith.constant 0 : index
    %36 = vector.load %arg4[%c2_28, %c0_29, %c0_30] : memref<16x32x32xf32, #tpu.memory_space<vmem>>, vector<1x32x32xf32>
    %37 = vector.shape_cast %36 : vector<1x32x32xf32> to vector<32x32xf32>
    %38 = vector.extract_strided_slice %37 {offsets = [0, 0], sizes = [16, 32], strides = [1, 1]} : vector<32x32xf32> to vector<16x32xf32>
    %39 = vector.extract_strided_slice %24 {offsets = [0, 128], sizes = [32, 64], strides = [1, 1]} : vector<32x256xf32> to vector<32x64xf32>
    %cst_31 = arith.constant dense<0.000000e+00> : vector<16x64xf32>
    %40 = tpu.matmul %38, %39, %cst_31 {dimension_numbers = #tpu.dot_dimension_numbers<[1], [0], [0], [1], [0, 0, 1, 1], [], []>} : vector<16x32xf32>, vector<32x64xf32>, vector<16x64xf32> -> vector<16x64xf32>
    %41 = arith.addf %35, %40 : vector<16x64xf32>
    %c3_32 = arith.constant 3 : index
    %c0_33 = arith.constant 0 : index
    %c0_34 = arith.constant 0 : index
    %42 = vector.load %arg4[%c3_32, %c0_33, %c0_34] : memref<16x32x32xf32, #tpu.memory_space<vmem>>, vector<1x32x32xf32>
    %43 = vector.shape_cast %42 : vector<1x32x32xf32> to vector<32x32xf32>
    %44 = vector.extract_strided_slice %43 {offsets = [0, 0], sizes = [16, 32], strides = [1, 1]} : vector<32x32xf32> to vector<16x32xf32>
    %45 = vector.extract_strided_slice %24 {offsets = [0, 192], sizes = [32, 64], strides = [1, 1]} : vector<32x256xf32> to vector<32x64xf32>
    %cst_35 = arith.constant dense<0.000000e+00> : vector<16x64xf32>
    %46 = tpu.matmul %44, %45, %cst_35 {dimension_numbers = #tpu.dot_dimension_numbers<[1], [0], [0], [1], [0, 0, 1, 1], [], []>} : vector<16x32xf32>, vector<32x64xf32>, vector<16x64xf32> -> vector<16x64xf32>
    %47 = arith.addf %41, %46 : vector<16x64xf32>
    %48 = arith.mulf %47, %47 : vector<16x64xf32>
    %49 = tpu.concatenate %47, %48 in 0 : vector<16x64xf32>, vector<16x64xf32> -> vector<32x64xf32>
    %c0_36 = arith.constant 0 : index
    %c0_37 = arith.constant 0 : index
    %c0_38 = arith.constant 0 : index
    %50 = vector.load %arg6[%c0_36, %c0_37, %c0_38] : memref<4x64x64xf32, #tpu.memory_space<vmem>>, vector<1x64x64xf32>
    %51 = vector.shape_cast %50 : vector<1x64x64xf32> to vector<64x64xf32>
    %cst_39 = arith.constant dense<0.000000e+00> : vector<32x64xf32>
    %52 = tpu.matmul %49, %51, %cst_39 {dimension_numbers = #tpu.dot_dimension_numbers<[1], [0], [0], [1], [0, 0, 1, 1], [], []>} : vector<32x64xf32>, vector<64x64xf32>, vector<32x64xf32> -> vector<32x64xf32>
    %53 = vector.extract_strided_slice %52 {offsets = [0, 0], sizes = [16, 64], strides = [1, 1]} : vector<32x64xf32> to vector<16x64xf32>
    %cst_40 = arith.constant dense<0.000000e+00> : vector<64xf32>
    %54 = vector.multi_reduction <add>, %53, %cst_40 [0] : vector<16x64xf32> to vector<64xf32>
    %55 = vector.shape_cast %54 : vector<64xf32> to vector<1x64xf32>
    %cst_41 = arith.constant 7.812500e-03 : f32
    %56 = vector.broadcast %cst_41 : f32 to vector<1x64xf32>
    %57 = arith.mulf %55, %56 : vector<1x64xf32>
    %58 = vector.extract_strided_slice %52 {offsets = [16, 0], sizes = [16, 64], strides = [1, 1]} : vector<32x64xf32> to vector<16x64xf32>
    %cst_42 = arith.constant dense<0.000000e+00> : vector<64xf32>
    %59 = vector.multi_reduction <add>, %58, %cst_42 [0] : vector<16x64xf32> to vector<64xf32>
    %60 = vector.shape_cast %59 : vector<64xf32> to vector<1x64xf32>
    %cst_43 = arith.constant 7.812500e-03 : f32
    %61 = vector.broadcast %cst_43 : f32 to vector<1x64xf32>
    %62 = arith.mulf %60, %61 : vector<1x64xf32>
    %63 = arith.mulf %57, %57 : vector<1x64xf32>
    %64 = arith.subf %62, %63 : vector<1x64xf32>
    %c0_44 = arith.constant 0 : index
    %c0_45 = arith.constant 0 : index
    %c0_46 = arith.constant 0 : index
    %65 = vector.load %arg7[%c0_44, %c0_45, %c0_46] : memref<8x1x64xf32, #tpu.memory_space<vmem>>, vector<1x1x64xf32>
    %66 = vector.shape_cast %65 : vector<1x1x64xf32> to vector<1x64xf32>
    %cst_47 = arith.constant 9.99999974E-6 : f32
    %67 = vector.broadcast %cst_47 : f32 to vector<1x64xf32>
    %68 = arith.addf %64, %67 : vector<1x64xf32>
    %69 = math.rsqrt %68 : vector<1x64xf32>
    %70 = arith.mulf %66, %69 : vector<1x64xf32>
    %c4 = arith.constant 4 : index
    %c0_48 = arith.constant 0 : index
    %c0_49 = arith.constant 0 : index
    %71 = vector.load %arg7[%c4, %c0_48, %c0_49] : memref<8x1x64xf32, #tpu.memory_space<vmem>>, vector<1x1x64xf32>
    %72 = vector.shape_cast %71 : vector<1x1x64xf32> to vector<1x64xf32>
    %73 = arith.mulf %57, %70 : vector<1x64xf32>
    %74 = arith.subf %72, %73 : vector<1x64xf32>
    %75 = vector.broadcast %70 : vector<1x64xf32> to vector<16x64xf32>
    %76 = arith.mulf %47, %75 : vector<16x64xf32>
    %77 = vector.broadcast %74 : vector<1x64xf32> to vector<16x64xf32>
    %78 = arith.addf %76, %77 : vector<16x64xf32>
    %cst_50 = arith.constant 0.000000e+00 : f32
    %79 = vector.broadcast %cst_50 : f32 to vector<16x64xf32>
    %80 = arith.cmpf oge, %78, %79 : vector<16x64xf32>
    %cst_51 = arith.constant 2.000000e-01 : f32
    %81 = vector.broadcast %cst_51 : f32 to vector<16x64xf32>
    %82 = arith.mulf %81, %78 : vector<16x64xf32>
    %83 = arith.select %80, %78, %82 : vector<16x64xi1>, vector<16x64xf32>
    %c1_52 = arith.constant 1 : index
    %c0_53 = arith.constant 0 : index
    %c0_54 = arith.constant 0 : index
    %84 = vector.load %arg5[%c1_52, %c0_53, %c0_54] : memref<4x64x256xf32, #tpu.memory_space<vmem>>, vector<1x64x256xf32>
    %85 = vector.shape_cast %84 : vector<1x64x256xf32> to vector<64x256xf32>
    %cst_55 = arith.constant dense<0.000000e+00> : vector<16x256xf32>
    %86 = tpu.matmul %83, %85, %cst_55 {dimension_numbers = #tpu.dot_dimension_numbers<[1], [0], [0], [1], [0, 0, 1, 1], [], []>} : vector<16x64xf32>, vector<64x256xf32>, vector<16x256xf32> -> vector<16x256xf32>
    %c4_56 = arith.constant 4 : index
    %c0_57 = arith.constant 0 : index
    %c0_58 = arith.constant 0 : index
    %87 = vector.load %arg4[%c4_56, %c0_57, %c0_58] : memref<16x32x32xf32, #tpu.memory_space<vmem>>, vector<1x32x32xf32>
    %88 = vector.shape_cast %87 : vector<1x32x32xf32> to vector<32x32xf32>
    %89 = vector.extract_strided_slice %88 {offsets = [0, 0], sizes = [8, 16], strides = [1, 1]} : vector<32x32xf32> to vector<8x16xf32>
    %90 = vector.extract_strided_slice %86 {offsets = [0, 0], sizes = [16, 64], strides = [1, 1]} : vector<16x256xf32> to vector<16x64xf32>
    %cst_59 = arith.constant dense<0.000000e+00> : vector<8x64xf32>
    %91 = tpu.matmul %89, %90, %cst_59 {dimension_numbers = #tpu.dot_dimension_numbers<[1], [0], [0], [1], [0, 0, 1, 1], [], []>} : vector<8x16xf32>, vector<16x64xf32>, vector<8x64xf32> -> vector<8x64xf32>
    %c5 = arith.constant 5 : index
    %c0_60 = arith.constant 0 : index
    %c0_61 = arith.constant 0 : index
    %92 = vector.load %arg4[%c5, %c0_60, %c0_61] : memref<16x32x32xf32, #tpu.memory_space<vmem>>, vector<1x32x32xf32>
    %93 = vector.shape_cast %92 : vector<1x32x32xf32> to vector<32x32xf32>
    %94 = vector.extract_strided_slice %93 {offsets = [0, 0], sizes = [8, 16], strides = [1, 1]} : vector<32x32xf32> to vector<8x16xf32>
    %95 = vector.extract_strided_slice %86 {offsets = [0, 64], sizes = [16, 64], strides = [1, 1]} : vector<16x256xf32> to vector<16x64xf32>
    %cst_62 = arith.constant dense<0.000000e+00> : vector<8x64xf32>
    %96 = tpu.matmul %94, %95, %cst_62 {dimension_numbers = #tpu.dot_dimension_numbers<[1], [0], [0], [1], [0, 0, 1, 1], [], []>} : vector<8x16xf32>, vector<16x64xf32>, vector<8x64xf32> -> vector<8x64xf32>
    %97 = arith.addf %91, %96 : vector<8x64xf32>
    %c6 = arith.constant 6 : index
    %c0_63 = arith.constant 0 : index
    %c0_64 = arith.constant 0 : index
    %98 = vector.load %arg4[%c6, %c0_63, %c0_64] : memref<16x32x32xf32, #tpu.memory_space<vmem>>, vector<1x32x32xf32>
    %99 = vector.shape_cast %98 : vector<1x32x32xf32> to vector<32x32xf32>
    %100 = vector.extract_strided_slice %99 {offsets = [0, 0], sizes = [8, 16], strides = [1, 1]} : vector<32x32xf32> to vector<8x16xf32>
    %101 = vector.extract_strided_slice %86 {offsets = [0, 128], sizes = [16, 64], strides = [1, 1]} : vector<16x256xf32> to vector<16x64xf32>
    %cst_65 = arith.constant dense<0.000000e+00> : vector<8x64xf32>
    %102 = tpu.matmul %100, %101, %cst_65 {dimension_numbers = #tpu.dot_dimension_numbers<[1], [0], [0], [1], [0, 0, 1, 1], [], []>} : vector<8x16xf32>, vector<16x64xf32>, vector<8x64xf32> -> vector<8x64xf32>
    %103 = arith.addf %97, %102 : vector<8x64xf32>
    %c7 = arith.constant 7 : index
    %c0_66 = arith.constant 0 : index
    %c0_67 = arith.constant 0 : index
    %104 = vector.load %arg4[%c7, %c0_66, %c0_67] : memref<16x32x32xf32, #tpu.memory_space<vmem>>, vector<1x32x32xf32>
    %105 = vector.shape_cast %104 : vector<1x32x32xf32> to vector<32x32xf32>
    %106 = vector.extract_strided_slice %105 {offsets = [0, 0], sizes = [8, 16], strides = [1, 1]} : vector<32x32xf32> to vector<8x16xf32>
    %107 = vector.extract_strided_slice %86 {offsets = [0, 192], sizes = [16, 64], strides = [1, 1]} : vector<16x256xf32> to vector<16x64xf32>
    %cst_68 = arith.constant dense<0.000000e+00> : vector<8x64xf32>
    %108 = tpu.matmul %106, %107, %cst_68 {dimension_numbers = #tpu.dot_dimension_numbers<[1], [0], [0], [1], [0, 0, 1, 1], [], []>} : vector<8x16xf32>, vector<16x64xf32>, vector<8x64xf32> -> vector<8x64xf32>
    %109 = arith.addf %103, %108 : vector<8x64xf32>
    %110 = arith.mulf %109, %109 : vector<8x64xf32>
    %111 = tpu.concatenate %109, %110 in 0 : vector<8x64xf32>, vector<8x64xf32> -> vector<16x64xf32>
    %c1_69 = arith.constant 1 : index
    %c0_70 = arith.constant 0 : index
    %c0_71 = arith.constant 0 : index
    %112 = vector.load %arg6[%c1_69, %c0_70, %c0_71] : memref<4x64x64xf32, #tpu.memory_space<vmem>>, vector<1x64x64xf32>
    %113 = vector.shape_cast %112 : vector<1x64x64xf32> to vector<64x64xf32>
    %cst_72 = arith.constant dense<0.000000e+00> : vector<16x64xf32>
    %114 = tpu.matmul %111, %113, %cst_72 {dimension_numbers = #tpu.dot_dimension_numbers<[1], [0], [0], [1], [0, 0, 1, 1], [], []>} : vector<16x64xf32>, vector<64x64xf32>, vector<16x64xf32> -> vector<16x64xf32>
    %115 = vector.extract_strided_slice %114 {offsets = [0, 0], sizes = [8, 64], strides = [1, 1]} : vector<16x64xf32> to vector<8x64xf32>
    %cst_73 = arith.constant dense<0.000000e+00> : vector<64xf32>
    %116 = vector.multi_reduction <add>, %115, %cst_73 [0] : vector<8x64xf32> to vector<64xf32>
    %117 = vector.shape_cast %116 : vector<64xf32> to vector<1x64xf32>
    %cst_74 = arith.constant 3.125000e-02 : f32
    %118 = vector.broadcast %cst_74 : f32 to vector<1x64xf32>
    %119 = arith.mulf %117, %118 : vector<1x64xf32>
    %120 = vector.extract_strided_slice %114 {offsets = [8, 0], sizes = [8, 64], strides = [1, 1]} : vector<16x64xf32> to vector<8x64xf32>
    %cst_75 = arith.constant dense<0.000000e+00> : vector<64xf32>
    %121 = vector.multi_reduction <add>, %120, %cst_75 [0] : vector<8x64xf32> to vector<64xf32>
    %122 = vector.shape_cast %121 : vector<64xf32> to vector<1x64xf32>
    %cst_76 = arith.constant 3.125000e-02 : f32
    %123 = vector.broadcast %cst_76 : f32 to vector<1x64xf32>
    %124 = arith.mulf %122, %123 : vector<1x64xf32>
    %125 = arith.mulf %119, %119 : vector<1x64xf32>
    %126 = arith.subf %124, %125 : vector<1x64xf32>
    %c1_77 = arith.constant 1 : index
    %c0_78 = arith.constant 0 : index
    %c0_79 = arith.constant 0 : index
    %127 = vector.load %arg7[%c1_77, %c0_78, %c0_79] : memref<8x1x64xf32, #tpu.memory_space<vmem>>, vector<1x1x64xf32>
    %128 = vector.shape_cast %127 : vector<1x1x64xf32> to vector<1x64xf32>
    %cst_80 = arith.constant 9.99999974E-6 : f32
    %129 = vector.broadcast %cst_80 : f32 to vector<1x64xf32>
    %130 = arith.addf %126, %129 : vector<1x64xf32>
    %131 = math.rsqrt %130 : vector<1x64xf32>
    %132 = arith.mulf %128, %131 : vector<1x64xf32>
    %c5_81 = arith.constant 5 : index
    %c0_82 = arith.constant 0 : index
    %c0_83 = arith.constant 0 : index
    %133 = vector.load %arg7[%c5_81, %c0_82, %c0_83] : memref<8x1x64xf32, #tpu.memory_space<vmem>>, vector<1x1x64xf32>
    %134 = vector.shape_cast %133 : vector<1x1x64xf32> to vector<1x64xf32>
    %135 = arith.mulf %119, %132 : vector<1x64xf32>
    %136 = arith.subf %134, %135 : vector<1x64xf32>
    %137 = vector.broadcast %132 : vector<1x64xf32> to vector<8x64xf32>
    %138 = arith.mulf %109, %137 : vector<8x64xf32>
    %139 = vector.broadcast %136 : vector<1x64xf32> to vector<8x64xf32>
    %140 = arith.addf %138, %139 : vector<8x64xf32>
    %c0_84 = arith.constant 0 : index
    %c0_85 = arith.constant 0 : index
    %141 = vector.load %arg8[%c0_84, %c0_85] : memref<96x256xf32, #tpu.memory_space<vmem>>, vector<96x256xf32>
    %c0_86 = arith.constant 0 : index
    %c0_87 = arith.constant 0 : index
    %142 = vector.load %arg9[%c0_86, %c0_87] : memref<16x64xf32, #tpu.memory_space<vmem>>, vector<16x64xf32>
    %143 = vector.extract_strided_slice %141 {offsets = [0, 0], sizes = [64, 256], strides = [1, 1]} : vector<96x256xf32> to vector<64x256xf32>
    %cst_88 = arith.constant dense<0.000000e+00> : vector<8x256xf32>
    %144 = tpu.matmul %140, %143, %cst_88 {dimension_numbers = #tpu.dot_dimension_numbers<[1], [0], [0], [1], [0, 0, 1, 1], [], []>} : vector<8x64xf32>, vector<64x256xf32>, vector<8x256xf32> -> vector<8x256xf32>
    %c0_89 = arith.constant 0 : index
    %c0_90 = arith.constant 0 : index
    %c0_91 = arith.constant 0 : index
    %145 = vector.load %arg10[%c0_89, %c0_90, %c0_91] : memref<4x2x8xf32, #tpu.memory_space<vmem>>, vector<1x2x8xf32>
    %146 = vector.shape_cast %145 : vector<1x2x8xf32> to vector<2x8xf32>
    %147 = vector.extract_strided_slice %144 {offsets = [0, 0], sizes = [8, 64], strides = [1, 1]} : vector<8x256xf32> to vector<8x64xf32>
    %cst_92 = arith.constant dense<0.000000e+00> : vector<2x64xf32>
    %148 = tpu.matmul %146, %147, %cst_92 {dimension_numbers = #tpu.dot_dimension_numbers<[1], [0], [0], [1], [0, 0, 1, 1], [], []>} : vector<2x8xf32>, vector<8x64xf32>, vector<2x64xf32> -> vector<2x64xf32>
    %c1_93 = arith.constant 1 : index
    %c0_94 = arith.constant 0 : index
    %c0_95 = arith.constant 0 : index
    %149 = vector.load %arg10[%c1_93, %c0_94, %c0_95] : memref<4x2x8xf32, #tpu.memory_space<vmem>>, vector<1x2x8xf32>
    %150 = vector.shape_cast %149 : vector<1x2x8xf32> to vector<2x8xf32>
    %151 = vector.extract_strided_slice %144 {offsets = [0, 64], sizes = [8, 64], strides = [1, 1]} : vector<8x256xf32> to vector<8x64xf32>
    %cst_96 = arith.constant dense<0.000000e+00> : vector<2x64xf32>
    %152 = tpu.matmul %150, %151, %cst_96 {dimension_numbers = #tpu.dot_dimension_numbers<[1], [0], [0], [1], [0, 0, 1, 1], [], []>} : vector<2x8xf32>, vector<8x64xf32>, vector<2x64xf32> -> vector<2x64xf32>
    %153 = arith.addf %148, %152 : vector<2x64xf32>
    %c2_97 = arith.constant 2 : index
    %c0_98 = arith.constant 0 : index
    %c0_99 = arith.constant 0 : index
    %154 = vector.load %arg10[%c2_97, %c0_98, %c0_99] : memref<4x2x8xf32, #tpu.memory_space<vmem>>, vector<1x2x8xf32>
    %155 = vector.shape_cast %154 : vector<1x2x8xf32> to vector<2x8xf32>
    %156 = vector.extract_strided_slice %144 {offsets = [0, 128], sizes = [8, 64], strides = [1, 1]} : vector<8x256xf32> to vector<8x64xf32>
    %cst_100 = arith.constant dense<0.000000e+00> : vector<2x64xf32>
    %157 = tpu.matmul %155, %156, %cst_100 {dimension_numbers = #tpu.dot_dimension_numbers<[1], [0], [0], [1], [0, 0, 1, 1], [], []>} : vector<2x8xf32>, vector<8x64xf32>, vector<2x64xf32> -> vector<2x64xf32>
    %158 = arith.addf %153, %157 : vector<2x64xf32>
    %c3_101 = arith.constant 3 : index
    %c0_102 = arith.constant 0 : index
    %c0_103 = arith.constant 0 : index
    %159 = vector.load %arg10[%c3_101, %c0_102, %c0_103] : memref<4x2x8xf32, #tpu.memory_space<vmem>>, vector<1x2x8xf32>
    %160 = vector.shape_cast %159 : vector<1x2x8xf32> to vector<2x8xf32>
    %161 = vector.extract_strided_slice %144 {offsets = [0, 192], sizes = [8, 64], strides = [1, 1]} : vector<8x256xf32> to vector<8x64xf32>
    %cst_104 = arith.constant dense<0.000000e+00> : vector<2x64xf32>
    %162 = tpu.matmul %160, %161, %cst_104 {dimension_numbers = #tpu.dot_dimension_numbers<[1], [0], [0], [1], [0, 0, 1, 1], [], []>} : vector<2x8xf32>, vector<8x64xf32>, vector<2x64xf32> -> vector<2x64xf32>
    %163 = arith.addf %158, %162 : vector<2x64xf32>
    %164 = vector.extract_strided_slice %142 {offsets = [0, 0], sizes = [1, 64], strides = [1, 1]} : vector<16x64xf32> to vector<1x64xf32>
    %165 = vector.broadcast %164 : vector<1x64xf32> to vector<2x64xf32>
    %166 = arith.addf %163, %165 : vector<2x64xf32>
    %c0_105 = arith.constant 0 : index
    %c0_106 = arith.constant 0 : index
    %167 = vector.load %arg15[%c0_105, %c0_106] : memref<2x64xf32, #tpu.memory_space<vmem>>, vector<2x64xf32>
    tpu.vector_store %arg15[%c0_105, %c0_106], %166 {strides = array<i32>} : memref<2x64xf32, #tpu.memory_space<vmem>>, vector<2x64xf32>,
    %168 = vector.extract_strided_slice %166 {offsets = [0, 0], sizes = [2, 32], strides = [1, 1]} : vector<2x64xf32> to vector<2x32xf32>
    %169 = vector.extract_strided_slice %166 {offsets = [0, 32], sizes = [2, 32], strides = [1, 1]} : vector<2x64xf32> to vector<2x32xf32>
    %cst_107 = arith.constant 5.000000e-01 : f32
    %170 = vector.broadcast %cst_107 : f32 to vector<2x32xf32>
    %171 = arith.mulf %170, %169 : vector<2x32xf32>
    %172 = math.exp %171 : vector<2x32xf32>
    %c0_108 = arith.constant 0 : index
    %c0_109 = arith.constant 0 : index
    %173 = vector.load %arg1[%c0_108, %c0_109] : memref<2x32xf32, #tpu.memory_space<vmem>>, vector<2x32xf32>
    %174 = arith.mulf %172, %173 : vector<2x32xf32>
    %175 = arith.addf %168, %174 : vector<2x32xf32>
    %176 = vector.extract_strided_slice %141 {offsets = [64, 0], sizes = [32, 256], strides = [1, 1]} : vector<96x256xf32> to vector<32x256xf32>
    %cst_110 = arith.constant dense<0.000000e+00> : vector<2x256xf32>
    %177 = tpu.matmul %175, %176, %cst_110 {dimension_numbers = #tpu.dot_dimension_numbers<[1], [0], [0], [1], [0, 0, 1, 1], [], []>} : vector<2x32xf32>, vector<32x256xf32>, vector<2x256xf32> -> vector<2x256xf32>
    %c0_111 = arith.constant 0 : index
    %c0_112 = arith.constant 0 : index
    %c0_113 = arith.constant 0 : index
    %178 = vector.load %arg11[%c0_111, %c0_112, %c0_113] : memref<4x8x2xf32, #tpu.memory_space<vmem>>, vector<1x8x2xf32>
    %179 = vector.shape_cast %178 : vector<1x8x2xf32> to vector<8x2xf32>
    %180 = vector.extract_strided_slice %177 {offsets = [0, 0], sizes = [2, 64], strides = [1, 1]} : vector<2x256xf32> to vector<2x64xf32>
    %cst_114 = arith.constant dense<0.000000e+00> : vector<8x64xf32>
    %181 = tpu.matmul %179, %180, %cst_114 {dimension_numbers = #tpu.dot_dimension_numbers<[1], [0], [0], [1], [0, 0, 1, 1], [], []>} : vector<8x2xf32>, vector<2x64xf32>, vector<8x64xf32> -> vector<8x64xf32>
    %c1_115 = arith.constant 1 : index
    %c0_116 = arith.constant 0 : index
    %c0_117 = arith.constant 0 : index
    %182 = vector.load %arg11[%c1_115, %c0_116, %c0_117] : memref<4x8x2xf32, #tpu.memory_space<vmem>>, vector<1x8x2xf32>
    %183 = vector.shape_cast %182 : vector<1x8x2xf32> to vector<8x2xf32>
    %184 = vector.extract_strided_slice %177 {offsets = [0, 64], sizes = [2, 64], strides = [1, 1]} : vector<2x256xf32> to vector<2x64xf32>
    %cst_118 = arith.constant dense<0.000000e+00> : vector<8x64xf32>
    %185 = tpu.matmul %183, %184, %cst_118 {dimension_numbers = #tpu.dot_dimension_numbers<[1], [0], [0], [1], [0, 0, 1, 1], [], []>} : vector<8x2xf32>, vector<2x64xf32>, vector<8x64xf32> -> vector<8x64xf32>
    %186 = arith.addf %181, %185 : vector<8x64xf32>
    %c2_119 = arith.constant 2 : index
    %c0_120 = arith.constant 0 : index
    %c0_121 = arith.constant 0 : index
    %187 = vector.load %arg11[%c2_119, %c0_120, %c0_121] : memref<4x8x2xf32, #tpu.memory_space<vmem>>, vector<1x8x2xf32>
    %188 = vector.shape_cast %187 : vector<1x8x2xf32> to vector<8x2xf32>
    %189 = vector.extract_strided_slice %177 {offsets = [0, 128], sizes = [2, 64], strides = [1, 1]} : vector<2x256xf32> to vector<2x64xf32>
    %cst_122 = arith.constant dense<0.000000e+00> : vector<8x64xf32>
    %190 = tpu.matmul %188, %189, %cst_122 {dimension_numbers = #tpu.dot_dimension_numbers<[1], [0], [0], [1], [0, 0, 1, 1], [], []>} : vector<8x2xf32>, vector<2x64xf32>, vector<8x64xf32> -> vector<8x64xf32>
    %191 = arith.addf %186, %190 : vector<8x64xf32>
    %c3_123 = arith.constant 3 : index
    %c0_124 = arith.constant 0 : index
    %c0_125 = arith.constant 0 : index
    %192 = vector.load %arg11[%c3_123, %c0_124, %c0_125] : memref<4x8x2xf32, #tpu.memory_space<vmem>>, vector<1x8x2xf32>
    %193 = vector.shape_cast %192 : vector<1x8x2xf32> to vector<8x2xf32>
    %194 = vector.extract_strided_slice %177 {offsets = [0, 192], sizes = [2, 64], strides = [1, 1]} : vector<2x256xf32> to vector<2x64xf32>
    %cst_126 = arith.constant dense<0.000000e+00> : vector<8x64xf32>
    %195 = tpu.matmul %193, %194, %cst_126 {dimension_numbers = #tpu.dot_dimension_numbers<[1], [0], [0], [1], [0, 0, 1, 1], [], []>} : vector<8x2xf32>, vector<2x64xf32>, vector<8x64xf32> -> vector<8x64xf32>
    %196 = arith.addf %191, %195 : vector<8x64xf32>
    %197 = vector.extract_strided_slice %142 {offsets = [8, 0], sizes = [8, 64], strides = [1, 1]} : vector<16x64xf32> to vector<8x64xf32>
    %198 = arith.addf %196, %197 : vector<8x64xf32>
    %c2_127 = arith.constant 2 : index
    %c0_128 = arith.constant 0 : index
    %c0_129 = arith.constant 0 : index
    %199 = vector.load %arg5[%c2_127, %c0_128, %c0_129] : memref<4x64x256xf32, #tpu.memory_space<vmem>>, vector<1x64x256xf32>
    %200 = vector.shape_cast %199 : vector<1x64x256xf32> to vector<64x256xf32>
    %cst_130 = arith.constant dense<0.000000e+00> : vector<8x256xf32>
    %201 = tpu.matmul %198, %200, %cst_130 {dimension_numbers = #tpu.dot_dimension_numbers<[1], [0], [0], [1], [0, 0, 1, 1], [], []>} : vector<8x64xf32>, vector<64x256xf32>, vector<8x256xf32> -> vector<8x256xf32>
    %c8 = arith.constant 8 : index
    %c0_131 = arith.constant 0 : index
    %c0_132 = arith.constant 0 : index
    %202 = vector.load %arg4[%c8, %c0_131, %c0_132] : memref<16x32x32xf32, #tpu.memory_space<vmem>>, vector<1x32x32xf32>
    %203 = vector.shape_cast %202 : vector<1x32x32xf32> to vector<32x32xf32>
    %204 = vector.extract_strided_slice %203 {offsets = [0, 0], sizes = [16, 8], strides = [1, 1]} : vector<32x32xf32> to vector<16x8xf32>
    %205 = vector.extract_strided_slice %201 {offsets = [0, 0], sizes = [8, 64], strides = [1, 1]} : vector<8x256xf32> to vector<8x64xf32>
    %cst_133 = arith.constant dense<0.000000e+00> : vector<16x64xf32>
    %206 = tpu.matmul %204, %205, %cst_133 {dimension_numbers = #tpu.dot_dimension_numbers<[1], [0], [0], [1], [0, 0, 1, 1], [], []>} : vector<16x8xf32>, vector<8x64xf32>, vector<16x64xf32> -> vector<16x64xf32>
    %c9 = arith.constant 9 : index
    %c0_134 = arith.constant 0 : index
    %c0_135 = arith.constant 0 : index
    %207 = vector.load %arg4[%c9, %c0_134, %c0_135] : memref<16x32x32xf32, #tpu.memory_space<vmem>>, vector<1x32x32xf32>
    %208 = vector.shape_cast %207 : vector<1x32x32xf32> to vector<32x32xf32>
    %209 = vector.extract_strided_slice %208 {offsets = [0, 0], sizes = [16, 8], strides = [1, 1]} : vector<32x32xf32> to vector<16x8xf32>
    %210 = vector.extract_strided_slice %201 {offsets = [0, 64], sizes = [8, 64], strides = [1, 1]} : vector<8x256xf32> to vector<8x64xf32>
    %cst_136 = arith.constant dense<0.000000e+00> : vector<16x64xf32>
    %211 = tpu.matmul %209, %210, %cst_136 {dimension_numbers = #tpu.dot_dimension_numbers<[1], [0], [0], [1], [0, 0, 1, 1], [], []>} : vector<16x8xf32>, vector<8x64xf32>, vector<16x64xf32> -> vector<16x64xf32>
    %212 = arith.addf %206, %211 : vector<16x64xf32>
    %c10 = arith.constant 10 : index
    %c0_137 = arith.constant 0 : index
    %c0_138 = arith.constant 0 : index
    %213 = vector.load %arg4[%c10, %c0_137, %c0_138] : memref<16x32x32xf32, #tpu.memory_space<vmem>>, vector<1x32x32xf32>
    %214 = vector.shape_cast %213 : vector<1x32x32xf32> to vector<32x32xf32>
    %215 = vector.extract_strided_slice %214 {offsets = [0, 0], sizes = [16, 8], strides = [1, 1]} : vector<32x32xf32> to vector<16x8xf32>
    %216 = vector.extract_strided_slice %201 {offsets = [0, 128], sizes = [8, 64], strides = [1, 1]} : vector<8x256xf32> to vector<8x64xf32>
    %cst_139 = arith.constant dense<0.000000e+00> : vector<16x64xf32>
    %217 = tpu.matmul %215, %216, %cst_139 {dimension_numbers = #tpu.dot_dimension_numbers<[1], [0], [0], [1], [0, 0, 1, 1], [], []>} : vector<16x8xf32>, vector<8x64xf32>, vector<16x64xf32> -> vector<16x64xf32>
    %218 = arith.addf %212, %217 : vector<16x64xf32>
    %c11 = arith.constant 11 : index
    %c0_140 = arith.constant 0 : index
    %c0_141 = arith.constant 0 : index
    %219 = vector.load %arg4[%c11, %c0_140, %c0_141] : memref<16x32x32xf32, #tpu.memory_space<vmem>>, vector<1x32x32xf32>
    %220 = vector.shape_cast %219 : vector<1x32x32xf32> to vector<32x32xf32>
    %221 = vector.extract_strided_slice %220 {offsets = [0, 0], sizes = [16, 8], strides = [1, 1]} : vector<32x32xf32> to vector<16x8xf32>
    %222 = vector.extract_strided_slice %201 {offsets = [0, 192], sizes = [8, 64], strides = [1, 1]} : vector<8x256xf32> to vector<8x64xf32>
    %cst_142 = arith.constant dense<0.000000e+00> : vector<16x64xf32>
    %223 = tpu.matmul %221, %222, %cst_142 {dimension_numbers = #tpu.dot_dimension_numbers<[1], [0], [0], [1], [0, 0, 1, 1], [], []>} : vector<16x8xf32>, vector<8x64xf32>, vector<16x64xf32> -> vector<16x64xf32>
    %224 = arith.addf %218, %223 : vector<16x64xf32>
    %225 = arith.mulf %224, %224 : vector<16x64xf32>
    %226 = tpu.concatenate %224, %225 in 0 : vector<16x64xf32>, vector<16x64xf32> -> vector<32x64xf32>
    %c2_143 = arith.constant 2 : index
    %c0_144 = arith.constant 0 : index
    %c0_145 = arith.constant 0 : index
    %227 = vector.load %arg6[%c2_143, %c0_144, %c0_145] : memref<4x64x64xf32, #tpu.memory_space<vmem>>, vector<1x64x64xf32>
    %228 = vector.shape_cast %227 : vector<1x64x64xf32> to vector<64x64xf32>
    %cst_146 = arith.constant dense<0.000000e+00> : vector<32x64xf32>
    %229 = tpu.matmul %226, %228, %cst_146 {dimension_numbers = #tpu.dot_dimension_numbers<[1], [0], [0], [1], [0, 0, 1, 1], [], []>} : vector<32x64xf32>, vector<64x64xf32>, vector<32x64xf32> -> vector<32x64xf32>
    %230 = vector.extract_strided_slice %229 {offsets = [0, 0], sizes = [16, 64], strides = [1, 1]} : vector<32x64xf32> to vector<16x64xf32>
    %cst_147 = arith.constant dense<0.000000e+00> : vector<64xf32>
    %231 = vector.multi_reduction <add>, %230, %cst_147 [0] : vector<16x64xf32> to vector<64xf32>
    %232 = vector.shape_cast %231 : vector<64xf32> to vector<1x64xf32>
    %cst_148 = arith.constant 7.812500e-03 : f32
    %233 = vector.broadcast %cst_148 : f32 to vector<1x64xf32>
    %234 = arith.mulf %232, %233 : vector<1x64xf32>
    %235 = vector.extract_strided_slice %229 {offsets = [16, 0], sizes = [16, 64], strides = [1, 1]} : vector<32x64xf32> to vector<16x64xf32>
    %cst_149 = arith.constant dense<0.000000e+00> : vector<64xf32>
    %236 = vector.multi_reduction <add>, %235, %cst_149 [0] : vector<16x64xf32> to vector<64xf32>
    %237 = vector.shape_cast %236 : vector<64xf32> to vector<1x64xf32>
    %cst_150 = arith.constant 7.812500e-03 : f32
    %238 = vector.broadcast %cst_150 : f32 to vector<1x64xf32>
    %239 = arith.mulf %237, %238 : vector<1x64xf32>
    %240 = arith.mulf %234, %234 : vector<1x64xf32>
    %241 = arith.subf %239, %240 : vector<1x64xf32>
    %c2_151 = arith.constant 2 : index
    %c0_152 = arith.constant 0 : index
    %c0_153 = arith.constant 0 : index
    %242 = vector.load %arg7[%c2_151, %c0_152, %c0_153] : memref<8x1x64xf32, #tpu.memory_space<vmem>>, vector<1x1x64xf32>
    %243 = vector.shape_cast %242 : vector<1x1x64xf32> to vector<1x64xf32>
    %cst_154 = arith.constant 9.99999974E-6 : f32
    %244 = vector.broadcast %cst_154 : f32 to vector<1x64xf32>
    %245 = arith.addf %241, %244 : vector<1x64xf32>
    %246 = math.rsqrt %245 : vector<1x64xf32>
    %247 = arith.mulf %243, %246 : vector<1x64xf32>
    %c6_155 = arith.constant 6 : index
    %c0_156 = arith.constant 0 : index
    %c0_157 = arith.constant 0 : index
    %248 = vector.load %arg7[%c6_155, %c0_156, %c0_157] : memref<8x1x64xf32, #tpu.memory_space<vmem>>, vector<1x1x64xf32>
    %249 = vector.shape_cast %248 : vector<1x1x64xf32> to vector<1x64xf32>
    %250 = arith.mulf %234, %247 : vector<1x64xf32>
    %251 = arith.subf %249, %250 : vector<1x64xf32>
    %252 = vector.broadcast %247 : vector<1x64xf32> to vector<16x64xf32>
    %253 = arith.mulf %224, %252 : vector<16x64xf32>
    %254 = vector.broadcast %251 : vector<1x64xf32> to vector<16x64xf32>
    %255 = arith.addf %253, %254 : vector<16x64xf32>
    %cst_158 = arith.constant 0.000000e+00 : f32
    %256 = vector.broadcast %cst_158 : f32 to vector<16x64xf32>
    %257 = arith.maximumf %255, %256 : vector<16x64xf32>
    %c3_159 = arith.constant 3 : index
    %c0_160 = arith.constant 0 : index
    %c0_161 = arith.constant 0 : index
    %258 = vector.load %arg5[%c3_159, %c0_160, %c0_161] : memref<4x64x256xf32, #tpu.memory_space<vmem>>, vector<1x64x256xf32>
    %259 = vector.shape_cast %258 : vector<1x64x256xf32> to vector<64x256xf32>
    %cst_162 = arith.constant dense<0.000000e+00> : vector<16x256xf32>
    %260 = tpu.matmul %257, %259, %cst_162 {dimension_numbers = #tpu.dot_dimension_numbers<[1], [0], [0], [1], [0, 0, 1, 1], [], []>} : vector<16x64xf32>, vector<64x256xf32>, vector<16x256xf32> -> vector<16x256xf32>
    %c12 = arith.constant 12 : index
    %c0_163 = arith.constant 0 : index
    %c0_164 = arith.constant 0 : index
    %261 = vector.load %arg4[%c12, %c0_163, %c0_164] : memref<16x32x32xf32, #tpu.memory_space<vmem>>, vector<1x32x32xf32>
    %262 = vector.shape_cast %261 : vector<1x32x32xf32> to vector<32x32xf32>
    %263 = vector.extract_strided_slice %262 {offsets = [0, 0], sizes = [32, 16], strides = [1, 1]} : vector<32x32xf32> to vector<32x16xf32>
    %264 = vector.extract_strided_slice %260 {offsets = [0, 0], sizes = [16, 64], strides = [1, 1]} : vector<16x256xf32> to vector<16x64xf32>
    %cst_165 = arith.constant dense<0.000000e+00> : vector<32x64xf32>
    %265 = tpu.matmul %263, %264, %cst_165 {dimension_numbers = #tpu.dot_dimension_numbers<[1], [0], [0], [1], [0, 0, 1, 1], [], []>} : vector<32x16xf32>, vector<16x64xf32>, vector<32x64xf32> -> vector<32x64xf32>
    %c13 = arith.constant 13 : index
    %c0_166 = arith.constant 0 : index
    %c0_167 = arith.constant 0 : index
    %266 = vector.load %arg4[%c13, %c0_166, %c0_167] : memref<16x32x32xf32, #tpu.memory_space<vmem>>, vector<1x32x32xf32>
    %267 = vector.shape_cast %266 : vector<1x32x32xf32> to vector<32x32xf32>
    %268 = vector.extract_strided_slice %267 {offsets = [0, 0], sizes = [32, 16], strides = [1, 1]} : vector<32x32xf32> to vector<32x16xf32>
    %269 = vector.extract_strided_slice %260 {offsets = [0, 64], sizes = [16, 64], strides = [1, 1]} : vector<16x256xf32> to vector<16x64xf32>
    %cst_168 = arith.constant dense<0.000000e+00> : vector<32x64xf32>
    %270 = tpu.matmul %268, %269, %cst_168 {dimension_numbers = #tpu.dot_dimension_numbers<[1], [0], [0], [1], [0, 0, 1, 1], [], []>} : vector<32x16xf32>, vector<16x64xf32>, vector<32x64xf32> -> vector<32x64xf32>
    %271 = arith.addf %265, %270 : vector<32x64xf32>
    %c14 = arith.constant 14 : index
    %c0_169 = arith.constant 0 : index
    %c0_170 = arith.constant 0 : index
    %272 = vector.load %arg4[%c14, %c0_169, %c0_170] : memref<16x32x32xf32, #tpu.memory_space<vmem>>, vector<1x32x32xf32>
    %273 = vector.shape_cast %272 : vector<1x32x32xf32> to vector<32x32xf32>
    %274 = vector.extract_strided_slice %273 {offsets = [0, 0], sizes = [32, 16], strides = [1, 1]} : vector<32x32xf32> to vector<32x16xf32>
    %275 = vector.extract_strided_slice %260 {offsets = [0, 128], sizes = [16, 64], strides = [1, 1]} : vector<16x256xf32> to vector<16x64xf32>
    %cst_171 = arith.constant dense<0.000000e+00> : vector<32x64xf32>
    %276 = tpu.matmul %274, %275, %cst_171 {dimension_numbers = #tpu.dot_dimension_numbers<[1], [0], [0], [1], [0, 0, 1, 1], [], []>} : vector<32x16xf32>, vector<16x64xf32>, vector<32x64xf32> -> vector<32x64xf32>
    %277 = arith.addf %271, %276 : vector<32x64xf32>
    %c15 = arith.constant 15 : index
    %c0_172 = arith.constant 0 : index
    %c0_173 = arith.constant 0 : index
    %278 = vector.load %arg4[%c15, %c0_172, %c0_173] : memref<16x32x32xf32, #tpu.memory_space<vmem>>, vector<1x32x32xf32>
    %279 = vector.shape_cast %278 : vector<1x32x32xf32> to vector<32x32xf32>
    %280 = vector.extract_strided_slice %279 {offsets = [0, 0], sizes = [32, 16], strides = [1, 1]} : vector<32x32xf32> to vector<32x16xf32>
    %281 = vector.extract_strided_slice %260 {offsets = [0, 192], sizes = [16, 64], strides = [1, 1]} : vector<16x256xf32> to vector<16x64xf32>
    %cst_174 = arith.constant dense<0.000000e+00> : vector<32x64xf32>
    %282 = tpu.matmul %280, %281, %cst_174 {dimension_numbers = #tpu.dot_dimension_numbers<[1], [0], [0], [1], [0, 0, 1, 1], [], []>} : vector<32x16xf32>, vector<16x64xf32>, vector<32x64xf32> -> vector<32x64xf32>
    %283 = arith.addf %277, %282 : vector<32x64xf32>
    %284 = arith.mulf %283, %283 : vector<32x64xf32>
    %285 = tpu.concatenate %283, %284 in 0 : vector<32x64xf32>, vector<32x64xf32> -> vector<64x64xf32>
    %c3_175 = arith.constant 3 : index
    %c0_176 = arith.constant 0 : index
    %c0_177 = arith.constant 0 : index
    %286 = vector.load %arg6[%c3_175, %c0_176, %c0_177] : memref<4x64x64xf32, #tpu.memory_space<vmem>>, vector<1x64x64xf32>
    %287 = vector.shape_cast %286 : vector<1x64x64xf32> to vector<64x64xf32>
    %cst_178 = arith.constant dense<0.000000e+00> : vector<64x64xf32>
    %288 = tpu.matmul %285, %287, %cst_178 {dimension_numbers = #tpu.dot_dimension_numbers<[1], [0], [0], [1], [0, 0, 1, 1], [], []>} : vector<64x64xf32>, vector<64x64xf32>, vector<64x64xf32> -> vector<64x64xf32>
    %289 = vector.extract_strided_slice %288 {offsets = [0, 0], sizes = [32, 64], strides = [1, 1]} : vector<64x64xf32> to vector<32x64xf32>
    %cst_179 = arith.constant dense<0.000000e+00> : vector<64xf32>
    %290 = vector.multi_reduction <add>, %289, %cst_179 [0] : vector<32x64xf32> to vector<64xf32>
    %291 = vector.shape_cast %290 : vector<64xf32> to vector<1x64xf32>
    %cst_180 = arith.constant 0.001953125 : f32
    %292 = vector.broadcast %cst_180 : f32 to vector<1x64xf32>
    %293 = arith.mulf %291, %292 : vector<1x64xf32>
    %294 = vector.extract_strided_slice %288 {offsets = [32, 0], sizes = [32, 64], strides = [1, 1]} : vector<64x64xf32> to vector<32x64xf32>
    %cst_181 = arith.constant dense<0.000000e+00> : vector<64xf32>
    %295 = vector.multi_reduction <add>, %294, %cst_181 [0] : vector<32x64xf32> to vector<64xf32>
    %296 = vector.shape_cast %295 : vector<64xf32> to vector<1x64xf32>
    %cst_182 = arith.constant 0.001953125 : f32
    %297 = vector.broadcast %cst_182 : f32 to vector<1x64xf32>
    %298 = arith.mulf %296, %297 : vector<1x64xf32>
    %299 = arith.mulf %293, %293 : vector<1x64xf32>
    %300 = arith.subf %298, %299 : vector<1x64xf32>
    %c3_183 = arith.constant 3 : index
    %c0_184 = arith.constant 0 : index
    %c0_185 = arith.constant 0 : index
    %301 = vector.load %arg7[%c3_183, %c0_184, %c0_185] : memref<8x1x64xf32, #tpu.memory_space<vmem>>, vector<1x1x64xf32>
    %302 = vector.shape_cast %301 : vector<1x1x64xf32> to vector<1x64xf32>
    %cst_186 = arith.constant 9.99999974E-6 : f32
    %303 = vector.broadcast %cst_186 : f32 to vector<1x64xf32>
    %304 = arith.addf %300, %303 : vector<1x64xf32>
    %305 = math.rsqrt %304 : vector<1x64xf32>
    %306 = arith.mulf %302, %305 : vector<1x64xf32>
    %c7_187 = arith.constant 7 : index
    %c0_188 = arith.constant 0 : index
    %c0_189 = arith.constant 0 : index
    %307 = vector.load %arg7[%c7_187, %c0_188, %c0_189] : memref<8x1x64xf32, #tpu.memory_space<vmem>>, vector<1x1x64xf32>
    %308 = vector.shape_cast %307 : vector<1x1x64xf32> to vector<1x64xf32>
    %309 = arith.mulf %293, %306 : vector<1x64xf32>
    %310 = arith.subf %308, %309 : vector<1x64xf32>
    %311 = vector.broadcast %306 : vector<1x64xf32> to vector<32x64xf32>
    %312 = arith.mulf %283, %311 : vector<32x64xf32>
    %313 = vector.broadcast %310 : vector<1x64xf32> to vector<32x64xf32>
    %314 = arith.addf %312, %313 : vector<32x64xf32>
    %315 = arith.negf %314 : vector<32x64xf32>
    %316 = math.exp %315 : vector<32x64xf32>
    %cst_190 = arith.constant 1.000000e+00 : f32
    %317 = vector.broadcast %cst_190 : f32 to vector<32x64xf32>
    %318 = arith.addf %317, %316 : vector<32x64xf32>
    %319 = arith.divf %317, %318 : vector<32x64xf32>
    %c0_191 = arith.constant 0 : index
    %c0_192 = arith.constant 0 : index
    %320 = vector.load %arg13[%c0_191, %c0_192] : memref<64x64xf32, #tpu.memory_space<vmem>>, vector<64x64xf32>
    %cst_193 = arith.constant dense<0.000000e+00> : vector<32x64xf32>
    %321 = tpu.matmul %319, %320, %cst_193 {dimension_numbers = #tpu.dot_dimension_numbers<[1], [0], [0], [1], [0, 0, 1, 1], [], []>} : vector<32x64xf32>, vector<64x64xf32>, vector<32x64xf32> -> vector<32x64xf32>
    %c0_194 = arith.constant 0 : index
    %c0_195 = arith.constant 0 : index
    %c0_196 = arith.constant 0 : index
    %322 = vector.load %arg12[%c0_194, %c0_195, %c0_196] : memref<4x128x32xf32, #tpu.memory_space<vmem>>, vector<1x128x32xf32>
    %323 = vector.shape_cast %322 : vector<1x128x32xf32> to vector<128x32xf32>
    %324 = vector.extract_strided_slice %321 {offsets = [0, 0], sizes = [32, 16], strides = [1, 1]} : vector<32x64xf32> to vector<32x16xf32>
    %cst_197 = arith.constant dense<0.000000e+00> : vector<128x16xf32>
    %325 = tpu.matmul %323, %324, %cst_197 {dimension_numbers = #tpu.dot_dimension_numbers<[1], [0], [0], [1], [0, 0, 1, 1], [], []>} : vector<128x32xf32>, vector<32x16xf32>, vector<128x16xf32> -> vector<128x16xf32>
    %c1_198 = arith.constant 1 : index
    %c0_199 = arith.constant 0 : index
    %c0_200 = arith.constant 0 : index
    %326 = vector.load %arg12[%c1_198, %c0_199, %c0_200] : memref<4x128x32xf32, #tpu.memory_space<vmem>>, vector<1x128x32xf32>
    %327 = vector.shape_cast %326 : vector<1x128x32xf32> to vector<128x32xf32>
    %328 = vector.extract_strided_slice %321 {offsets = [0, 16], sizes = [32, 16], strides = [1, 1]} : vector<32x64xf32> to vector<32x16xf32>
    %cst_201 = arith.constant dense<0.000000e+00> : vector<128x16xf32>
    %329 = tpu.matmul %327, %328, %cst_201 {dimension_numbers = #tpu.dot_dimension_numbers<[1], [0], [0], [1], [0, 0, 1, 1], [], []>} : vector<128x32xf32>, vector<32x16xf32>, vector<128x16xf32> -> vector<128x16xf32>
    %330 = arith.addf %325, %329 : vector<128x16xf32>
    %c2_202 = arith.constant 2 : index
    %c0_203 = arith.constant 0 : index
    %c0_204 = arith.constant 0 : index
    %331 = vector.load %arg12[%c2_202, %c0_203, %c0_204] : memref<4x128x32xf32, #tpu.memory_space<vmem>>, vector<1x128x32xf32>
    %332 = vector.shape_cast %331 : vector<1x128x32xf32> to vector<128x32xf32>
    %333 = vector.extract_strided_slice %321 {offsets = [0, 32], sizes = [32, 16], strides = [1, 1]} : vector<32x64xf32> to vector<32x16xf32>
    %cst_205 = arith.constant dense<0.000000e+00> : vector<128x16xf32>
    %334 = tpu.matmul %332, %333, %cst_205 {dimension_numbers = #tpu.dot_dimension_numbers<[1], [0], [0], [1], [0, 0, 1, 1], [], []>} : vector<128x32xf32>, vector<32x16xf32>, vector<128x16xf32> -> vector<128x16xf32>
    %335 = arith.addf %330, %334 : vector<128x16xf32>
    %c3_206 = arith.constant 3 : index
    %c0_207 = arith.constant 0 : index
    %c0_208 = arith.constant 0 : index
    %336 = vector.load %arg12[%c3_206, %c0_207, %c0_208] : memref<4x128x32xf32, #tpu.memory_space<vmem>>, vector<1x128x32xf32>
    %337 = vector.shape_cast %336 : vector<1x128x32xf32> to vector<128x32xf32>
    %338 = vector.extract_strided_slice %321 {offsets = [0, 48], sizes = [32, 16], strides = [1, 1]} : vector<32x64xf32> to vector<32x16xf32>
    %cst_209 = arith.constant dense<0.000000e+00> : vector<128x16xf32>
    %339 = tpu.matmul %337, %338, %cst_209 {dimension_numbers = #tpu.dot_dimension_numbers<[1], [0], [0], [1], [0, 0, 1, 1], [], []>} : vector<128x32xf32>, vector<32x16xf32>, vector<128x16xf32> -> vector<128x16xf32>
    %340 = arith.addf %335, %339 : vector<128x16xf32>
    %c0_210 = arith.constant 0 : index
    %c0_211 = arith.constant 0 : index
    %341 = vector.load %arg14[%c0_210, %c0_211] : memref<128x16xf32, #tpu.memory_space<vmem>>, vector<128x16xf32>
    tpu.vector_store %arg14[%c0_210, %c0_211], %340 {strides = array<i32>} : memref<128x16xf32, #tpu.memory_space<vmem>>, vector<128x16xf32>,
    return
  }
}

</mosaic_0001>

<bundles_post_ra>
// kernel: vae_forward_pallas.1
= control target key start
LH: loop header
LB: loop body
LE: loop exit
PB: predicated region body
PF: predicated region fallthrough
CT: control target
= control target key end

     0   :  { %21 = vsyncpa [#allocation3], 0  ;;  %s7743_s0 = inlined_call_operand.vmem [shape: f32[128,16], index: 0, kind: input, shape index: {}]   ;;  %s7744_s1 = inlined_call_operand.vmem [shape: f32[2,32], index: 1, kind: input, shape index: {}]   ;;  %s7745_s2 = inlined_call_operand.hbm [shape: f32[4,32,128], index: 2, kind: input, shape index: {}]   ;;  %s7746_s3 = inlined_call_operand.vmem [shape: f32[16,256], index: 3, kind: input, shape index: {}]   ;;  %s7747_s4 = inlined_call_operand.vmem [shape: f32[16,32,32], index: 4, kind: input, shape index: {}]   ;;  %s7748_s5 = inlined_call_operand.hbm [shape: f32[4,64,256], index: 5, kind: input, shape index: {}]   ;;  %s7749_s6 = inlined_call_operand.hbm [shape: f32[4,64,64], index: 6, kind: input, shape index: {}]   ;;  %s7750_s7 = inlined_call_operand.hbm [shape: f32[8,1,64], index: 7, kind: input, shape index: {}]   ;;  %s7751_s8 = inlined_call_operand.hbm [shape: f32[96,256], index: 8, kind: input, shape index: {}]   ;;  %s7752_s9 = inlined_call_operand.vmem [shape: f32[16,64], index: 9, kind: input, shape index: {}]   ;;  %s7753_s10 = inlined_call_operand.hbm [shape: f32[4,2,8], index: 10, kind: input, shape index: {}]   ;;  %s7754_s11 = inlined_call_operand.vmem [shape: f32[4,8,2], index: 11, kind: input, shape index: {}]   ;;  %s7755_s12 = inlined_call_operand.vmem [shape: f32[4,128,32], index: 12, kind: input, shape index: {}]   ;;  %s7756_s13 = inlined_call_operand.hbm [shape: f32[64,64], index: 13, kind: input, shape index: {}]   ;;  %s7757_s14 = inlined_call_operand.hbm [shape: f32[128,16], index: 14, kind: output, shape index: {0}]   ;;  %s7758_s15 = inlined_call_operand.vmem [shape: f32[2,64], index: 15, kind: output, shape index: {1}]  }
   0x1   :  { %22 = vsyncpa [#allocation6], 0 }
   0x2   :  { %23 = vsyncpa [#allocation9], 0 }
   0x3   :  { %24 = vsyncpa [#allocation12], 0 }
   0x4   :  { %25 = vsyncpa [#allocation4], 0  ;;  %s6643_s18 = smov [#allocation5]  }
   0x5   :  { %s51_s19 = sshll.u32 %s6643_s18, 4  ;;  %s52_s19 = int_to_ptr.vmem [resolvable:$true] %s51_s19 }
   0x6   :  { %s6481_s20 = scalar_lea.vmem %s52_s19, 8192  ;;  %p6486_p1 = scmp.lt.s32.totalorder %s52_s19, %s52_s19 }
   0x7   :  { %p6482_p0 = scmp.ne.s32.totalorder %s52_s19, %s6481_s20  ;;  %p6487_p2 = scmp.lt.s32.totalorder %s6481_s20, %s6481_s20 }
   0x9   :  { %p6488_p3 = por %p6487_p2, %p6486_p1 }
   0xb   :  { %p6489_p4 = pnand %p6488_p3, %p6482_p0 }
   0xd   :  { %6492 = shalt.err (!%p6489_p4)
}
   0xe   :  { %s6644_s21 = smov 256   ;;  %s6645_s22 = smov 16  }
   0xf   :  { %57 = dma.hbm_to_vmem [thread:$0]  %s7748_s5, 8192, %s52_s19, [#allocation6], %s6644_s21, %s6644_s21, %s6645_s22  }
  0x10   :  { %s6646_s25 = smov [#allocation8]  }
  0x11   :  { %s75_s26 = sshll.u32 %s6646_s25, 4  ;;  %s76_s26 = int_to_ptr.vmem [resolvable:$true] %s75_s26 }
  0x12   :  { %s6501_s27 = scalar_lea.vmem %s76_s26, 128  ;;  %p6506_p6 = scmp.lt.s32.totalorder %s76_s26, %s76_s26 }
  0x13   :  { %p6502_p5 = scmp.ne.s32.totalorder %s76_s26, %s6501_s27  ;;  %p6507_p7 = scmp.lt.s32.totalorder %s6501_s27, %s6501_s27 }
  0x15   :  { %p6508_p8 = por %p6507_p7, %p6506_p6 }
  0x17   :  { %p6509_p9 = pnand %p6508_p8, %p6502_p5 }
  0x19   :  { %6512 = shalt.err (!%p6509_p9)
}
  0x1a   :  { %s6647_s28 = smov 1   ;;  %s6648_s16 = smov [#allocation11]  }
  0x1b   :  { %81 = dma.hbm_to_vmem [thread:$0]  %s7750_s7, 128, %s76_s26, [#allocation9], %s6645_s22, %s6645_s22, %s6647_s28  }
  0x1c   :  { %s101_s17 = sshll.u32 %s6648_s16, 4  ;;  %s102_s17 = int_to_ptr.vmem [resolvable:$true] %s101_s17 }
  0x1d   :  { %s6521_s5 = scalar_lea.vmem %s102_s17, 128  ;;  %p6526_p11 = scmp.lt.s32.totalorder %s102_s17, %s102_s17 }
  0x1e   :  { %p6522_p10 = scmp.ne.s32.totalorder %s102_s17, %s6521_s5  ;;  %p6527_p12 = scmp.lt.s32.totalorder %s6521_s5, %s6521_s5 }
  0x20   :  { %p6528_p13 = por %p6527_p12, %p6526_p11 }
  0x22   :  { %p6529_p0 = pnand %p6528_p13, %p6522_p10 }
  0x24   :  { %6532 = shalt.err (!%p6529_p0)
}
  0x25   :  { %s6649_s18 = smov 32   ;;  %s6650_s19 = smov 2  }
  0x26   :  { %107 = dma.hbm_to_vmem [thread:$0]  %s7753_s10, 128, %s102_s17, [#allocation12], %s6649_s18, %s6649_s18, %s6650_s19  }
  0x27   :  { %s6651_s24 = smov [#allocation2]  }
  0x28   :  { %s35_s7 = sshll.u32 %s6651_s24, 4  ;;  %s36_s7 = int_to_ptr.vmem [resolvable:$true] %s35_s7 }
  0x29   :  { %s6541_s25 = scalar_lea.vmem %s36_s7, 2048  ;;  %p6546_p2 = scmp.lt.s32.totalorder %s36_s7, %s36_s7 }
  0x2a   :  { %p6542_p1 = scmp.ne.s32.totalorder %s36_s7, %s6541_s25  ;;  %p6547_p3 = scmp.lt.s32.totalorder %s6541_s25, %s6541_s25 }
  0x2c   :  { %p6548_p4 = por %p6547_p3, %p6546_p2 }
  0x2e   :  { %p6549_p5 = pnand %p6548_p4, %p6542_p1 }
  0x30   :  { %6552 = shalt.err (!%p6549_p5)
}
  0x31   :  { %s6652_s26 = smov 128   ;;  %s6653_s27 = smov 8  }
  0x32   :  { %41 = dma.hbm_to_vmem [thread:$0]  %s7745_s2, 2048, %s36_s7, [#allocation3], %s6652_s26, %s6652_s26, %s6653_s27  }
  0x33   :  { %s6654_s10 = smov [#allocation7]   ;;  %s6655_s16 = smov [#allocation10]  }
  0x34   :  { %s63_s30 = sshll.u32 %s6654_s10, 4  ;;  %s87_s17 = sshll.u32 %s6655_s16, 4  ;;  %s64_s30 = int_to_ptr.vmem [resolvable:$true] %s63_s30  ;;  %s88_s17 = int_to_ptr.vmem [resolvable:$true] %s87_s17 }
  0x35   :  { %s6561_s5 = scalar_lea.vmem %s64_s30, 4096  ;;  %p6566_p7 = scmp.lt.s32.totalorder %s64_s30, %s64_s30 }
  0x36   :  { %p6562_p6 = scmp.ne.s32.totalorder %s64_s30, %s6561_s5  ;;  %p6567_p8 = scmp.lt.s32.totalorder %s6561_s5, %s6561_s5 }
  0x38   :  { %p6568_p9 = por %p6567_p8, %p6566_p7 }
  0x3a   :  { %p6569_p10 = pnand %p6568_p9, %p6562_p6 }
  0x3c   :  { %6572 = shalt.err (!%p6569_p10)
}
  0x3d   :  { %69 = dma.hbm_to_vmem [thread:$0]  %s7749_s6, 4096, %s64_s30, [#allocation6], %s6652_s26, %s6652_s26, %s6653_s27  }
  0x3e   :  { %s6581_s2 = scalar_lea.vmem %s88_s17, 3072  ;;  %p6586_p12 = scmp.lt.s32.totalorder %s88_s17, %s88_s17 }
  0x3f   :  { %p6582_p11 = scmp.ne.s32.totalorder %s88_s17, %s6581_s2  ;;  %p6587_p13 = scmp.lt.s32.totalorder %s6581_s2, %s6581_s2 }
  0x41   :  { %p6588_p0 = por %p6587_p13, %p6586_p12 }
  0x43   :  { %p6589_p1 = pnand %p6588_p0, %p6582_p11 }
  0x45   :  { %6592 = shalt.err (!%p6589_p1)
}
  0x46   :  { %93 = dma.hbm_to_vmem [thread:$0]  %s7751_s8, 3072, %s88_s17, [#allocation9], %s6644_s21, %s6644_s21, %s6645_s22  }
  0x47   :  { %s6656_s7 = smov [#allocation13]  }
  0x48   :  { %s117_s25 = sshll.u32 %s6656_s7, 4  ;;  %s118_s25 = int_to_ptr.vmem [resolvable:$true] %s117_s25 }
  0x49   :  { %s6601_s28 = scalar_lea.vmem %s118_s25, 1024  ;;  %p6606_p3 = scmp.lt.s32.totalorder %s118_s25, %s118_s25 }
  0x4a   :  { %p6602_p2 = scmp.ne.s32.totalorder %s118_s25, %s6601_s28  ;;  %p6607_p4 = scmp.lt.s32.totalorder %s6601_s28, %s6601_s28 }
  0x4c   :  { %p6608_p5 = por %p6607_p4, %p6606_p3 }
  0x4e   :  { %p6609_p6 = pnand %p6608_p5, %p6602_p2 }
  0x50   :  { %6612 = shalt.err (!%p6609_p6)
}
  0x51   :  { %123 = dma.hbm_to_vmem [thread:$0]  %s7756_s13, 1024, %s118_s25, [#allocation12], %s6652_s26, %s6652_s26, %s6653_s27  }
  0x52   :  { %6633 = dma.done.wait [#allocation3], 2048  }
  0x53   :  { %6634 = vsyncadd [#allocation3], 4294965248 }
  0x54   :  { %6635 = dma.done.wait [#allocation6], 12288  }
  0x55   :  { %6636 = vsyncadd [#allocation6], 4294955008 }
  0x56   :  { %6637 = dma.done.wait [#allocation9], 3200  }
  0x57   :  { %6638 = vsyncadd [#allocation9], 4294964096 }
  0x58   :  { %6639 = dma.done.wait [#allocation12], 1152  }
  0x59   :  { %6640 = vsyncadd [#allocation12], 4294966144  ;;  %v6657_v0 = vmov 0.0   ;;  %v164_v1 = vld [vmem:[%s7746_s3 + $0x18] sm:$0xff]  ;;  %v163_v2 = vld [vmem:[%s7746_s3 + $0x10] sm:$0xff]  ;;  %vm165_vm0 = vcmask 130048  }
  0x5a   :  { %278 = vmatprep.mubr.f32.mxu0 %v6657_v0  ;;  %v162_v3 = vld [vmem:[%s7746_s3 + $0x8] sm:$0xff]  ;;  %242 = vmatprep.subr.mxu0 %v164_v1  ;;  %v161_v4 = vld [vmem:[%s7746_s3] sm:$0xff]  ;;  %v147_v7 = vld [vmem:[%s7743_s0 + $0x10] sm:$0xff]  ;;  %vm886_vm1 = vcmask 523264   ;;  %vm1009_vm2 = vcmask 261120   ;;  %vm6659_vm5 = vmmov 0  }
  0x5b   :  { %243 = vmatpush1.msra.mxu0 %v163_v2  ;;  %v145_v5 = vld [vmem:[%s7743_s0] sm:$0xff]  ;;  %v146_v6 = vld [vmem:[%s7743_s0 + $0x8] sm:$0xff]  ;;  %v148_v8 = vld [vmem:[%s7743_s0 + $0x18] sm:$0xff]  ;;  %vm2176_vm6 = vcmask 64512   ;;  %vm2484_vm7 = vcmask 517120   ;;  %s6660_s5 = smov 96  }
  0x5c   :  { %244 = vmatprep.subr.mxu0 %v162_v3  ;;  %v149_v9 = vld [vmem:[%s7743_s0 + $0x20] sm:$0xff]  ;;  %v150_v10 = vld [vmem:[%s7743_s0 + $0x28] sm:$0xff]  ;;  %v151_v11 = vld [vmem:[%s7743_s0 + $0x30] sm:$0xff]  ;;  %vm2584_vm8 = vcmask 1041408   ;;  %vm2580_vm9 = vcmask 15360  }
  0x5d   :  { %245 = vmatpush1.msra.mxu0 %v161_v4  ;;  %v152_v12 = vld [vmem:[%s7743_s0 + $0x38] sm:$0xff]  ;;  %v153_v13 = vld [vmem:[%s7743_s0 + $0x40] sm:$0xff]  ;;  %v154_v14 = vld [vmem:[%s7743_s0 + $0x48] sm:$0xff] }
  0x5e   :  { %5301 = vmatmul.mubr.msk.f32.vlgmr.msra.gmra.mxu0 %vm165_vm0, %v145_v5  ;;  %v155_v15 = vld [vmem:[%s7743_s0 + $0x50] sm:$0xff]  ;;  %v156_v16 = vld [vmem:[%s7743_s0 + $0x58] sm:$0xff]  ;;  %v157_v17 = vld [vmem:[%s7743_s0 + $0x60] sm:$0xff] }
  0x5f   :  { %284 = vmatprep.mubr.f32.mxu0 %v6657_v0  ;;  %v158_v18 = vld [vmem:[%s7743_s0 + $0x68] sm:$0xff]  ;;  %v159_v19 = vld [vmem:[%s7743_s0 + $0x70] sm:$0xff]  ;;  %v160_v20 = vld [vmem:[%s7743_s0 + $0x78] sm:$0xff]  ;;  %s6658_s0 = smov 64  }
  0x60   :  { %v380_v53 = vld [vmem:[#allocation2 + $0x20] sm:$0xff]  ;;  %v620_v55 = vld [vmem:[#allocation2 + $0x48] sm:$0xff]  ;;  %v621_v56 = vld [vmem:[#allocation2 + $0x50] sm:$0xff] }
  0x61   :  { %5893 = vmatprep.mubr.f32.mxu1 %v380_v53  ;;  %v619_v54 = vld [vmem:[#allocation2 + $0x40] sm:$0xff]  ;;  %v622_v57 = vld [vmem:[#allocation2 + $0x58] sm:$0xff] }
  0x62   :  { %5302 = vmatmul.mubr.msk.f32.gmra.mxu0 %vm165_vm0, %v146_v6  ;;  %v870_v53 = vld [vmem:[#allocation5] sm:$0xff] }
  0x63   :  { %290 = vmatprep.mubr.f32.mxu0 %v6657_v0 }
  0x66   :  { %5303 = vmatmul.mubr.msk.f32.gmra.mxu0 %vm165_vm0, %v147_v7 }
  0x67   :  { %296 = vmatprep.mubr.f32.mxu0 %v6657_v0 }
  0x6a   :  { %5304 = vmatmul.mubr.msk.f32.gmra.mxu0 %vm165_vm0, %v148_v8 }
  0x6b   :  { %302 = vmatprep.mubr.f32.mxu0 %v6657_v0 }
  0x6e   :  { %5305 = vmatmul.mubr.msk.f32.gmra.mxu0 %vm165_vm0, %v149_v9 }
  0x6f   :  { %308 = vmatprep.mubr.f32.mxu0 %v6657_v0 }
  0x72   :  { %5306 = vmatmul.mubr.msk.f32.gmra.mxu0 %vm165_vm0, %v150_v10 }
  0x73   :  { %314 = vmatprep.mubr.f32.mxu0 %v6657_v0 }
  0x76   :  { %5307 = vmatmul.mubr.msk.f32.gmra.mxu0 %vm165_vm0, %v151_v11  ;;  %v381_v11 = vld [vmem:[#allocation2 + $0x28] sm:$0xff] }
  0x77   :  { %320 = vmatprep.mubr.f32.mxu0 %v6657_v0 }
  0x7a   :  { %5308 = vmatmul.mubr.msk.f32.gmra.mxu0 %vm165_vm0, %v152_v12  ;;  %v382_v12 = vld [vmem:[#allocation2 + $0x30] sm:$0xff] }
  0x7b   :  { %326 = vmatprep.mubr.f32.mxu0 %v6657_v0 }
  0x7e   :  { %5309 = vmatmul.mubr.msk.f32.gmra.mxu0 %vm165_vm0, %v153_v13  ;;  %v383_v13 = vld [vmem:[#allocation2 + $0x38] sm:$0xff] }
  0x7f   :  { %332 = vmatprep.mubr.f32.mxu0 %v6657_v0 }
  0x82   :  { %5310 = vmatmul.mubr.msk.f32.gmra.mxu0 %vm165_vm0, %v154_v14  ;;  %v375_v14 = vld [vmem:[#allocation2] sm:$0xff] }
  0x83   :  { %338 = vmatprep.mubr.f32.mxu0 %v6657_v0 }
  0x86   :  { %5311 = vmatmul.mubr.msk.f32.gmra.mxu0 %vm165_vm0, %v155_v15 }
  0x87   :  { %344 = vmatprep.mubr.f32.mxu0 %v6657_v0 }
  0x8a   :  { %5312 = vmatmul.mubr.msk.f32.gmra.mxu0 %vm165_vm0, %v156_v16 }
  0x8b   :  { %350 = vmatprep.mubr.f32.mxu0 %v6657_v0 }
  0x8e   :  { %5313 = vmatmul.mubr.msk.f32.gmra.mxu0 %vm165_vm0, %v157_v17 }
  0x8f   :  { %356 = vmatprep.mubr.f32.mxu0 %v6657_v0 }
  0x92   :  { %5314 = vmatmul.mubr.msk.f32.gmra.mxu0 %vm165_vm0, %v158_v18 }
  0x93   :  { %362 = vmatprep.mubr.f32.mxu0 %v6657_v0 }
  0x96   :  { %5315 = vmatmul.mubr.msk.f32.gmra.mxu0 %vm165_vm0, %v159_v19 }
  0x97   :  { %368 = vmatprep.mubr.f32.mxu0 %v6657_v0 }
  0x9a   :  { %5316 = vmatmul.mubr.msk.f32.gmra.mxu0 %vm165_vm0, %v160_v20  ;;  %v376_v20 = vld [vmem:[#allocation2 + $0x8] sm:$0xff] }
  0x9b   :  { %5969 = vmatprep.mubr.f32.mxu0 %v619_v54 }
 0x11e   :  { %v6876_v21 = vpop.f32.mrf.mxu0 }
 0x120   :  { %v6878_v22 = vpop.f32.mrf.mxu0 }
 0x122   :  { %v6880_v23 = vpop.f32.mrf.mxu0 }
 0x124   :  { %v6882_v24 = vpop.f32.mrf.mxu0 }
 0x126   :  { %v6884_v25 = vpop.f32.mrf.mxu0 }
 0x128   :  { %v6886_v26 = vpop.f32.mrf.mxu0 }
 0x12a   :  { %v6888_v27 = vpop.f32.mrf.mxu0 }
 0x12c   :  { %v6890_v28 = vpop.f32.mrf.mxu0 }
 0x12e   :  { %v6892_v29 = vpop.f32.mrf.mxu0 }
 0x130   :  { %v6894_v30 = vpop.f32.mrf.mxu0 }
 0x132   :  { %v6896_v31 = vpop.f32.mrf.mxu0 }
 0x134   :  { %v6898_v32 = vpop.f32.mrf.mxu0 }
 0x136   :  { %v6900_v33 = vpop.f32.mrf.mxu0 }
 0x138   :  { %v6902_v34 = vpop.f32.mrf.mxu0 }
 0x13a   :  { %v6904_v35 = vpop.f32.mrf.mxu0 }
 0x13c   :  { %v6906_v36 = vpop.f32.mrf.mxu0 }
 0x13e   :  { %v6908_v37 = vpop.f32.mrf.mxu0 }
 0x140   :  { %v6910_v38 = vpop.f32.mrf.mxu0 }
 0x142   :  { %v6912_v39 = vpop.f32.mrf.mxu0 }
 0x144   :  { %v6914_v40 = vpop.f32.mrf.mxu0 }
 0x146   :  { %v6916_v41 = vpop.f32.mrf.mxu0 }
 0x148   :  { %v342_v42 = vpop.f32.mrf.mxu0 }
 0x14a   :  { %v6918_v43 = vpop.f32.mrf.mxu0 }
 0x14c   :  { %v6920_v44 = vpop.f32.mrf.mxu0 }
 0x14e   :  { %v6922_v45 = vpop.f32.mrf.mxu0 }
 0x150   :  { %v354_v46 = vpop.f32.mrf.mxu0 }
 0x152   :  { %v6924_v47 = vpop.f32.mrf.mxu0 }
 0x153   :  { %426 = vrot.lane.b32.xlu1 %v6924_v47, %s6658_s0 }
 0x154   :  { %v360_v48 = vpop.f32.mrf.mxu0 }
 0x156   :  { %v6928_v49 = vpop.f32.mrf.mxu0 }
 0x157   :  { %424 = vrot.lane.b32.xlu1 %v6922_v45, %s6658_s0 }
 0x158   :  { %v366_v50 = vpop.f32.mrf.mxu0 }
 0x15a   :  { %v6932_v51 = vpop.f32.mrf.mxu0 }
 0x15b   :  { %420 = vrot.lane.b32.xlu1 %v6916_v41, %s6658_s0  ;;  %430 = vrot.lane.b32.xlu0 %v6932_v51, %s6658_s0 }
 0x15c   :  { %v372_v52 = vpop.f32.mrf.mxu0 }
 0x15d   :  { %5937 = vmatprep.subr.mxu0 %v372_v52 }
 0x15e   :  { %5938 = vmatpush3.msra.mxu0 %v372_v52 }
 0x15f   :  { %416 = vrot.lane.b32.xlu1 %v6908_v37, %s6658_s0  ;;  %428 = vrot.lane.b32.xlu0 %v6928_v49, %s6658_s0 }
 0x160   :  { %5939 = vmatprep.subr.mxu0 %v366_v50 }
 0x161   :  { %5940 = vmatpush3.msra.mxu0 %v366_v50 }
 0x162   :  { %5941 = vmatprep.subr.mxu0 %v360_v48 }
 0x163   :  { %5942 = vmatpush3.msra.mxu0 %v360_v48  ;;  %412 = vrot.lane.b32.xlu1 %v6900_v33, %s6658_s0 }
 0x164   :  { %422 = vrot.lane.b32.xlu0 %v6918_v43, %s6658_s0  ;;  %5943 = vmatprep.subr.mxu0 %v354_v46 }
 0x165   :  { %5944 = vmatpush3.msra.mxu0 %v354_v46 }
 0x166   :  { %5945 = vmatprep.subr.mxu0 %v6920_v44 }
 0x167   :  { %5946 = vmatpush3.msra.mxu0 %v6920_v44  ;;  %408 = vrot.lane.b32.xlu1 %v6892_v29, %s6658_s0 }
 0x168   :  { %418 = vrot.lane.b32.xlu0 %v6912_v39, %s6658_s0  ;;  %5947 = vmatprep.subr.mxu0 %v342_v42 }
 0x169   :  { %5948 = vmatpush3.msra.mxu0 %v342_v42 }
 0x16a   :  { %5949 = vmatprep.subr.mxu0 %v6914_v40 }
 0x16b   :  { %5950 = vmatpush3.msra.mxu0 %v6914_v40  ;;  %404 = vrot.lane.b32.xlu1 %v6884_v25, %s6658_s0 }
 0x16c   :  { %414 = vrot.lane.b32.xlu0 %v6904_v35, %s6658_s0  ;;  %5951 = vmatprep.subr.mxu0 %v6910_v38 }
 0x16d   :  { %5952 = vmatpush3.msra.mxu0 %v6910_v38 }
 0x16e   :  { %5953 = vmatprep.subr.mxu0 %v6906_v36 }
 0x16f   :  { %5954 = vmatpush3.msra.mxu0 %v6906_v36  ;;  %400 = vrot.lane.b32.xlu1 %v6876_v21, %s6658_s0 }
 0x170   :  { %410 = vrot.lane.b32.xlu0 %v6896_v31, %s6658_s0  ;;  %5955 = vmatprep.subr.mxu0 %v6902_v34 }
 0x171   :  { %5956 = vmatpush3.msra.mxu0 %v6902_v34 }
 0x172   :  { %5957 = vmatprep.subr.mxu0 %v6898_v32 }
 0x173   :  { %5958 = vmatpush3.msra.mxu0 %v6898_v32  ;;  %761 = vrot.lane.b32.xlu1 %v366_v50, %s6658_s0  ;;  %v873_v50 = vld [vmem:[#allocation5 + $0x18] sm:$0xff] }
 0x174   :  { %406 = vrot.lane.b32.xlu0 %v6888_v27, %s6658_s0  ;;  %5959 = vmatprep.subr.mxu0 %v6894_v30 }
 0x175   :  { %5960 = vmatpush3.msra.mxu0 %v6894_v30 }
 0x176   :  { %5961 = vmatprep.subr.mxu0 %v6890_v28 }
 0x177   :  { %5962 = vmatpush3.msra.mxu0 %v6890_v28  ;;  %757 = vrot.lane.b32.xlu1 %v354_v46, %s6658_s0  ;;  %v877_v46 = vld [vmem:[#allocation5 + $0x38] sm:$0xff] }
 0x178   :  { %402 = vrot.lane.b32.xlu0 %v6880_v23, %s6658_s0  ;;  %5963 = vmatprep.subr.mxu0 %v6886_v26 }
 0x179   :  { %5964 = vmatpush3.msra.mxu0 %v6886_v26 }
 0x17a   :  { %5965 = vmatprep.subr.mxu0 %v6882_v24 }
 0x17b   :  { %5966 = vmatpush3.msra.mxu0 %v6882_v24  ;;  %753 = vrot.lane.b32.xlu1 %v342_v42, %s6658_s0  ;;  %v881_v42 = vld [vmem:[#allocation5 + $0x58] sm:$0xff] }
 0x17c   :  { %763 = vrot.lane.b32.xlu0 %v372_v52, %s6658_s0  ;;  %5967 = vmatprep.subr.mxu0 %v6878_v22  ;;  %v871_v52 = vld [vmem:[#allocation5 + $0x8] sm:$0xff] }
 0x17d   :  { %5968 = vmatpush3.msra.mxu0 %v6878_v22 }
 0x17e   :  { %5970 = vmatmul.mubr.f32.vlgmr.msra.gmra.mxu0 %v620_v55 }
 0x17f   :  { %749 = vrot.lane.b32.xlu1 %v6910_v38, %s6658_s0  ;;  %5972 = vmatprep.mubr.f32.mxu0 %v621_v56  ;;  %v885_v38 = vld [vmem:[#allocation5 + $0x78] sm:$0xff] }
 0x180   :  { %759 = vrot.lane.b32.xlu0 %v360_v48, %s6658_s0  ;;  %915 = vmatprep.subr.mxu0 %v885_v38  ;;  %v875_v48 = vld [vmem:[#allocation5 + $0x28] sm:$0xff] }
 0x182   :  { %5973 = vmatmul.mubr.f32.gmra.mxu0 %v622_v57 }
 0x183   :  { %745 = vrot.lane.b32.xlu1 %v6902_v34, %s6658_s0  ;;  %963 = vmatprep.mubr.f32.mxu0 %v6657_v0 }
 0x184   :  { %755 = vrot.lane.b32.xlu0 %v6920_v44, %s6658_s0  ;;  %v879_v44 = vld [vmem:[#allocation5 + $0x48] sm:$0xff] }
 0x187   :  { %741 = vrot.lane.b32.xlu1 %v6894_v30, %s6658_s0 }
 0x188   :  { %751 = vrot.lane.b32.xlu0 %v6914_v40, %s6658_s0  ;;  %v883_v40 = vld [vmem:[#allocation5 + $0x68] sm:$0xff] }
 0x18b   :  { %737 = vrot.lane.b32.xlu1 %v6886_v26, %s6658_s0  ;;  %v378_v26 = vld [vmem:[#allocation2 + $0x18] sm:$0xff] }
 0x18c   :  { %747 = vrot.lane.b32.xlu0 %v6906_v36, %s6658_s0  ;;  %v715_v36 = vld [vmem:[#allocation2 + $0x70] sm:$0xff] }
 0x18f   :  { %733 = vrot.lane.b32.xlu1 %v6878_v22, %s6658_s0  ;;  %v377_v22 = vld [vmem:[#allocation2 + $0x10] sm:$0xff] }
 0x190   :  { %743 = vrot.lane.b32.xlu0 %v6898_v32, %s6658_s0 }
 0x194   :  { %739 = vrot.lane.b32.xlu0 %v6890_v28, %s6658_s0 }
 0x198   :  { %735 = vrot.lane.b32.xlu0 %v6882_v24, %s6658_s0 }
 0x1c5   :  { %v427_v58 = vpop.permute.xlu1 %426 }
 0x1c9   :  { %v425_v59 = vpop.permute.xlu1 %424 }
 0x1cd   :  { %v431_v60 = vpop.permute.xlu0 %430  ;;  %v421_v61 = vpop.permute.xlu1 %420 }
 0x1ce   :  { %5861 = vmatprep.subr.mxu1 %v431_v60 }
 0x1cf   :  { %5862 = vmatpush3.msra.mxu1 %v431_v60 }
 0x1d1   :  { %v429_v62 = vpop.permute.xlu0 %428  ;;  %v417_v63 = vpop.permute.xlu1 %416 }
 0x1d2   :  { %5863 = vmatprep.subr.mxu1 %v429_v62 }
 0x1d3   :  { %5864 = vmatpush3.msra.mxu1 %v429_v62 }
 0x1d4   :  { %5865 = vmatprep.subr.mxu1 %v427_v58 }
 0x1d5   :  { %5866 = vmatpush3.msra.mxu1 %v427_v58  ;;  %v413_v3 = vpop.permute.xlu1 %412 }
 0x1d6   :  { %v423_v1 = vpop.permute.xlu0 %422  ;;  %5867 = vmatprep.subr.mxu1 %v425_v59 }
 0x1d7   :  { %5868 = vmatpush3.msra.mxu1 %v425_v59 }
 0x1d8   :  { %5869 = vmatprep.subr.mxu1 %v423_v1 }
 0x1d9   :  { %5870 = vmatpush3.msra.mxu1 %v423_v1  ;;  %v409_v5 = vpop.permute.xlu1 %408 }
 0x1da   :  { %v419_v2 = vpop.permute.xlu0 %418  ;;  %5871 = vmatprep.subr.mxu1 %v421_v61 }
 0x1db   :  { %5872 = vmatpush3.msra.mxu1 %v421_v61 }
 0x1dc   :  { %5873 = vmatprep.subr.mxu1 %v419_v2 }
 0x1dd   :  { %5874 = vmatpush3.msra.mxu1 %v419_v2  ;;  %v405_v8 = vpop.permute.xlu1 %404 }
 0x1de   :  { %v415_v4 = vpop.permute.xlu0 %414  ;;  %5875 = vmatprep.subr.mxu1 %v417_v63 }
 0x1df   :  { %5876 = vmatpush3.msra.mxu1 %v417_v63 }
 0x1e0   :  { %5877 = vmatprep.subr.mxu1 %v415_v4 }
 0x1e1   :  { %5878 = vmatpush3.msra.mxu1 %v415_v4  ;;  %v401_v10 = vpop.permute.xlu1 %400 }
 0x1e2   :  { %v411_v6 = vpop.permute.xlu0 %410  ;;  %5879 = vmatprep.subr.mxu1 %v413_v3 }
 0x1e3   :  { %5880 = vmatpush3.msra.mxu1 %v413_v3 }
 0x1e4   :  { %5881 = vmatprep.subr.mxu1 %v411_v6 }
 0x1e5   :  { %5882 = vmatpush3.msra.mxu1 %v411_v6  ;;  %v762_v16 = vpop.permute.xlu1 %761 }
 0x1e6   :  { %v407_v7 = vpop.permute.xlu0 %406  ;;  %5883 = vmatprep.subr.mxu1 %v409_v5 }
 0x1e7   :  { %5884 = vmatpush3.msra.mxu1 %v409_v5 }
 0x1e8   :  { %5885 = vmatprep.subr.mxu1 %v407_v7 }
 0x1e9   :  { %5886 = vmatpush3.msra.mxu1 %v407_v7  ;;  %v758_v18 = vpop.permute.xlu1 %757 }
 0x1ea   :  { %5887 = vmatprep.subr.mxu1 %v405_v8  ;;  %v403_v9 = vpop.permute.xlu0 %402 }
 0x1eb   :  { %5888 = vmatpush3.msra.mxu1 %v405_v8 }
 0x1ec   :  { %5889 = vmatprep.subr.mxu1 %v403_v9 }
 0x1ed   :  { %5890 = vmatpush3.msra.mxu1 %v403_v9  ;;  %v754_v24 = vpop.permute.xlu1 %753 }
 0x1ee   :  { %5891 = vmatprep.subr.mxu1 %v401_v10  ;;  %v764_v15 = vpop.permute.xlu0 %763 }
 0x1ef   :  { %5892 = vmatpush3.msra.mxu1 %v401_v10 }
 0x1f0   :  { %5894 = vmatmul.mubr.f32.vlgmr.msra.gmra.mxu1 %v381_v11  ;;  %5899 = vmatprep.subr.mxu1 %v6932_v51 }
 0x1f1   :  { %5900 = vmatpush3.msra.mxu1 %v6932_v51  ;;  %5896 = vmatprep.mubr.f32.mxu1 %v382_v12  ;;  %v750_v28 = vpop.permute.xlu1 %749  ;;  %v872_v51 = vld [vmem:[#allocation5 + $0x10] sm:$0xff] }
 0x1f2   :  { %5901 = vmatprep.subr.mxu1 %v6928_v49  ;;  %v760_v17 = vpop.permute.xlu0 %759 }
 0x1f3   :  { %5902 = vmatpush3.msra.mxu1 %v6928_v49  ;;  %v874_v49 = vld [vmem:[#allocation5 + $0x20] sm:$0xff] }
 0x1f4   :  { %5903 = vmatprep.subr.mxu1 %v6924_v47  ;;  %5897 = vmatmul.mubr.f32.gmra.mxu1 %v383_v13 }
 0x1f5   :  { %5904 = vmatpush3.msra.mxu1 %v6924_v47  ;;  %5931 = vmatprep.mubr.f32.mxu1 %v375_v14  ;;  %v876_v47 = vld [vmem:[#allocation5 + $0x30] sm:$0xff] }
 0x1f6   :  { %5905 = vmatprep.subr.mxu1 %v6922_v45  ;;  %v756_v19 = vpop.permute.xlu0 %755 }
 0x1f7   :  { %5906 = vmatpush3.msra.mxu1 %v6922_v45  ;;  %v878_v45 = vld [vmem:[#allocation5 + $0x40] sm:$0xff] }
 0x1f8   :  { %5907 = vmatprep.subr.mxu1 %v6918_v43 }
 0x1f9   :  { %5908 = vmatpush3.msra.mxu1 %v6918_v43  ;;  %v880_v43 = vld [vmem:[#allocation5 + $0x50] sm:$0xff] }
 0x1fa   :  { %5909 = vmatprep.subr.mxu1 %v6916_v41 }
 0x1fb   :  { %5910 = vmatpush3.msra.mxu1 %v6916_v41  ;;  %v882_v41 = vld [vmem:[#allocation5 + $0x60] sm:$0xff] }
 0x1fc   :  { %5911 = vmatprep.subr.mxu1 %v6912_v39 }
 0x1fd   :  { %5912 = vmatpush3.msra.mxu1 %v6912_v39  ;;  %v884_v39 = vld [vmem:[#allocation5 + $0x70] sm:$0xff] }
 0x1fe   :  { %5913 = vmatprep.subr.mxu1 %v6908_v37  ;;  %916 = vmatpush1.msra.mxu0 %v884_v39  ;;  %v5327_v39 = vld [vmem:[%s7747_s4 + $0x40] sm:$0xff] }
 0x1ff   :  { %5914 = vmatpush3.msra.mxu1 %v6908_v37  ;;  %v716_v37 = vld [vmem:[#allocation2 + $0x78] sm:$0xff]  ;;  %917 = vmatprep.subr.mxu0 %v883_v40 }
 0x200   :  { %5915 = vmatprep.subr.mxu1 %v6904_v35  ;;  %918 = vmatpush1.msra.mxu0 %v882_v41  ;;  %v5328_v41 = vld [vmem:[%s7747_s4 + $0x48] sm:$0xff] }
 0x201   :  { %5916 = vmatpush3.msra.mxu1 %v6904_v35  ;;  %v714_v35 = vld [vmem:[#allocation2 + $0x68] sm:$0xff]  ;;  %919 = vmatprep.subr.mxu0 %v881_v42 }
 0x202   :  { %5917 = vmatprep.subr.mxu1 %v6900_v33  ;;  %920 = vmatpush1.msra.mxu0 %v880_v43  ;;  %v5332_v42 = vld [vmem:[%s7747_s4 + $0x68] sm:$0xff]  ;;  %v1369_v43 = vld [vmem:[#allocation7 + $0x38] sm:$0xff] }
 0x203   :  { %5918 = vmatpush3.msra.mxu1 %v6900_v33  ;;  %921 = vmatprep.subr.mxu0 %v879_v44  ;;  %v1368_v44 = vld [vmem:[#allocation7 + $0x30] sm:$0xff] }
 0x204   :  { %5919 = vmatprep.subr.mxu1 %v6896_v31  ;;  %922 = vmatpush1.msra.mxu0 %v878_v45  ;;  %v1367_v45 = vld [vmem:[#allocation7 + $0x28] sm:$0xff] }
 0x205   :  { %5920 = vmatpush3.msra.mxu1 %v6896_v31  ;;  %923 = vmatprep.subr.mxu0 %v877_v46  ;;  %v1366_v46 = vld [vmem:[#allocation7 + $0x20] sm:$0xff] }
 0x206   :  { %5921 = vmatprep.subr.mxu1 %v6892_v29  ;;  %924 = vmatpush1.msra.mxu0 %v876_v47  ;;  %v1365_v47 = vld [vmem:[#allocation7 + $0x18] sm:$0xff] }
 0x207   :  { %5922 = vmatpush3.msra.mxu1 %v6892_v29  ;;  %925 = vmatprep.subr.mxu0 %v875_v48  ;;  %v1364_v48 = vld [vmem:[#allocation7 + $0x10] sm:$0xff] }
 0x208   :  { %5923 = vmatprep.subr.mxu1 %v6888_v27  ;;  %926 = vmatpush1.msra.mxu0 %v874_v49  ;;  %v1363_v49 = vld [vmem:[#allocation7 + $0x8] sm:$0xff] }
 0x209   :  { %5924 = vmatpush3.msra.mxu1 %v6888_v27  ;;  %v713_v27 = vld [vmem:[#allocation2 + $0x60] sm:$0xff]  ;;  %927 = vmatprep.subr.mxu0 %v873_v50 }
 0x20a   :  { %5925 = vmatprep.subr.mxu1 %v6884_v25  ;;  %928 = vmatpush1.msra.mxu0 %v872_v51  ;;  %v1362_v50 = vld [vmem:[#allocation7] sm:$0xff] }
 0x20b   :  { %5926 = vmatpush3.msra.mxu1 %v6884_v25  ;;  %v752_v25 = vpop.permute.xlu0 %751  ;;  %929 = vmatprep.subr.mxu0 %v871_v52 }
 0x20c   :  { %5927 = vmatprep.subr.mxu1 %v6880_v23  ;;  %930 = vmatpush1.msra.mxu0 %v870_v53 }
 0x20d   :  { %5928 = vmatpush3.msra.mxu1 %v6880_v23 }
 0x20e   :  { %5929 = vmatprep.subr.mxu1 %v6876_v21 }
 0x20f   :  { %5930 = vmatpush3.msra.mxu1 %v6876_v21  ;;  %v748_v23 = vpop.permute.xlu0 %747  ;;  %v746_v21 = vpop.permute.xlu1 %745 }
 0x210   :  { %5932 = vmatmul.mubr.f32.vlgmr.msra.gmra.mxu1 %v376_v20  ;;  %5975 = vmatprep.subr.mxu1 %v764_v15 }
 0x211   :  { %5976 = vmatpush3.msra.mxu1 %v764_v15  ;;  %5934 = vmatprep.mubr.f32.mxu1 %v377_v22 }
 0x212   :  { %5977 = vmatprep.subr.mxu1 %v762_v16 }
 0x213   :  { %5978 = vmatpush3.msra.mxu1 %v762_v16  ;;  %v744_v29 = vpop.permute.xlu0 %743  ;;  %v742_v30 = vpop.permute.xlu1 %741 }
 0x214   :  { %5935 = vmatmul.mubr.f32.gmra.mxu1 %v378_v26  ;;  %5979 = vmatprep.subr.mxu1 %v760_v17  ;;  %v5321_v26 = vld [vmem:[%s7747_s4 + $0x20] sm:$0xff] }
 0x215   :  { %5980 = vmatpush3.msra.mxu1 %v760_v17  ;;  %6007 = vmatprep.mubr.f32.mxu1 %v713_v27  ;;  %v988_v27 = vld [vmem:[%s7747_s4] sm:$0xff] }
 0x216   :  { %5981 = vmatprep.subr.mxu1 %v758_v18 }
 0x217   :  { %5982 = vmatpush3.msra.mxu1 %v758_v18  ;;  %v740_v31 = vpop.permute.xlu0 %739  ;;  %v738_v32 = vpop.permute.xlu1 %737 }
 0x218   :  { %5983 = vmatprep.subr.mxu1 %v756_v19 }
 0x219   :  { %5984 = vmatpush3.msra.mxu1 %v756_v19 }
 0x21a   :  { %5985 = vmatprep.subr.mxu1 %v754_v24 }
 0x21b   :  { %5986 = vmatpush3.msra.mxu1 %v754_v24  ;;  %v736_v33 = vpop.permute.xlu0 %735  ;;  %v734_v34 = vpop.permute.xlu1 %733 }
 0x21c   :  { %5987 = vmatprep.subr.mxu1 %v752_v25 }
 0x21d   :  { %5988 = vmatpush3.msra.mxu1 %v752_v25 }
 0x21e   :  { %5989 = vmatprep.subr.mxu1 %v750_v28 }
 0x21f   :  { %5990 = vmatpush3.msra.mxu1 %v750_v28 }
 0x220   :  { %5991 = vmatprep.subr.mxu1 %v748_v23 }
 0x221   :  { %5992 = vmatpush3.msra.mxu1 %v748_v23 }
 0x222   :  { %5993 = vmatprep.subr.mxu1 %v746_v21 }
 0x223   :  { %5994 = vmatpush3.msra.mxu1 %v746_v21  ;;  %v989_v21 = vld [vmem:[%s7747_s4 + $0x8] sm:$0xff] }
 0x224   :  { %5995 = vmatprep.subr.mxu1 %v744_v29 }
 0x225   :  { %5996 = vmatpush3.msra.mxu1 %v744_v29  ;;  %v5331_v29 = vld [vmem:[%s7747_s4 + $0x60] sm:$0xff] }
 0x226   :  { %5997 = vmatprep.subr.mxu1 %v742_v30 }
 0x227   :  { %5998 = vmatpush3.msra.mxu1 %v742_v30 }
 0x228   :  { %5999 = vmatprep.subr.mxu1 %v740_v31 }
 0x229   :  { %6000 = vmatpush3.msra.mxu1 %v740_v31 }
 0x22a   :  { %6001 = vmatprep.subr.mxu1 %v738_v32 }
 0x22b   :  { %6002 = vmatpush3.msra.mxu1 %v738_v32 }
 0x22c   :  { %6003 = vmatprep.subr.mxu1 %v736_v33 }
 0x22d   :  { %6004 = vmatpush3.msra.mxu1 %v736_v33 }
 0x22e   :  { %6005 = vmatprep.subr.mxu1 %v734_v34 }
 0x22f   :  { %6006 = vmatpush3.msra.mxu1 %v734_v34 }
 0x230   :  { %6008 = vmatmul.mubr.f32.vlgmr.msra.gmra.mxu1 %v714_v35  ;;  %v5322_v35 = vld [vmem:[%s7747_s4 + $0x28] sm:$0xff] }
 0x231   :  { %6010 = vmatprep.mubr.f32.mxu1 %v715_v36 }
 0x234   :  { %6011 = vmatmul.mubr.f32.gmra.mxu1 %v716_v37 }
 0x235   :  { %6032 = vmatprep.mubr.msk.f32.mxu1 %vm1009_vm2, %v988_v27 }
 0x23e   :  { %v5971_v60 = vpop.f32.mrf.mxu0 }
 0x240   :  { %v689_v63 = vpop.f32.mrf.mxu0 }
 0x242   :  { %v5974_v5 = vpop.f32.mrf.mxu0 }
 0x244   :  { %v699_v11 = vpop.f32.mrf.mxu0 }
 0x2b0   :  { %v5895_v54 = vpop.f32.mrf.mxu1 }
 0x2b2   :  { %v514_v55 = vpop.f32.mrf.mxu1 }
 0x2b4   :  { %v5898_v56 = vpop.f32.mrf.mxu1 }
 0x2b6   :  { %v524_v57 = vpop.f32.mrf.mxu1 }
 0x2d0   :  { %v5933_v58 = vpop.f32.mrf.mxu1 }
 0x2d1   :  { %v605_v3 = vadd.f32 %v5933_v58, %v5895_v54 }
 0x2d2   :  { %v599_v59 = vpop.f32.mrf.mxu1 }
 0x2d3   :  { %v600_v62 = vadd.f32 %v599_v59, %v514_v55  ;;  %v709_v9 = vadd.f32 %v5971_v60, %v605_v3 }
 0x2d4   :  { %v5936_v61 = vpop.f32.mrf.mxu1 }
 0x2d5   :  { %v708_v4 = vadd.f32 %v689_v63, %v600_v62  ;;  %v615_v14 = vadd.f32 %v5936_v61, %v5898_v56 }
 0x2d6   :  { %v609_v1 = vpop.f32.mrf.mxu1 }
 0x2d7   :  { %v610_v10 = vadd.f32 %v609_v1, %v524_v57  ;;  %v711_v17 = vadd.f32 %v5974_v5, %v615_v14  ;;  %v1534_v5 = vld [vmem:[#allocation5 + $0xf0] sm:$0xff]  ;;  %v1525_v14 = vld [vmem:[#allocation5 + $0xa8] sm:$0xff] }
 0x2d9   :  { %v710_v15 = vadd.f32 %v699_v11, %v610_v10  ;;  %v1529_v10 = vld [vmem:[#allocation5 + $0xc8] sm:$0xff]  ;;  %v1528_v11 = vld [vmem:[#allocation5 + $0xc0] sm:$0xff] }
 0x2f0   :  { %v6009_v2 = vpop.f32.mrf.mxu1 }
 0x2f1   :  { %v867_v12 = vadd.f32 %v6009_v2, %v709_v9  ;;  %v1530_v9 = vld [vmem:[#allocation5 + $0xd0] sm:$0xff] }
 0x2f2   :  { %v847_v6 = vpop.f32.mrf.mxu1 }
 0x2f3   :  { %v866_v7 = vadd.f32 %v847_v6, %v708_v4  ;;  %v1535_v4 = vld [vmem:[#allocation5 + $0xf8] sm:$0xff]  ;;  %v1533_v6 = vld [vmem:[#allocation5 + $0xe8] sm:$0xff] }
 0x2f4   :  { %v6012_v8 = vpop.f32.mrf.mxu1 }
 0x2f5   :  { %5317 = vmatmul.mubr.msk.f32.vlgmr.msra.gmra.mxu0 %vm886_vm1, %v866_v7  ;;  %v869_v18 = vadd.f32 %v6012_v8, %v711_v17  ;;  %v1532_v7 = vld [vmem:[#allocation5 + $0xe0] sm:$0xff]  ;;  %v1531_v8 = vld [vmem:[#allocation5 + $0xd8] sm:$0xff]  ;;  %v1522_v17 = vld [vmem:[#allocation5 + $0x90] sm:$0xff] }
 0x2f6   :  { %969 = vmatprep.mubr.f32.mxu0 %v6657_v0  ;;  %v857_v13 = vpop.f32.mrf.mxu1 }
 0x2f7   :  { %v868_v16 = vadd.f32 %v857_v13, %v710_v15  ;;  %v1526_v13 = vld [vmem:[#allocation5 + $0xb0] sm:$0xff]  ;;  %v1524_v15 = vld [vmem:[#allocation5 + $0xa0] sm:$0xff] }
 0x2f9   :  { %5318 = vmatmul.mubr.msk.f32.gmra.mxu0 %vm886_vm1, %v867_v12  ;;  %v1527_v12 = vld [vmem:[#allocation5 + $0xb8] sm:$0xff] }
 0x2fa   :  { %975 = vmatprep.mubr.f32.mxu0 %v6657_v0 }
 0x2fd   :  { %5319 = vmatmul.mubr.msk.f32.gmra.mxu0 %vm886_vm1, %v868_v16  ;;  %v1523_v16 = vld [vmem:[#allocation5 + $0x98] sm:$0xff] }
 0x2fe   :  { %981 = vmatprep.mubr.f32.mxu0 %v6657_v0 }
 0x301   :  { %5320 = vmatmul.mubr.msk.f32.gmra.mxu0 %vm886_vm1, %v869_v18  ;;  %v1521_v18 = vld [vmem:[#allocation5 + $0x88] sm:$0xff] }
 0x302   :  { %6021 = vmatprep.mubr.msk.f32.mxu0 %vm1009_vm2, %v5321_v26 }
 0x3b5   :  { %v965_v19 = vpop.f32.mrf.mxu0 }
 0x3b7   :  { %v7051_v20 = vpop.f32.mrf.mxu0 }
 0x3b9   :  { %v971_v22 = vpop.f32.mrf.mxu0 }
 0x3bb   :  { %v973_v24 = vpop.f32.mrf.mxu0 }
 0x3bd   :  { %v977_v25 = vpop.f32.mrf.mxu0 }
 0x3be   :  { %1001 = vrot.lane.b32.xlu1 %v977_v25, %s6658_s0 }
 0x3bf   :  { %v979_v28 = vpop.f32.mrf.mxu0 }
 0x3c1   :  { %v983_v23 = vpop.f32.mrf.mxu0 }
 0x3c2   :  { %997 = vrot.lane.b32.xlu1 %v965_v19, %s6658_s0  ;;  %1003 = vrot.lane.b32.xlu0 %v983_v23, %s6658_s0 }
 0x3c3   :  { %6024 = vmatprep.subr.mxu1 %v983_v23  ;;  %v985_v30 = vpop.f32.mrf.mxu0 }
 0x3c4   :  { %6025 = vmatpush3.msra.mxu1 %v983_v23 }
 0x3c5   :  { %6026 = vmatprep.subr.mxu1 %v977_v25 }
 0x3c6   :  { %6027 = vmatpush3.msra.mxu1 %v977_v25  ;;  %1269 = vrot.lane.b32.xlu1 %v979_v28, %s6658_s0 }
 0x3c7   :  { %999 = vrot.lane.b32.xlu0 %v971_v22, %s6658_s0  ;;  %6028 = vmatprep.subr.mxu1 %v971_v22 }
 0x3c8   :  { %6029 = vmatpush3.msra.mxu1 %v971_v22 }
 0x3c9   :  { %6030 = vmatprep.subr.mxu1 %v965_v19 }
 0x3ca   :  { %6031 = vmatpush3.msra.mxu1 %v965_v19  ;;  %1265 = vrot.lane.b32.xlu1 %v7051_v20, %s6658_s0  ;;  %v1520_v19 = vld [vmem:[#allocation5 + $0x80] sm:$0xff] }
 0x3cb   :  { %1271 = vrot.lane.b32.xlu0 %v985_v30, %s6658_s0  ;;  %6033 = vmatmul.mubr.msk.f32.vlgmr.msra.gmra.mxu1 %vm1009_vm2, %v989_v21 }
 0x3cc   :  { %6054 = vmatprep.mubr.msk.f32.mxu1 %vm1009_vm2, %v5331_v29 }
 0x3cf   :  { %1267 = vrot.lane.b32.xlu0 %v973_v24, %s6658_s0 }
 0x430   :  { %v1002_v31 = vpop.permute.xlu1 %1001 }
 0x434   :  { %v1004_v32 = vpop.permute.xlu0 %1003  ;;  %v998_v33 = vpop.permute.xlu1 %997 }
 0x435   :  { %6013 = vmatprep.subr.mxu0 %v1004_v32 }
 0x436   :  { %6014 = vmatpush3.msra.mxu0 %v1004_v32 }
 0x437   :  { %6015 = vmatprep.subr.mxu0 %v1002_v31 }
 0x438   :  { %6016 = vmatpush3.msra.mxu0 %v1002_v31  ;;  %v1270_v36 = vpop.permute.xlu1 %1269 }
 0x439   :  { %v1000_v34 = vpop.permute.xlu0 %999 }
 0x43a   :  { %6017 = vmatprep.subr.mxu0 %v1000_v34 }
 0x43b   :  { %6018 = vmatpush3.msra.mxu0 %v1000_v34 }
 0x43c   :  { %6019 = vmatprep.subr.mxu0 %v998_v33  ;;  %v1266_v40 = vpop.permute.xlu1 %1265 }
 0x43d   :  { %6020 = vmatpush3.msra.mxu0 %v998_v33  ;;  %v1272_v37 = vpop.permute.xlu0 %1271 }
 0x43e   :  { %6035 = vmatprep.subr.mxu0 %v985_v30  ;;  %6046 = vmatprep.subr.mxu1 %v1272_v37 }
 0x43f   :  { %6022 = vmatmul.mubr.msk.f32.vlgmr.msra.gmra.mxu0 %vm1009_vm2, %v5322_v35  ;;  %6047 = vmatpush3.msra.mxu1 %v1272_v37 }
 0x440   :  { %6036 = vmatpush3.msra.mxu0 %v985_v30  ;;  %6048 = vmatprep.subr.mxu1 %v1270_v36 }
 0x441   :  { %6037 = vmatprep.subr.mxu0 %v979_v28  ;;  %6049 = vmatpush3.msra.mxu1 %v1270_v36  ;;  %v1268_v38 = vpop.permute.xlu0 %1267 }
 0x442   :  { %6038 = vmatpush3.msra.mxu0 %v979_v28  ;;  %6050 = vmatprep.subr.mxu1 %v1268_v38 }
 0x443   :  { %6039 = vmatprep.subr.mxu0 %v973_v24  ;;  %6051 = vmatpush3.msra.mxu1 %v1268_v38 }
 0x444   :  { %6040 = vmatpush3.msra.mxu0 %v973_v24  ;;  %6052 = vmatprep.subr.mxu1 %v1266_v40 }
 0x445   :  { %6041 = vmatprep.subr.mxu0 %v7051_v20  ;;  %6043 = vmatprep.mubr.msk.f32.mxu0 %vm1009_vm2, %v5327_v39 }
 0x446   :  { %6042 = vmatpush3.msra.mxu0 %v7051_v20  ;;  %6053 = vmatpush3.msra.mxu1 %v1266_v40 }
 0x447   :  { %6044 = vmatmul.mubr.msk.f32.vlgmr.msra.gmra.mxu0 %vm1009_vm2, %v5328_v41  ;;  %6055 = vmatmul.mubr.msk.f32.vlgmr.msra.gmra.mxu1 %vm1009_vm2, %v5332_v42 }
 0x448   :  { %6057 = vmatprep.subr.mxu0 %v1369_v43  ;;  %1606 = vmatprep.mubr.f32.mxu1 %v6657_v0 }
 0x449   :  { %6058 = vmatpush3.msra.mxu0 %v1369_v43  ;;  %1558 = vmatprep.subr.mxu1 %v1535_v4 }
 0x44a   :  { %6059 = vmatprep.subr.mxu0 %v1368_v44  ;;  %1559 = vmatpush1.msra.mxu1 %v1534_v5 }
 0x44b   :  { %6060 = vmatpush3.msra.mxu0 %v1368_v44  ;;  %1560 = vmatprep.subr.mxu1 %v1533_v6 }
 0x44c   :  { %6061 = vmatprep.subr.mxu0 %v1367_v45  ;;  %1561 = vmatpush1.msra.mxu1 %v1532_v7  ;;  %v5345_v7 = vld [vmem:[%s7747_s4 + $0xc0] sm:$0xff] }
 0x44d   :  { %6062 = vmatpush3.msra.mxu0 %v1367_v45  ;;  %1562 = vmatprep.subr.mxu1 %v1531_v8  ;;  %v1946_v8 = vld [vmem:[#allocation7 + $0x78] sm:$0xff] }
 0x44e   :  { %6063 = vmatprep.subr.mxu0 %v1366_v46  ;;  %1563 = vmatpush1.msra.mxu1 %v1530_v9  ;;  %v1945_v9 = vld [vmem:[#allocation7 + $0x70] sm:$0xff] }
 0x44f   :  { %6064 = vmatpush3.msra.mxu0 %v1366_v46  ;;  %1564 = vmatprep.subr.mxu1 %v1529_v10 }
 0x450   :  { %6065 = vmatprep.subr.mxu0 %v1365_v47  ;;  %1565 = vmatpush1.msra.mxu1 %v1528_v11  ;;  %v5342_v11 = vld [vmem:[%s7747_s4 + $0xa0] sm:$0xff] }
 0x451   :  { %6066 = vmatpush3.msra.mxu0 %v1365_v47  ;;  %1566 = vmatprep.subr.mxu1 %v1527_v12  ;;  %v1498_v47 = vlaneseq }
 0x452   :  { %6067 = vmatprep.subr.mxu0 %v1364_v48  ;;  %1567 = vmatpush1.msra.mxu1 %v1526_v13  ;;  %v5341_v13 = vld [vmem:[%s7747_s4 + $0x80] sm:$0xff] }
 0x453   :  { %6068 = vmatpush3.msra.mxu0 %v1364_v48  ;;  %1568 = vmatprep.subr.mxu1 %v1525_v14  ;;  %v1499_v48 = vshrl.u32 %v1498_v47, 7  ;;  %v2072_v47 = vld [vmem:[#allocation10 + $0x18] sm:$0xff] }
 0x454   :  { %6069 = vmatprep.subr.mxu0 %v1363_v49  ;;  %1569 = vmatpush1.msra.mxu1 %v1524_v15  ;;  %v5347_v15 = vld [vmem:[%s7747_s4 + $0xe0] sm:$0xff] }
 0x455   :  { %6070 = vmatpush3.msra.mxu0 %v1363_v49  ;;  %1570 = vmatprep.subr.mxu1 %v1523_v16  ;;  %v1489_v49 = vld [vmem:[#allocation8] sm:$0x1] }
 0x456   :  { %6071 = vmatprep.subr.mxu0 %v1362_v50  ;;  %1571 = vmatpush1.msra.mxu1 %v1522_v17  ;;  %v1944_v17 = vld [vmem:[#allocation7 + $0x68] sm:$0xff] }
 0x457   :  { %6072 = vmatpush3.msra.mxu0 %v1362_v50  ;;  %1572 = vmatprep.subr.mxu1 %v1521_v18  ;;  %v7117_v50 = vsub.s32 0, %v1499_v48  ;;  %v1943_v18 = vld [vmem:[#allocation7 + $0x60] sm:$0xff]  ;;  %v2071_v48 = vld [vmem:[#allocation10 + $0x10] sm:$0xff] }
 0x458   :  { %6079 = vmatprep.subr.mxu0 %v6657_v0  ;;  %1573 = vmatpush1.msra.mxu1 %v1520_v19  ;;  %v1942_v19 = vld [vmem:[#allocation7 + $0x58] sm:$0xff] }
 0x459   :  { %6093 = vmatprep.subr.mxu1 %v6657_v0 }
 0x48b   :  { %v6034_v52 = vpop.f32.mrf.mxu1 }
 0x48d   :  { %v1163_v54 = vpop.f32.mrf.mxu1 }
 0x4ff   :  { %v6023_v51 = vpop.f32.mrf.mxu0 }
 0x500   :  { %v1169_v55 = vadd.f32 %v6034_v52, %v6023_v51 }
 0x501   :  { %v1082_v53 = vpop.f32.mrf.mxu0 }
 0x502   :  { %v1164_v58 = vadd.f32 %v1163_v54, %v1082_v53  ;;  %v1494_v53 = vld [vmem:[#allocation8 + $0x4] sm:$0x1] }
 0x507   :  { %v6045_v56 = vpop.f32.mrf.mxu0  ;;  %v6056_v57 = vpop.f32.mrf.mxu1 }
 0x508   :  { %v1257_v59 = vadd.f32 %v6045_v56, %v1169_v55 }
 0x509   :  { %v1247_v60 = vpop.f32.mrf.mxu0  ;;  %v1349_v62 = vpop.f32.mrf.mxu1 }
 0x50a   :  { %v1256_v61 = vadd.f32 %v1247_v60, %v1164_v58  ;;  %v7100_v1 = vadd.f32 %v6056_v57, %v1257_v59 }
 0x50c   :  { %v7098_v63 = vadd.f32 %v1349_v62, %v1256_v61  ;;  %v1361_v3 = vmul.f32 %v7100_v1, %v7100_v1 }
 0x50e   :  { %v1360_v2 = vmul.f32 %v7098_v63, %v7098_v63  ;;  %6073 = vmatprep.mubr.msk.f32.mxu0 %vm886_vm1, %v7098_v63 }
 0x50f   :  { %6074 = vmatmul.mubr.msk.f32.vlgmr.msra.gmra.mxu0 %vm886_vm1, %v7100_v1 }
 0x510   :  { %6076 = vmatprep.mubr.msk.f32.mxu0 %vm886_vm1, %v1360_v2 }
 0x513   :  { %6077 = vmatmul.mubr.msk.f32.gmra.mxu0 %vm886_vm1, %v1361_v3 }
 0x514   :  { %6083 = vmatprep.mubr.msk.f32.mxu0 %vm6659_vm5, %v6657_v0 }
 0x5cf   :  { %v6075_v20 = vpop.f32.mrf.mxu0 }
 0x5d0   :  { %v1468_v24 = vsel %vm886_vm1, %v6075_v20, 0.0  ;;  %v1941_v20 = vld [vmem:[#allocation7 + $0x50] sm:$0xff] }
 0x5d1   :  { %v1448_v22 = vpop.f32.mrf.mxu0 }
 0x5d2   :  { %v1467_v26 = vsel %vm886_vm1, %v1448_v22, 0.0  ;;  %v1940_v22 = vld [vmem:[#allocation7 + $0x48] sm:$0xff] }
 0x5d3   :  { %v1469_v27 = vadd.f32 %v1468_v24, %v1467_v26  ;;  %v6078_v25 = vpop.f32.mrf.mxu0  ;;  %v1939_v24 = vld [vmem:[#allocation7 + $0x40] sm:$0xff] }
 0x5d4   :  { %v1478_v21 = vsel %vm886_vm1, %v6078_v25, 0.0 }
 0x5d5   :  { %v1470_v28 = vrot.slane %v1469_v27, 4  ;;  %v1458_v23 = vpop.f32.mrf.mxu0 }
 0x5d6   :  { %v1477_v29 = vsel %vm886_vm1, %v1458_v23, 0.0 }
 0x5d7   :  { %v1471_v30 = vadd.f32 %v1470_v28, %v1469_v27  ;;  %v1479_v31 = vadd.f32 %v1478_v21, %v1477_v29 }
 0x5d9   :  { %v1472_v32 = vrot.slane %v1471_v30, 2  ;;  %v1480_v33 = vrot.slane %v1479_v31, 4 }
 0x5db   :  { %v1473_v34 = vadd.f32 %v1472_v32, %v1471_v30  ;;  %v1481_v35 = vadd.f32 %v1480_v33, %v1479_v31 }
 0x5dd   :  { %v1474_v36 = vrot.slane %v1473_v34, 1  ;;  %v1482_v37 = vrot.slane %v1481_v35, 2 }
 0x5df   :  { %v1475_v38 = vadd.f32 %v1474_v36, %v1473_v34  ;;  %v1483_v39 = vadd.f32 %v1482_v37, %v1481_v35  ;;  %v2084_v35 = vld [vmem:[#allocation10 + $0x78] sm:$0xff]  ;;  %v2083_v36 = vld [vmem:[#allocation10 + $0x70] sm:$0xff]  ;;  %v2082_v37 = vld [vmem:[#allocation10 + $0x68] sm:$0xff] }
 0x5e1   :  { %v1476_v40 = vmul.f32 0.0078125, %v1475_v38  ;;  %v1484_v41 = vrot.slane %v1483_v39, 1  ;;  %v2081_v38 = vld [vmem:[#allocation10 + $0x60] sm:$0xff] }
 0x5e3   :  { %v1485_v42 = vadd.f32 %v1484_v41, %v1483_v39  ;;  %v1487_v43 = vmul.f32 %v1476_v40, %v1476_v40  ;;  %v2080_v39 = vld [vmem:[#allocation10 + $0x58] sm:$0xff]  ;;  %v2078_v41 = vld [vmem:[#allocation10 + $0x48] sm:$0xff] }
 0x5e5   :  { %v1486_v44 = vmul.f32 0.0078125, %v1485_v42  ;;  %v2077_v42 = vld [vmem:[#allocation10 + $0x40] sm:$0xff] }
 0x5e7   :  { %v1488_v45 = vsub.f32 %v1486_v44, %v1487_v43  ;;  %v2076_v43 = vld [vmem:[#allocation10 + $0x38] sm:$0xff]  ;;  %v2075_v44 = vld [vmem:[#allocation10 + $0x30] sm:$0xff] }
 0x5e9   :  { %v1490_v46 = vadd.f32 1e-05, %v1488_v45  ;;  %v2074_v45 = vld [vmem:[#allocation10 + $0x28] sm:$0xff] }
 0x5eb   :  { %6447 = vrsqrt.f32 %v1490_v46  ;;  %v2073_v46 = vld [vmem:[#allocation10 + $0x20] sm:$0xff] }
 0x5f8   :  { %v6448_v51 = vpop.eup %6447 }
 0x5f9   :  { %v1492_v52 = vmul.f32 %v6448_v51, %v1489_v49  ;;  %v2070_v49 = vld [vmem:[#allocation10 + $0x8] sm:$0xff]  ;;  %v2069_v51 = vld [vmem:[#allocation10] sm:$0xff] }
 0x5fb   :  { %v1495_v54 = vmul.f32 %v1492_v52, %v1476_v40  ;;  %v1501_v55 = vrot.slane %v1492_v52, %v7117_v50  ;;  %v2079_v40 = vld [vmem:[#allocation10 + $0x50] sm:$0xff] }
 0x5fd   :  { %v1496_v56 = vsub.f32 %v1494_v53, %v1495_v54  ;;  %v1503_v57 = vmul.f32 %v1501_v55, %v7098_v63  ;;  %v1504_v59 = vmul.f32 %v1501_v55, %v7100_v1 }
 0x5ff   :  { %v1509_v58 = vrot.slane %v1496_v56, %v7117_v50 }
 0x601   :  { %v1511_v60 = vadd.f32 %v1509_v58, %v1503_v57  ;;  %v1512_v61 = vadd.f32 %v1509_v58, %v1504_v59 }
 0x603   :  { %vm1513_vm3 = vcmp.ge.f32.partialorder %v1511_v60, 0.0  ;;  %v1515_v62 = vmul.f32 0.2, %v1511_v60  ;;  %v1516_v3 = vmul.f32 0.2, %v1512_v61  ;;  %vm1514_vm4 = vcmp.ge.f32.partialorder %v1512_v61, 0.0 }
 0x605   :  { %v1517_v2 = vsel %vm1513_vm3, %v1511_v60, %v1515_v62  ;;  %v1518_v4 = vsel %vm1514_vm4, %v1512_v61, %v1516_v3 }
 0x606   :  { %5339 = vmatmul.mubr.msk.f32.vlgmr.msra.gmra.mxu1 %vm886_vm1, %v1517_v2 }
 0x607   :  { %1612 = vmatprep.mubr.f32.mxu1 %v6657_v0 }
 0x60a   :  { %5340 = vmatmul.mubr.msk.f32.gmra.mxu1 %vm886_vm1, %v1518_v4 }
 0x60b   :  { %6097 = vmatprep.mubr.msk.f32.mxu1 %vm6659_vm5, %v6657_v0 }
 0x6c6   :  { %v1608_v63 = vpop.f32.mrf.mxu1 }
 0x6c7   :  { %1625 = vrot.lane.b32.xlu1 %v1608_v63, %s6658_s0 }
 0x6c8   :  { %v1610_v1 = vpop.f32.mrf.mxu1 }
 0x6ca   :  { %v1614_v5 = vpop.f32.mrf.mxu1 }
 0x6cb   :  { %1857 = vrot.lane.b32.xlu1 %v1610_v1, %s6658_s0  ;;  %1627 = vrot.lane.b32.xlu0 %v1614_v5, %s6658_s0 }
 0x6cc   :  { %v1616_v6 = vpop.f32.mrf.mxu1 }
 0x6cd   :  { %6094 = vmatpush3.msra.mxu1 %v1616_v6 }
 0x6ce   :  { %6095 = vmatprep.subr.mxu1 %v6657_v0 }
 0x6cf   :  { %1859 = vrot.lane.b32.xlu0 %v1616_v6, %s6658_s0  ;;  %6096 = vmatpush3.msra.mxu1 %v1610_v1 }
 0x6d0   :  { %6098 = vmatmul.mubr.msk.f32.vlgmr.msra.gmra.mxu1 %vm165_vm0, %v5345_v7  ;;  %6107 = vmatprep.subr.mxu1 %v1946_v8 }
 0x6d1   :  { %6108 = vmatpush3.msra.mxu1 %v1946_v8 }
 0x6d2   :  { %6109 = vmatprep.subr.mxu1 %v1945_v9 }
 0x6d3   :  { %6110 = vmatpush3.msra.mxu1 %v1945_v9 }
 0x6d4   :  { %6111 = vmatprep.subr.mxu1 %v1944_v17 }
 0x6d5   :  { %6112 = vmatpush3.msra.mxu1 %v1944_v17 }
 0x6d6   :  { %6113 = vmatprep.subr.mxu1 %v1943_v18 }
 0x6d7   :  { %6114 = vmatpush3.msra.mxu1 %v1943_v18 }
 0x6d8   :  { %6115 = vmatprep.subr.mxu1 %v1942_v19 }
 0x6d9   :  { %6116 = vmatpush3.msra.mxu1 %v1942_v19 }
 0x6da   :  { %6117 = vmatprep.subr.mxu1 %v1941_v20 }
 0x6db   :  { %6118 = vmatpush3.msra.mxu1 %v1941_v20  ;;  %v2169_v20 = vld [vmem:[#allocation11] sm:$0x3] }
 0x6dc   :  { %6119 = vmatprep.subr.mxu1 %v1940_v22 }
 0x6dd   :  { %6120 = vmatpush3.msra.mxu1 %v1940_v22 }
 0x6de   :  { %6121 = vmatprep.subr.mxu1 %v1939_v24 }
 0x6df   :  { %6122 = vmatpush3.msra.mxu1 %v1939_v24 }
 0x6e0   :  { %6126 = vmatprep.subr.mxu1 %v6657_v0 }
 0x739   :  { %v1626_v12 = vpop.permute.xlu1 %1625 }
 0x73d   :  { %v1628_v10 = vpop.permute.xlu0 %1627  ;;  %v1858_v16 = vpop.permute.xlu1 %1857 }
 0x73e   :  { %6080 = vmatpush3.msra.mxu0 %v1628_v10  ;;  %v2047_v10 = vld [vmem:[#allocation8 + $0x1] sm:$0x1] }
 0x73f   :  { %6081 = vmatprep.subr.mxu0 %v6657_v0 }
 0x740   :  { %6082 = vmatpush3.msra.mxu0 %v1626_v12 }
 0x741   :  { %6084 = vmatmul.mubr.msk.f32.vlgmr.msra.gmra.mxu0 %vm165_vm0, %v5342_v11  ;;  %6086 = vmatprep.subr.mxu0 %v6657_v0  ;;  %v1860_v14 = vpop.permute.xlu0 %1859 }
 0x742   :  { %6087 = vmatpush3.msra.mxu0 %v1614_v5  ;;  %6090 = vmatprep.mubr.msk.f32.mxu0 %vm6659_vm5, %v6657_v0 }
 0x743   :  { %6088 = vmatprep.subr.mxu0 %v6657_v0 }
 0x744   :  { %6089 = vmatpush3.msra.mxu0 %v1608_v63 }
 0x745   :  { %6091 = vmatmul.mubr.msk.f32.vlgmr.msra.gmra.mxu0 %vm165_vm0, %v5341_v13  ;;  %6100 = vmatprep.subr.mxu0 %v6657_v0  ;;  %v2052_v13 = vld [vmem:[#allocation8 + $0x5] sm:$0x1] }
 0x746   :  { %6101 = vmatpush3.msra.mxu0 %v1860_v14  ;;  %6104 = vmatprep.mubr.msk.f32.mxu0 %vm6659_vm5, %v6657_v0 }
 0x747   :  { %6102 = vmatprep.subr.mxu0 %v6657_v0 }
 0x748   :  { %6103 = vmatpush3.msra.mxu0 %v1858_v16 }
 0x749   :  { %6105 = vmatmul.mubr.msk.f32.vlgmr.msra.gmra.mxu0 %vm165_vm0, %v5347_v15  ;;  %2114 = vmatprep.subr.mxu0 %v2084_v35  ;;  %v2088_v35 = vld [vmem:[#allocation10 + $0x98] sm:$0xff] }
 0x74a   :  { %2162 = vmatprep.mubr.f32.mxu0 %v6657_v0  ;;  %2115 = vmatpush1.msra.mxu0 %v2083_v36  ;;  %v2087_v36 = vld [vmem:[#allocation10 + $0x90] sm:$0xff] }
 0x74b   :  { %2116 = vmatprep.subr.mxu0 %v2082_v37 }
 0x74c   :  { %2117 = vmatpush1.msra.mxu0 %v2081_v38 }
 0x74d   :  { %2118 = vmatprep.subr.mxu0 %v2080_v39  ;;  %v2093_v39 = vld [vmem:[%s7752_s9] sm:$0xff] }
 0x74e   :  { %2119 = vmatpush1.msra.mxu0 %v2079_v40 }
 0x74f   :  { %2120 = vmatprep.subr.mxu0 %v2078_v41 }
 0x750   :  { %2121 = vmatpush1.msra.mxu0 %v2077_v42 }
 0x751   :  { %2122 = vmatprep.subr.mxu0 %v2076_v43 }
 0x752   :  { %2123 = vmatpush1.msra.mxu0 %v2075_v44 }
 0x753   :  { %2124 = vmatprep.subr.mxu0 %v2074_v45  ;;  %v2482_v45 = vrot.slane %v2093_v39, %v7117_v50  ;;  %v5370_v39 = vld [vmem:[%s7747_s4 + $0x108] sm:$0xff] }
 0x754   :  { %2125 = vmatpush1.msra.mxu0 %v2073_v46 }
 0x755   :  { %2126 = vmatprep.subr.mxu0 %v2072_v47 }
 0x756   :  { %2127 = vmatpush1.msra.mxu0 %v2071_v48 }
 0x757   :  { %2128 = vmatprep.subr.mxu0 %v2070_v49 }
 0x758   :  { %2129 = vmatpush1.msra.mxu0 %v2069_v51 }
 0x759   :  { %6131 = vmatprep.subr.mxu0 %v6657_v0 }
 0x790   :  { %v1848_v26 = vpop.f32.mrf.mxu1 }
 0x792   :  { %v6099_v27 = vpop.f32.mrf.mxu1 }
 0x793   :  { %v2171_v27 = vld [vmem:[#allocation11 + $0x2] sm:$0x3] }
 0x801   :  { %v1700_v25 = vpop.f32.mrf.mxu0 }
 0x803   :  { %v6085_v28 = vpop.f32.mrf.mxu0 }
 0x804   :  { %v2400_v28 = vld [vmem:[#allocation11 + $0x6] sm:$0x3] }
 0x805   :  { %v1773_v23 = vpop.f32.mrf.mxu0 }
 0x806   :  { %v1774_v21 = vadd.f32 %v1773_v23, %v1700_v25 }
 0x807   :  { %v6092_v29 = vpop.f32.mrf.mxu0 }
 0x808   :  { %v1852_v30 = vadd.f32 %v1848_v26, %v1774_v21  ;;  %v2489_v26 = vld [vmem:[%s7744_s1] sm:$0x3]  ;;  %v2324_v21 = vld [vmem:[#allocation11 + $0x4] sm:$0x3]  ;;  %s6662_s1 = smov 80  }
 0x809   :  { %v1932_v31 = vpop.f32.mrf.mxu0 }
 0x80a   :  { %v7162_v32 = vadd.f32 %v1932_v31, %v1852_v30  ;;  %v2092_v31 = vld [vmem:[#allocation10 + $0xb8] sm:$0xff] }
 0x80b   :  { %v6106_v33 = vpop.f32.mrf.mxu0 }
 0x80c   :  { %v1937_v34 = vmul.f32 %v7162_v32, %v7162_v32  ;;  %6123 = vmatprep.mubr.msk.f32.mxu1 %vm886_vm1, %v7162_v32  ;;  %v2090_v33 = vld [vmem:[#allocation10 + $0xa8] sm:$0xff] }
 0x80e   :  { %6124 = vmatmul.mubr.msk.f32.vlgmr.msra.gmra.mxu1 %vm886_vm1, %v1937_v34  ;;  %v2089_v34 = vld [vmem:[#allocation10 + $0xa0] sm:$0xff] }
 0x80f   :  { %6128 = vmatprep.mubr.msk.f32.mxu1 %vm6659_vm5, %v6657_v0 }
 0x8ce   :  { %v6125_v52 = vpop.f32.mrf.mxu1 }
 0x8cf   :  { %v2036_v53 = vsel %vm886_vm1, %v6125_v52, 0.0  ;;  %v2086_v52 = vld [vmem:[#allocation10 + $0x88] sm:$0xff] }
 0x8d0   :  { %v2037_v54 = vrot.slane %v2036_v53, 4  ;;  %v2019_v55 = vpop.f32.mrf.mxu1 }
 0x8d1   :  { %v2028_v56 = vsel %vm886_vm1, %v2019_v55, 0.0 }
 0x8d2   :  { %v2038_v57 = vadd.f32 %v2037_v54, %v2036_v53  ;;  %v2029_v58 = vrot.slane %v2028_v56, 4  ;;  %v2085_v53 = vld [vmem:[#allocation10 + $0x80] sm:$0xff] }
 0x8d4   :  { %v2039_v59 = vrot.slane %v2038_v57, 2  ;;  %v2030_v60 = vadd.f32 %v2029_v58, %v2028_v56 }
 0x8d6   :  { %v2040_v61 = vadd.f32 %v2039_v59, %v2038_v57  ;;  %v2031_v62 = vrot.slane %v2030_v60, 2 }
 0x8d8   :  { %v2041_v2 = vrot.slane %v2040_v61, 1  ;;  %v2032_v3 = vadd.f32 %v2031_v62, %v2030_v60  ;;  %v5362_v60 = vld [vmem:[%s7754_s11 + $0x10] sm:$0xff] }
 0x8da   :  { %v2033_v4 = vrot.slane %v2032_v3, 1  ;;  %v2042_v63 = vadd.f32 %v2041_v2, %v2040_v61  ;;  %v2908_v61 = vld [vmem:[#allocation5 + $0x178] sm:$0xff]  ;;  %v2907_v2 = vld [vmem:[#allocation5 + $0x170] sm:$0xff] }
 0x8dc   :  { %v2034_v1 = vadd.f32 %v2033_v4, %v2032_v3  ;;  %v2043_v6 = vmul.f32 0.03125, %v2042_v63  ;;  %v2906_v3 = vld [vmem:[#allocation5 + $0x168] sm:$0xff] }
 0x8dd   :  { %v5357_v4 = vld [vmem:[%s7754_s11 + $0x8] sm:$0xff] }
 0x8de   :  { %v2035_v5 = vmul.f32 0.03125, %v2034_v1  ;;  %v2574_v1 = vld [vmem:[%s7754_s11] sm:$0xff] }
 0x8e0   :  { %v2044_v7 = vmul.f32 %v2035_v5, %v2035_v5 }
 0x8e2   :  { %v2045_v8 = vsub.f32 %v2043_v6, %v2044_v7  ;;  %v5365_v6 = vld [vmem:[%s7754_s11 + $0x18] sm:$0xff]  ;;  %v2905_v7 = vld [vmem:[#allocation5 + $0x160] sm:$0xff] }
 0x8e4   :  { %v2048_v9 = vadd.f32 1e-05, %v2045_v8  ;;  %v2904_v8 = vld [vmem:[#allocation5 + $0x158] sm:$0xff] }
 0x8e6   :  { %6449 = vrsqrt.f32 %v2048_v9  ;;  %v2903_v9 = vld [vmem:[#allocation5 + $0x150] sm:$0xff] }
 0x8f3   :  { %v6450_v11 = vpop.eup %6449 }
 0x8f4   :  { %v2050_v12 = vmul.f32 %v6450_v11, %v2047_v10  ;;  %v2902_v10 = vld [vmem:[#allocation5 + $0x148] sm:$0xff]  ;;  %v2901_v11 = vld [vmem:[#allocation5 + $0x140] sm:$0xff] }
 0x8f6   :  { %v2053_v14 = vmul.f32 %v2050_v12, %v2035_v5  ;;  %v2059_v15 = vrot.slane %v2050_v12, %v7117_v50  ;;  %v2900_v12 = vld [vmem:[#allocation5 + $0x138] sm:$0xff] }
 0x8f8   :  { %v2054_v16 = vsub.f32 %v2052_v13, %v2053_v14  ;;  %v2061_v18 = vmul.f32 %v2059_v15, %v7162_v32  ;;  %v2091_v32 = vld [vmem:[#allocation10 + $0xb0] sm:$0xff]  ;;  %v2899_v13 = vld [vmem:[#allocation5 + $0x130] sm:$0xff]  ;;  %v2898_v14 = vld [vmem:[#allocation5 + $0x128] sm:$0xff] }
 0x8f9   :  { %v2897_v15 = vld [vmem:[#allocation5 + $0x120] sm:$0xff] }
 0x8fa   :  { %v2066_v17 = vrot.slane %v2054_v16, %v7117_v50  ;;  %v2896_v16 = vld [vmem:[#allocation5 + $0x118] sm:$0xff] }
 0x8fc   :  { %v2068_v19 = vadd.f32 %v2066_v17, %v2061_v18  ;;  %v2895_v17 = vld [vmem:[#allocation5 + $0x110] sm:$0xff]  ;;  %v2894_v18 = vld [vmem:[#allocation5 + $0x108] sm:$0xff] }
 0x8fe   :  { %5351 = vmatmul.mubr.msk.f32.vlgmr.msra.gmra.mxu0 %vm886_vm1, %v2068_v19  ;;  %v2893_v19 = vld [vmem:[#allocation5 + $0x100] sm:$0xff] }
 0x8ff   :  { %6133 = vmatprep.mubr.msk.f32.mxu0 %vm6659_vm5, %v6657_v0 }
 0x9be   :  { %v2164_v22 = vpop.f32.mrf.mxu0 }
 0x9bf   :  { %2173 = vrot.lane.b32.xlu0 %v2164_v22, %s6658_s0  ;;  %6132 = vmatpush3.msra.mxu0 %v2164_v22 }
 0x9c0   :  { %v2166_v24 = vpop.f32.mrf.mxu0  ;;  %6141 = vmatprep.subr.mxu0 %v6657_v0  ;;  %6134 = vmatmul.mubr.msk.f32.vlgmr.msra.gmra.mxu0 %vm2176_vm6, %v2169_v20 }
 0x9c1   :  { %2402 = vrot.lane.b32.xlu1 %v2166_v24, %s6658_s0  ;;  %6143 = vmatprep.mubr.msk.f32.mxu0 %vm6659_vm5, %v6657_v0 }
 0x9c3   :  { %2491 = vrot.lane.b32.xlu0 %v2489_v26, %s6649_s18 }
 0xa31   :  { %v2174_v25 = vpop.permute.xlu0 %2173 }
 0xa32   :  { %6127 = vmatpush3.msra.mxu1 %v2174_v25 }
 0xa33   :  { %6129 = vmatmul.mubr.msk.f32.vlgmr.msra.gmra.mxu1 %vm2176_vm6, %v2171_v27  ;;  %6136 = vmatprep.subr.mxu1 %v6657_v0  ;;  %v2403_v23 = vpop.permute.xlu1 %2402 }
 0xa34   :  { %6137 = vmatpush3.msra.mxu1 %v2166_v24  ;;  %6142 = vmatpush3.msra.mxu0 %v2403_v23 }
 0xa35   :  { %6138 = vmatprep.mubr.msk.f32.mxu1 %vm6659_vm5, %v6657_v0  ;;  %6144 = vmatmul.mubr.msk.f32.vlgmr.msra.gmra.mxu0 %vm2176_vm6, %v2400_v28  ;;  %v2492_v54 = vpop.permute.xlu0 %2491 }
 0xa36   :  { %6146 = vmatprep.subr.mxu0 %v6657_v0  ;;  %6148 = vmatprep.mubr.msk.f32.mxu0 %vm6659_vm5, %v6657_v0 }
 0xa37   :  { %6139 = vmatmul.mubr.msk.f32.vlgmr.msra.gmra.mxu1 %vm2176_vm6, %v2324_v21  ;;  %2527 = vmatprep.subr.mxu1 %v2092_v31  ;;  %v2094_v21 = vld [vmem:[%s7752_s9 + $0x8] sm:$0xff]  ;;  %s6661_s9 = smov 112  }
 0xa38   :  { %2567 = vmatprep.mubr.f32.mxu1 %v6657_v0  ;;  %2528 = vmatpush1.msra.mxu1 %v2091_v32 }
 0xa39   :  { %2529 = vmatprep.subr.mxu1 %v2090_v33  ;;  %v5371_v33 = vld [vmem:[%s7747_s4 + $0x120] sm:$0xff] }
 0xa3a   :  { %2530 = vmatpush1.msra.mxu1 %v2089_v34 }
 0xa3b   :  { %2531 = vmatprep.subr.mxu1 %v2088_v35 }
 0xa3c   :  { %2532 = vmatpush1.msra.mxu1 %v2087_v36 }
 0xa3d   :  { %2533 = vmatprep.subr.mxu1 %v2086_v52  ;;  %v3335_v52 = vld [vmem:[#allocation7 + $0x88] sm:$0xff] }
 0xa3e   :  { %2534 = vmatpush1.msra.mxu1 %v2085_v53  ;;  %v3334_v53 = vld [vmem:[#allocation7 + $0x80] sm:$0xff] }
 0xa3f   :  { %6156 = vmatprep.subr.mxu1 %v6657_v0 }
 0xa80   :  { %v2319_v29 = vpop.f32.mrf.mxu0 }
 0xa82   :  { %v6135_v30 = vpop.f32.mrf.mxu0 }
 0xaf3   :  { %v2246_v37 = vpop.f32.mrf.mxu1 }
 0xaf4   :  { %v2320_v41 = vadd.f32 %v2319_v29, %v2246_v37  ;;  %v5372_v37 = vld [vmem:[%s7747_s4 + $0x128] sm:$0xff] }
 0xaf5   :  { %v6130_v38 = vpop.f32.mrf.mxu1  ;;  %v2474_v40 = vpop.f32.mrf.mxu0 }
 0xaf6   :  { %v5369_v38 = vld [vmem:[%s7747_s4 + $0x100] sm:$0xff] }
 0xaf7   :  { %v2394_v42 = vpop.f32.mrf.mxu1  ;;  %v6145_v43 = vpop.f32.mrf.mxu0 }
 0xaf8   :  { %v2398_v44 = vadd.f32 %v2394_v42, %v2320_v41  ;;  %v5378_v42 = vld [vmem:[%s7747_s4 + $0x148] sm:$0xff]  ;;  %v5381_v43 = vld [vmem:[%s7747_s4 + $0x160] sm:$0xff] }
 0xaf9   :  { %v6140_v46 = vpop.f32.mrf.mxu1 }
 0xafa   :  { %v2478_v47 = vadd.f32 %v2474_v40, %v2398_v44  ;;  %v5377_v40 = vld [vmem:[%s7747_s4 + $0x140] sm:$0xff]  ;;  %v5382_v44 = vld [vmem:[%s7747_s4 + $0x168] sm:$0xff]  ;;  %v3340_v46 = vld [vmem:[#allocation7 + $0xb0] sm:$0xff] }
 0xafc   :  { %v2483_v48 = vadd.f32 %v2482_v45, %v2478_v47  ;;  %v3341_v45 = vld [vmem:[#allocation7 + $0xb8] sm:$0xff]  ;;  %v3339_v47 = vld [vmem:[#allocation7 + $0xa8] sm:$0xff] }
 0xafe   :  { %2485 = vst.msk [vmem:[%s7758_s15] sm:$0x3] %vm2484_vm7, %v2483_v48  ;;  %v2486_v49 = vmul.f32 0.5, %v2483_v48 }
 0xb00   :  { %v2487_v51 = vmul.f32 1.442695, %v2486_v49  ;;  %v3337_v49 = vld [vmem:[#allocation7 + $0x98] sm:$0xff] }
 0xb02   :  { %6451 = vpow2.f32 %v2487_v51  ;;  %v3336_v51 = vld [vmem:[#allocation7 + $0x90] sm:$0xff] }
 0xb0f   :  { %v6452_v55 = vpop.eup %6451 }
 0xb10   :  { %v2494_v56 = vmul.f32 %v6452_v55, %v2492_v54 }
 0xb12   :  { %2496 = vrot.lane.b32.xlu1 %v2494_v56, %s6660_s5 }
 0xb84   :  { %v2497_v57 = vpop.permute.xlu1 %2496 }
 0xb85   :  { %v2499_v58 = vadd.f32 %v2497_v57, %v2483_v48  ;;  %v3338_v48 = vld [vmem:[#allocation7 + $0xa0] sm:$0xff] }
 0xb87   :  { %5356 = vmatmul.mubr.msk.f32.vlgmr.msra.gmra.mxu1 %vm1009_vm2, %v2499_v58 }
 0xb88   :  { %6158 = vmatprep.mubr.msk.f32.mxu1 %vm6659_vm5, %v6657_v0 }
 0xc47   :  { %v2569_v59 = vpop.f32.mrf.mxu1 }
 0xc48   :  { %2578 = vrot.lane.b32.xlu0 %v2569_v59, %s6658_s0 }
 0xc49   :  { %v2571_v62 = vpop.f32.mrf.mxu1 }
 0xc4a   :  { %2813 = vrot.lane.b32.xlu1 %v2571_v62, %s6658_s0  ;;  %6157 = vmatpush3.msk.msra.mxu1 %vm2584_vm8, %v2571_v62 }
 0xc4b   :  { %6159 = vmatmul.mubr.msk.f32.vlgmr.msra.gmra.mxu1 %vm2580_vm9, %v5362_v60  ;;  %2928 = vmatprep.subr.mxu1 %v2908_v61 }
 0xc4c   :  { %2929 = vmatpush1.msra.mxu1 %v2907_v2  ;;  %2976 = vmatprep.mubr.f32.mxu1 %v6657_v0 }
 0xc4d   :  { %2930 = vmatprep.subr.mxu1 %v2906_v3 }
 0xc4e   :  { %2931 = vmatpush1.msra.mxu1 %v2905_v7  ;;  %v3504_v7 = vld [vmem:[#allocation5 + $0x1f8] sm:$0xff] }
 0xc4f   :  { %2932 = vmatprep.subr.mxu1 %v2904_v8  ;;  %v3503_v8 = vld [vmem:[#allocation5 + $0x1f0] sm:$0xff] }
 0xc50   :  { %2933 = vmatpush1.msra.mxu1 %v2903_v9  ;;  %v3502_v9 = vld [vmem:[#allocation5 + $0x1e8] sm:$0xff] }
 0xc51   :  { %2934 = vmatprep.subr.mxu1 %v2902_v10  ;;  %v3501_v10 = vld [vmem:[#allocation5 + $0x1e0] sm:$0xff] }
 0xc52   :  { %2935 = vmatpush1.msra.mxu1 %v2901_v11  ;;  %v3500_v11 = vld [vmem:[#allocation5 + $0x1d8] sm:$0xff] }
 0xc53   :  { %2936 = vmatprep.subr.mxu1 %v2900_v12  ;;  %v3499_v12 = vld [vmem:[#allocation5 + $0x1d0] sm:$0xff] }
 0xc54   :  { %2937 = vmatpush1.msra.mxu1 %v2899_v13  ;;  %v3498_v13 = vld [vmem:[#allocation5 + $0x1c8] sm:$0xff] }
 0xc55   :  { %2938 = vmatprep.subr.mxu1 %v2898_v14  ;;  %v3497_v14 = vld [vmem:[#allocation5 + $0x1c0] sm:$0xff] }
 0xc56   :  { %2939 = vmatpush1.msra.mxu1 %v2897_v15  ;;  %v3496_v15 = vld [vmem:[#allocation5 + $0x1b8] sm:$0xff] }
 0xc57   :  { %2940 = vmatprep.subr.mxu1 %v2896_v16  ;;  %v3495_v16 = vld [vmem:[#allocation5 + $0x1b0] sm:$0xff] }
 0xc58   :  { %2941 = vmatpush1.msra.mxu1 %v2895_v17  ;;  %v3494_v17 = vld [vmem:[#allocation5 + $0x1a8] sm:$0xff] }
 0xc59   :  { %2942 = vmatprep.subr.mxu1 %v2894_v18  ;;  %v3493_v18 = vld [vmem:[#allocation5 + $0x1a0] sm:$0xff] }
 0xc5a   :  { %2943 = vmatpush1.msra.mxu1 %v2893_v19  ;;  %v3492_v19 = vld [vmem:[#allocation5 + $0x198] sm:$0xff] }
 0xc5b   :  { %6186 = vmatprep.subr.mxu1 %v3341_v45 }
 0xcba   :  { %v2579_v63 = vpop.permute.xlu0 %2578 }
 0xcbb   :  { %6147 = vmatpush3.msk.msra.mxu0 %vm2584_vm8, %v2579_v63 }
 0xcbc   :  { %6149 = vmatmul.mubr.msk.f32.vlgmr.msra.gmra.mxu0 %vm2580_vm9, %v5357_v4  ;;  %6151 = vmatprep.subr.mxu0 %v6657_v0  ;;  %v2814_v5 = vpop.permute.xlu1 %2813 }
 0xcbd   :  { %6152 = vmatpush3.msk.msra.mxu0 %vm2584_vm8, %v2569_v59  ;;  %6153 = vmatprep.mubr.msk.f32.mxu0 %vm6659_vm5, %v6657_v0 }
 0xcbe   :  { %6161 = vmatprep.subr.mxu0 %v6657_v0 }
 0xcc0   :  { %6154 = vmatmul.mubr.msk.f32.vlgmr.msra.gmra.mxu0 %vm2580_vm9, %v2574_v1 }
 0xcc1   :  { %6162 = vmatpush3.msk.msra.mxu0 %vm2584_vm8, %v2814_v5  ;;  %6163 = vmatprep.mubr.msk.f32.mxu0 %vm6659_vm5, %v6657_v0 }
 0xcc4   :  { %6164 = vmatmul.mubr.msk.f32.vlgmr.msra.gmra.mxu0 %vm2580_vm9, %v5365_v6 }
 0xcc5   :  { %6168 = vmatprep.mubr.msk.f32.mxu0 %vm2176_vm6, %v5371_v33 }
 0xd0b   :  { %v2806_v20 = vpop.f32.mrf.mxu1 }
 0xd0d   :  { %v6160_v22 = vpop.f32.mrf.mxu1 }
 0xd0e   :  { %v3490_v22 = vld [vmem:[#allocation5 + $0x188] sm:$0xff] }
 0xd7c   :  { %v2653_v24 = vpop.f32.mrf.mxu0 }
 0xd7e   :  { %v6150_v26 = vpop.f32.mrf.mxu0 }
 0xd80   :  { %v2728_v27 = vpop.f32.mrf.mxu0 }
 0xd81   :  { %v2729_v25 = vadd.f32 %v2728_v27, %v2653_v24  ;;  %v3489_v24 = vld [vmem:[#allocation5 + $0x180] sm:$0xff] }
 0xd82   :  { %v6155_v28 = vpop.f32.mrf.mxu0 }
 0xd83   :  { %v2810_v23 = vadd.f32 %v2806_v20, %v2729_v25  ;;  %v3491_v20 = vld [vmem:[#allocation5 + $0x190] sm:$0xff] }
 0xd84   :  { %v2886_v29 = vpop.f32.mrf.mxu0 }
 0xd85   :  { %v2890_v30 = vadd.f32 %v2886_v29, %v2810_v23 }
 0xd86   :  { %v6165_v31 = vpop.f32.mrf.mxu0 }
 0xd87   :  { %v2891_v32 = vadd.f32 %v2890_v30, %v2094_v21 }
 0xd89   :  { %5368 = vmatmul.mubr.msk.f32.vlgmr.msra.gmra.mxu1 %vm886_vm1, %v2891_v32 }
 0xd8a   :  { %6187 = vmatpush3.msra.mxu1 %v3341_v45 }
 0xd8b   :  { %6188 = vmatprep.subr.mxu1 %v3340_v46 }
 0xd8c   :  { %6189 = vmatpush3.msra.mxu1 %v3340_v46 }
 0xd8d   :  { %6190 = vmatprep.subr.mxu1 %v3339_v47 }
 0xd8e   :  { %6191 = vmatpush3.msra.mxu1 %v3339_v47 }
 0xd8f   :  { %6192 = vmatprep.subr.mxu1 %v3338_v48 }
 0xd90   :  { %6193 = vmatpush3.msra.mxu1 %v3338_v48 }
 0xd91   :  { %6194 = vmatprep.subr.mxu1 %v3337_v49 }
 0xd92   :  { %6195 = vmatpush3.msra.mxu1 %v3337_v49 }
 0xd93   :  { %6196 = vmatprep.subr.mxu1 %v3336_v51 }
 0xd94   :  { %6197 = vmatpush3.msra.mxu1 %v3336_v51  ;;  %v3462_v51 = vld [vmem:[#allocation8 + $0x2] sm:$0x1] }
 0xd95   :  { %6198 = vmatprep.subr.mxu1 %v3335_v52 }
 0xd96   :  { %6199 = vmatpush3.msra.mxu1 %v3335_v52 }
 0xd97   :  { %6200 = vmatprep.subr.mxu1 %v3334_v53 }
 0xd98   :  { %6201 = vmatpush3.msra.mxu1 %v3334_v53 }
 0xe49   :  { %v2978_v34 = vpop.f32.mrf.mxu1 }
 0xe4a   :  { %2990 = vrot.lane.b32.xlu0 %v2978_v34, %s6658_s0 }
 0xe4b   :  { %v2980_v35 = vpop.f32.mrf.mxu1 }
 0xe4c   :  { %3245 = vrot.lane.b32.xlu1 %v2980_v35, %s6658_s0 }
 0xebc   :  { %v2991_v36 = vpop.permute.xlu0 %2990 }
 0xebd   :  { %6166 = vmatprep.subr.mxu0 %v2991_v36 }
 0xebe   :  { %6167 = vmatpush3.msra.mxu0 %v2991_v36  ;;  %v3246_v41 = vpop.permute.xlu1 %3245 }
 0xebf   :  { %6169 = vmatmul.mubr.msk.f32.vlgmr.msra.gmra.mxu0 %vm2176_vm6, %v5372_v37  ;;  %6171 = vmatprep.subr.mxu0 %v2978_v34 }
 0xec0   :  { %6172 = vmatpush3.msra.mxu0 %v2978_v34  ;;  %6173 = vmatprep.mubr.msk.f32.mxu0 %vm2176_vm6, %v5369_v38 }
 0xec1   :  { %6176 = vmatprep.subr.mxu0 %v2980_v35 }
 0xec3   :  { %6174 = vmatmul.mubr.msk.f32.vlgmr.msra.gmra.mxu0 %vm2176_vm6, %v5370_v39 }
 0xec4   :  { %6177 = vmatpush3.msra.mxu0 %v2980_v35  ;;  %6178 = vmatprep.mubr.msk.f32.mxu0 %vm2176_vm6, %v5377_v40 }
 0xec5   :  { %6181 = vmatprep.subr.mxu0 %v3246_v41 }
 0xec7   :  { %6179 = vmatmul.mubr.msk.f32.vlgmr.msra.gmra.mxu0 %vm2176_vm6, %v5378_v42 }
 0xec8   :  { %6182 = vmatpush3.msra.mxu0 %v3246_v41  ;;  %6183 = vmatprep.mubr.msk.f32.mxu0 %vm2176_vm6, %v5381_v43 }
 0xec9   :  { %3527 = vmatprep.subr.mxu0 %v3504_v7 }
 0xecb   :  { %6184 = vmatmul.mubr.msk.f32.vlgmr.msra.gmra.mxu0 %vm2176_vm6, %v5382_v44 }
 0xecc   :  { %3575 = vmatprep.mubr.f32.mxu0 %v6657_v0  ;;  %3528 = vmatpush1.msra.mxu0 %v3503_v8  ;;  %v5393_v8 = vld [vmem:[%s7747_s4 + $0x190] sm:$0xff] }
 0xecd   :  { %3529 = vmatprep.subr.mxu0 %v3502_v9  ;;  %v5394_v9 = vld [vmem:[%s7747_s4 + $0x198] sm:$0xff] }
 0xece   :  { %3530 = vmatpush1.msra.mxu0 %v3501_v10  ;;  %v5415_v10 = vld [vmem:[%s7747_s4 + $0x1e0] sm:$0xff] }
 0xecf   :  { %3531 = vmatprep.subr.mxu0 %v3500_v11 }
 0xed0   :  { %3532 = vmatpush1.msra.mxu0 %v3499_v12 }
 0xed1   :  { %3533 = vmatprep.subr.mxu0 %v3498_v13  ;;  %v5396_v13 = vld [vmem:[%s7747_s4 + $0x1a8] sm:$0xff] }
 0xed2   :  { %3534 = vmatpush1.msra.mxu0 %v3497_v14 }
 0xed3   :  { %3535 = vmatprep.subr.mxu0 %v3496_v15  ;;  %v5397_v15 = vld [vmem:[%s7747_s4 + $0x1b0] sm:$0xff] }
 0xed4   :  { %3536 = vmatpush1.msra.mxu0 %v3495_v16 }
 0xed5   :  { %3537 = vmatprep.subr.mxu0 %v3494_v17  ;;  %v5398_v17 = vld [vmem:[%s7747_s4 + $0x1b8] sm:$0xff] }
 0xed6   :  { %3538 = vmatpush1.msra.mxu0 %v3493_v18  ;;  %v5416_v18 = vld [vmem:[%s7747_s4 + $0x1e8] sm:$0xff] }
 0xed7   :  { %3539 = vmatprep.subr.mxu0 %v3492_v19  ;;  %v5407_v19 = vld [vmem:[%s7747_s4 + $0x1c0] sm:$0xff] }
 0xed8   :  { %3540 = vmatpush1.msra.mxu0 %v3491_v20  ;;  %v5417_v20 = vld [vmem:[%s7747_s4 + $0x1f0] sm:$0xff] }
 0xed9   :  { %3541 = vmatprep.subr.mxu0 %v3490_v22  ;;  %v5408_v22 = vld [vmem:[%s7747_s4 + $0x1c8] sm:$0xff] }
 0xeda   :  { %3542 = vmatpush1.msra.mxu0 %v3489_v24  ;;  %v5418_v24 = vld [vmem:[%s7747_s4 + $0x1f8] sm:$0xff] }
 0xf7f   :  { %v6170_v54 = vpop.f32.mrf.mxu0 }
 0xf81   :  { %v3065_v55 = vpop.f32.mrf.mxu0 }
 0xf83   :  { %v6175_v56 = vpop.f32.mrf.mxu0 }
 0xf84   :  { %v3152_v61 = vadd.f32 %v6175_v56, %v6170_v54  ;;  %v3467_v54 = vld [vmem:[#allocation8 + $0x6] sm:$0x1] }
 0xf85   :  { %v3146_v57 = vpop.f32.mrf.mxu0 }
 0xf86   :  { %v3147_v60 = vadd.f32 %v3146_v57, %v3065_v55 }
 0xf87   :  { %v6180_v58 = vpop.f32.mrf.mxu0 }
 0xf88   :  { %v3240_v3 = vadd.f32 %v6180_v58, %v3152_v61 }
 0xf89   :  { %v3230_v59 = vpop.f32.mrf.mxu0 }
 0xf8a   :  { %v3239_v2 = vadd.f32 %v3230_v59, %v3147_v60 }
 0xf8b   :  { %v6185_v62 = vpop.f32.mrf.mxu0 }
 0xf8c   :  { %v7282_v1 = vadd.f32 %v6185_v62, %v3240_v3 }
 0xf8d   :  { %v3320_v4 = vpop.f32.mrf.mxu0 }
 0xf8e   :  { %v7280_v63 = vadd.f32 %v3320_v4, %v3239_v2  ;;  %v3332_v6 = vmul.f32 %v7282_v1, %v7282_v1  ;;  %v5395_v4 = vld [vmem:[%s7747_s4 + $0x1a0] sm:$0xff] }
 0xf90   :  { %v3331_v5 = vmul.f32 %v7280_v63, %v7280_v63  ;;  %6202 = vmatprep.mubr.msk.f32.mxu1 %vm886_vm1, %v7280_v63 }
 0xf91   :  { %6203 = vmatmul.mubr.msk.f32.vlgmr.msra.gmra.mxu1 %vm886_vm1, %v7282_v1 }
 0xf92   :  { %6205 = vmatprep.mubr.msk.f32.mxu1 %vm886_vm1, %v3331_v5 }
 0xf95   :  { %6206 = vmatmul.mubr.msk.f32.gmra.mxu1 %vm886_vm1, %v3332_v6  ;;  %v5392_v6 = vld [vmem:[%s7747_s4 + $0x188] sm:$0xff] }
 0xf96   :  { %6212 = vmatprep.mubr.msk.f32.mxu1 %vm165_vm0, %v5395_v4 }
0x1051   :  { %v6204_v26 = vpop.f32.mrf.mxu1 }
0x1052   :  { %v3440_v25 = vsel %vm886_vm1, %v6204_v26, 0.0  ;;  %v5409_v26 = vld [vmem:[%s7747_s4 + $0x1d0] sm:$0xff] }
0x1053   :  { %v3420_v27 = vpop.f32.mrf.mxu1 }
0x1054   :  { %v3439_v28 = vsel %vm886_vm1, %v3420_v27, 0.0  ;;  %v5410_v27 = vld [vmem:[%s7747_s4 + $0x1d8] sm:$0xff] }
0x1055   :  { %v3441_v23 = vadd.f32 %v3440_v25, %v3439_v28  ;;  %v6207_v21 = vpop.f32.mrf.mxu1  ;;  %v4032_v25 = vld [vmem:[#allocation7 + $0xf8] sm:$0xff]  ;;  %v4031_v28 = vld [vmem:[#allocation7 + $0xf0] sm:$0xff] }
0x1056   :  { %v3450_v31 = vsel %vm886_vm1, %v6207_v21, 0.0  ;;  %v4029_v21 = vld [vmem:[#allocation7 + $0xe0] sm:$0xff] }
0x1057   :  { %v3442_v29 = vrot.slane %v3441_v23, 4  ;;  %v3430_v30 = vpop.f32.mrf.mxu1 }
0x1058   :  { %v3449_v32 = vsel %vm886_vm1, %v3430_v30, 0.0  ;;  %v4027_v30 = vld [vmem:[#allocation7 + $0xd0] sm:$0xff] }
0x1059   :  { %v3443_v33 = vadd.f32 %v3442_v29, %v3441_v23  ;;  %v3451_v34 = vadd.f32 %v3450_v31, %v3449_v32  ;;  %v4030_v23 = vld [vmem:[#allocation7 + $0xe8] sm:$0xff]  ;;  %v4028_v29 = vld [vmem:[#allocation7 + $0xd8] sm:$0xff]  ;;  %v4025_v32 = vld [vmem:[#allocation7 + $0xc0] sm:$0xff] }
0x105a   :  { %v4026_v31 = vld [vmem:[#allocation7 + $0xc8] sm:$0xff] }
0x105b   :  { %v3444_v35 = vrot.slane %v3443_v33, 2  ;;  %v3452_v36 = vrot.slane %v3451_v34, 4 }
0x105d   :  { %v3445_v37 = vadd.f32 %v3444_v35, %v3443_v33  ;;  %v3453_v38 = vadd.f32 %v3452_v36, %v3451_v34 }
0x105f   :  { %v3446_v39 = vrot.slane %v3445_v37, 1  ;;  %v3454_v40 = vrot.slane %v3453_v38, 2 }
0x1061   :  { %v3447_v41 = vadd.f32 %v3446_v39, %v3445_v37  ;;  %v3455_v42 = vadd.f32 %v3454_v40, %v3453_v38 }
0x1063   :  { %v3448_v43 = vmul.f32 0.0078125, %v3447_v41  ;;  %v3456_v44 = vrot.slane %v3455_v42, 1 }
0x1065   :  { %v3457_v45 = vadd.f32 %v3456_v44, %v3455_v42  ;;  %v3459_v46 = vmul.f32 %v3448_v43, %v3448_v43 }
0x1067   :  { %v3458_v47 = vmul.f32 0.0078125, %v3457_v45 }
0x1069   :  { %v3460_v48 = vsub.f32 %v3458_v47, %v3459_v46 }
0x106b   :  { %v3463_v49 = vadd.f32 1e-05, %v3460_v48 }
0x106d   :  { %6453 = vrsqrt.f32 %v3463_v49 }
0x107a   :  { %v6454_v52 = vpop.eup %6453 }
0x107b   :  { %v3465_v53 = vmul.f32 %v6454_v52, %v3462_v51 }
0x107d   :  { %v3468_v55 = vmul.f32 %v3465_v53, %v3448_v43  ;;  %v3474_v56 = vrot.slane %v3465_v53, %v7117_v50 }
0x107f   :  { %v3469_v57 = vsub.f32 %v3467_v54, %v3468_v55  ;;  %v3476_v58 = vmul.f32 %v3474_v56, %v7280_v63  ;;  %v3477_v61 = vmul.f32 %v3474_v56, %v7282_v1  ;;  %v5391_v63 = vld [vmem:[%s7747_s4 + $0x180] sm:$0xff] }
0x1081   :  { %v3482_v59 = vrot.slane %v3469_v57, %v7117_v50 }
0x1083   :  { %v3484_v60 = vadd.f32 %v3482_v59, %v3476_v58  ;;  %v3485_v2 = vadd.f32 %v3482_v59, %v3477_v61 }
0x1085   :  { %v3486_v62 = vmax.f32 %v3484_v60, 0.0  ;;  %v3487_v3 = vmax.f32 %v3485_v2, 0.0 }
0x1087   :  { %5389 = vmatmul.mubr.msk.f32.vlgmr.msra.gmra.mxu0 %vm886_vm1, %v3486_v62 }
0x1088   :  { %3581 = vmatprep.mubr.f32.mxu0 %v6657_v0 }
0x108b   :  { %5390 = vmatmul.mubr.msk.f32.gmra.mxu0 %vm886_vm1, %v3487_v3 }
0x108c   :  { %6222 = vmatprep.mubr.msk.f32.mxu0 %vm165_vm0, %v5391_v63  ;;  %v4252_v63 = vld [vmem:[#allocation13 + $0x38] sm:$0xff] }
0x1147   :  { %v3577_v1 = vpop.f32.mrf.mxu0 }
0x1148   :  { %3600 = vrot.lane.b32.xlu1 %v3577_v1, %s6658_s0 }
0x1149   :  { %v3579_v5 = vpop.f32.mrf.mxu0 }
0x114b   :  { %v3583_v0 = vpop.f32.mrf.mxu0 }
0x114c   :  { %3913 = vrot.lane.b32.xlu1 %v3579_v5, %s6658_s0  ;;  %3602 = vrot.lane.b32.xlu0 %v3583_v0, %s6658_s0 }
0x114d   :  { %6218 = vmatprep.subr.mxu0 %v3583_v0  ;;  %v3585_v7 = vpop.f32.mrf.mxu0 }
0x114e   :  { %6219 = vmatpush3.msra.mxu0 %v3583_v0  ;;  %v4249_v0 = vld [vmem:[#allocation13 + $0x20] sm:$0xff] }
0x114f   :  { %6220 = vmatprep.subr.mxu0 %v3577_v1 }
0x1150   :  { %6221 = vmatpush3.msra.mxu0 %v3577_v1  ;;  %3915 = vrot.lane.b32.xlu0 %v3585_v7, %s6658_s0  ;;  %v4251_v1 = vld [vmem:[#allocation13 + $0x30] sm:$0xff] }
0x1151   :  { %6223 = vmatmul.mubr.msk.f32.vlgmr.msra.gmra.mxu0 %vm165_vm0, %v5392_v6  ;;  %v4248_v6 = vld [vmem:[#allocation13 + $0x18] sm:$0xff] }
0x1152   :  { %6225 = vmatprep.mubr.msk.f32.mxu0 %vm165_vm0, %v5393_v8  ;;  %v4246_v8 = vld [vmem:[#allocation13 + $0x8] sm:$0xff] }
0x1155   :  { %6226 = vmatmul.mubr.msk.f32.gmra.mxu0 %vm165_vm0, %v5394_v9  ;;  %v4245_v9 = vld [vmem:[#allocation13] sm:$0xff] }
0x1156   :  { %6242 = vmatprep.mubr.msk.f32.mxu0 %vm165_vm0, %v5415_v10 }
0x11ba   :  { %v3601_v12 = vpop.permute.xlu1 %3600 }
0x11be   :  { %v3603_v11 = vpop.permute.xlu0 %3602  ;;  %v3914_v16 = vpop.permute.xlu1 %3913 }
0x11bf   :  { %6208 = vmatprep.subr.mxu1 %v3603_v11 }
0x11c0   :  { %6209 = vmatpush3.msra.mxu1 %v3603_v11 }
0x11c1   :  { %6210 = vmatprep.subr.mxu1 %v3601_v12 }
0x11c2   :  { %6211 = vmatpush3.msra.mxu1 %v3601_v12  ;;  %v3916_v14 = vpop.permute.xlu0 %3915 }
0x11c3   :  { %6213 = vmatmul.mubr.msk.f32.vlgmr.msra.gmra.mxu1 %vm165_vm0, %v5396_v13  ;;  %6228 = vmatprep.subr.mxu1 %v3585_v7 }
0x11c4   :  { %6238 = vmatprep.subr.mxu0 %v3916_v14  ;;  %6229 = vmatpush3.msra.mxu1 %v3585_v7  ;;  %v4247_v7 = vld [vmem:[#allocation13 + $0x10] sm:$0xff] }
0x11c5   :  { %6239 = vmatpush3.msra.mxu0 %v3916_v14  ;;  %6230 = vmatprep.subr.mxu1 %v3579_v5 }
0x11c6   :  { %6240 = vmatprep.subr.mxu0 %v3914_v16  ;;  %6215 = vmatprep.mubr.msk.f32.mxu1 %vm165_vm0, %v5397_v15 }
0x11c7   :  { %6231 = vmatpush3.msra.mxu1 %v3579_v5  ;;  %6241 = vmatpush3.msra.mxu0 %v3914_v16  ;;  %v4250_v5 = vld [vmem:[#allocation13 + $0x28] sm:$0xff] }
0x11c8   :  { %6216 = vmatmul.mubr.msk.f32.gmra.mxu1 %vm165_vm0, %v5398_v17  ;;  %6243 = vmatmul.mubr.msk.f32.vlgmr.msra.gmra.mxu0 %vm165_vm0, %v5416_v18 }
0x11c9   :  { %6232 = vmatprep.mubr.msk.f32.mxu1 %vm165_vm0, %v5407_v19  ;;  %6245 = vmatprep.mubr.msk.f32.mxu0 %vm165_vm0, %v5417_v20 }
0x11ca   :  { %6248 = vmatprep.subr.mxu1 %v4032_v25  ;;  %6276 = vmatprep.subr.mxu0 %v4252_v63 }
0x11cb   :  { %6277 = vmatpush3.msra.mxu0 %v4252_v63 }
0x11cc   :  { %6233 = vmatmul.mubr.msk.f32.vlgmr.msra.gmra.mxu1 %vm165_vm0, %v5408_v22  ;;  %6246 = vmatmul.mubr.msk.f32.gmra.mxu0 %vm165_vm0, %v5418_v24 }
0x11cd   :  { %6235 = vmatprep.mubr.msk.f32.mxu1 %vm165_vm0, %v5409_v26  ;;  %6249 = vmatpush3.msra.mxu1 %v4032_v25 }
0x11ce   :  { %6250 = vmatprep.subr.mxu1 %v4031_v28  ;;  %6278 = vmatprep.subr.mxu0 %v4251_v1 }
0x11cf   :  { %6251 = vmatpush3.msra.mxu1 %v4031_v28  ;;  %6279 = vmatpush3.msra.mxu0 %v4251_v1 }
0x11d0   :  { %6236 = vmatmul.mubr.msk.f32.gmra.mxu1 %vm165_vm0, %v5410_v27  ;;  %6252 = vmatprep.subr.mxu1 %v4030_v23 }
0x11d1   :  { %6253 = vmatpush3.msra.mxu1 %v4030_v23  ;;  %6280 = vmatprep.subr.mxu0 %v4250_v5 }
0x11d2   :  { %6254 = vmatprep.subr.mxu1 %v4029_v21  ;;  %6281 = vmatpush3.msra.mxu0 %v4250_v5 }
0x11d3   :  { %6255 = vmatpush3.msra.mxu1 %v4029_v21  ;;  %6282 = vmatprep.subr.mxu0 %v4249_v0 }
0x11d4   :  { %6256 = vmatprep.subr.mxu1 %v4028_v29  ;;  %6283 = vmatpush3.msra.mxu0 %v4249_v0 }
0x11d5   :  { %6257 = vmatpush3.msra.mxu1 %v4028_v29  ;;  %6284 = vmatprep.subr.mxu0 %v4248_v6 }
0x11d6   :  { %6258 = vmatprep.subr.mxu1 %v4027_v30  ;;  %6285 = vmatpush3.msra.mxu0 %v4248_v6 }
0x11d7   :  { %6259 = vmatpush3.msra.mxu1 %v4027_v30  ;;  %6286 = vmatprep.subr.mxu0 %v4247_v7 }
0x11d8   :  { %6260 = vmatprep.subr.mxu1 %v4026_v31  ;;  %6287 = vmatpush3.msra.mxu0 %v4247_v7 }
0x11d9   :  { %6261 = vmatpush3.msra.mxu1 %v4026_v31  ;;  %6288 = vmatprep.subr.mxu0 %v4246_v8 }
0x11da   :  { %6262 = vmatprep.subr.mxu1 %v4025_v32  ;;  %6289 = vmatpush3.msra.mxu0 %v4246_v8 }
0x11db   :  { %6263 = vmatpush3.msra.mxu1 %v4025_v32  ;;  %6290 = vmatprep.subr.mxu0 %v4245_v9 }
0x11dc   :  { %6291 = vmatpush3.msra.mxu0 %v4245_v9 }
0x1211   :  { %v6224_v33 = vpop.f32.mrf.mxu0 }
0x1213   :  { %v3781_v34 = vpop.f32.mrf.mxu0 }
0x1215   :  { %v6227_v35 = vpop.f32.mrf.mxu0 }
0x1217   :  { %v3791_v37 = vpop.f32.mrf.mxu0 }
0x1283   :  { %v6214_v36 = vpop.f32.mrf.mxu1 }
0x1284   :  { %v3787_v42 = vadd.f32 %v6224_v33, %v6214_v36 }
0x1285   :  { %v3684_v38 = vpop.f32.mrf.mxu1 }
0x1286   :  { %v3782_v45 = vadd.f32 %v3781_v34, %v3684_v38 }
0x1288   :  { %v6217_v39 = vpop.f32.mrf.mxu1  ;;  %v6244_v40 = vpop.f32.mrf.mxu0 }
0x1289   :  { %v3797_v49 = vadd.f32 %v6227_v35, %v6217_v39 }
0x128a   :  { %v3694_v41 = vpop.f32.mrf.mxu1  ;;  %v3997_v44 = vpop.f32.mrf.mxu0 }
0x128b   :  { %v3792_v53 = vadd.f32 %v3791_v37, %v3694_v41 }
0x128c   :  { %v6234_v43 = vpop.f32.mrf.mxu1  ;;  %v6247_v52 = vpop.f32.mrf.mxu0 }
0x128d   :  { %v3903_v46 = vadd.f32 %v6234_v43, %v3787_v42 }
0x128e   :  { %v3883_v47 = vpop.f32.mrf.mxu1  ;;  %v4007_v59 = vpop.f32.mrf.mxu0 }
0x128f   :  { %v3902_v48 = vadd.f32 %v3883_v47, %v3782_v45  ;;  %v7375_v55 = vadd.f32 %v6244_v40, %v3903_v46 }
0x1290   :  { %v6237_v51 = vpop.f32.mrf.mxu1 }
0x1291   :  { %v7373_v54 = vadd.f32 %v3997_v44, %v3902_v48  ;;  %v3905_v56 = vadd.f32 %v6237_v51, %v3797_v49  ;;  %v4021_v2 = vmul.f32 %v7375_v55, %v7375_v55  ;;  %v4193_v49 = vld [vmem:[#allocation8 + $0x3] sm:$0x1] }
0x1292   :  { %v3893_v57 = vpop.f32.mrf.mxu1 }
0x1293   :  { %v3904_v58 = vadd.f32 %v3893_v57, %v3792_v53  ;;  %6264 = vmatprep.mubr.msk.f32.mxu1 %vm886_vm1, %v7373_v54  ;;  %v7383_v61 = vadd.f32 %v6247_v52, %v3905_v56  ;;  %v4020_v62 = vmul.f32 %v7373_v54, %v7373_v54  ;;  %v4198_v53 = vld [vmem:[#allocation8 + $0x7] sm:$0x1] }
0x1294   :  { %6265 = vmatmul.mubr.msk.f32.vlgmr.msra.gmra.mxu1 %vm886_vm1, %v7375_v55 }
0x1295   :  { %v7381_v60 = vadd.f32 %v4007_v59, %v3904_v58  ;;  %v4023_v4 = vmul.f32 %v7383_v61, %v7383_v61 }
0x1297   :  { %6267 = vmatprep.mubr.msk.f32.mxu1 %vm886_vm1, %v7381_v60  ;;  %v4022_v3 = vmul.f32 %v7381_v60, %v7381_v60 }
0x1298   :  { %6268 = vmatmul.mubr.msk.f32.gmra.mxu1 %vm886_vm1, %v7383_v61 }
0x1299   :  { %6270 = vmatprep.mubr.msk.f32.mxu1 %vm886_vm1, %v4020_v62 }
0x129c   :  { %6271 = vmatmul.mubr.msk.f32.gmra.mxu1 %vm886_vm1, %v4021_v2 }
0x129d   :  { %6273 = vmatprep.mubr.msk.f32.mxu1 %vm886_vm1, %v4022_v3 }
0x12a0   :  { %6274 = vmatmul.mubr.msk.f32.gmra.mxu1 %vm886_vm1, %v4023_v4 }
0x1354   :  { %v6266_v10 = vpop.f32.mrf.mxu1 }
0x1355   :  { %v4163_v14 = vsel %vm886_vm1, %v6266_v10, 0.0 }
0x1356   :  { %v4123_v11 = vpop.f32.mrf.mxu1 }
0x1357   :  { %v4162_v12 = vsel %vm886_vm1, %v4123_v11, 0.0 }
0x1358   :  { %v6269_v13 = vpop.f32.mrf.mxu1  ;;  %v4164_v15 = vadd.f32 %v4163_v14, %v4162_v12 }
0x1359   :  { %v4167_v20 = vsel %vm886_vm1, %v6269_v13, 0.0 }
0x135a   :  { %v4133_v16 = vpop.f32.mrf.mxu1 }
0x135b   :  { %v4165_v17 = vsel %vm886_vm1, %v4133_v16, 0.0 }
0x135c   :  { %v4166_v18 = vadd.f32 %v4165_v17, %v4164_v15  ;;  %v6272_v19 = vpop.f32.mrf.mxu1  ;;  %v5439_v17 = vld [vmem:[%s7755_s12 + $0x80] sm:$0xff] }
0x135d   :  { %v4177_v28 = vsel %vm886_vm1, %v6272_v19, 0.0  ;;  %v4350_v19 = vld [vmem:[%s7755_s12] sm:$0xff] }
0x135e   :  { %v4168_v22 = vadd.f32 %v4167_v20, %v4166_v18  ;;  %v4143_v24 = vpop.f32.mrf.mxu1  ;;  %6338 = vmatprep.mubr.msk.f32.mxu1 %vm1009_vm2, %v4350_v19  ;;  %v5492_v19 = vld [vmem:[%s7755_s12 + $0x128] sm:$0xff] }
0x135f   :  { %v4176_v26 = vsel %vm886_vm1, %v4143_v24, 0.0 }
0x1360   :  { %v4169_v27 = vrot.slane %v4168_v22, 4  ;;  %v6275_v25 = vpop.f32.mrf.mxu1  ;;  %v4178_v21 = vadd.f32 %v4177_v28, %v4176_v26  ;;  %v4351_v26 = vld [vmem:[%s7755_s12 + $0x8] sm:$0xff]  ;;  %v4354_v28 = vld [vmem:[%s7755_s12 + $0x20] sm:$0xff] }
0x1361   :  { %v4181_v33 = vsel %vm886_vm1, %v6275_v25, 0.0  ;;  %v4353_v25 = vld [vmem:[%s7755_s12 + $0x18] sm:$0xff] }
0x1362   :  { %v4170_v23 = vadd.f32 %v4169_v27, %v4168_v22  ;;  %v4153_v29 = vpop.f32.mrf.mxu1  ;;  %v4352_v27 = vld [vmem:[%s7755_s12 + $0x10] sm:$0xff] }
0x1363   :  { %v4179_v30 = vsel %vm886_vm1, %v4153_v29, 0.0  ;;  %v4357_v29 = vld [vmem:[%s7755_s12 + $0x38] sm:$0xff] }
0x1364   :  { %v4171_v31 = vrot.slane %v4170_v23, 2  ;;  %v4180_v32 = vadd.f32 %v4179_v30, %v4178_v21  ;;  %v4356_v21 = vld [vmem:[%s7755_s12 + $0x30] sm:$0xff]  ;;  %v4358_v30 = vld [vmem:[%s7755_s12 + $0x40] sm:$0xff] }
0x1366   :  { %v4172_v34 = vadd.f32 %v4171_v31, %v4170_v23  ;;  %v4182_v35 = vadd.f32 %v4181_v33, %v4180_v32  ;;  %v4355_v23 = vld [vmem:[%s7755_s12 + $0x28] sm:$0xff]  ;;  %v4360_v32 = vld [vmem:[%s7755_s12 + $0x50] sm:$0xff]  ;;  %v4361_v33 = vld [vmem:[%s7755_s12 + $0x58] sm:$0xff] }
0x1367   :  { %v4359_v31 = vld [vmem:[%s7755_s12 + $0x48] sm:$0xff] }
0x1368   :  { %v4173_v36 = vrot.slane %v4172_v34, 1  ;;  %v4183_v37 = vrot.slane %v4182_v35, 4 }
0x136a   :  { %v4184_v38 = vadd.f32 %v4183_v37, %v4182_v35  ;;  %v4174_v39 = vadd.f32 %v4173_v36, %v4172_v34  ;;  %v4362_v34 = vld [vmem:[%s7755_s12 + $0x60] sm:$0xff]  ;;  %v4363_v35 = vld [vmem:[%s7755_s12 + $0x68] sm:$0xff]  ;;  %v4364_v36 = vld [vmem:[%s7755_s12 + $0x70] sm:$0xff] }
0x136b   :  { %v4365_v37 = vld [vmem:[%s7755_s12 + $0x78] sm:$0xff] }
0x136c   :  { %v4185_v40 = vrot.slane %v4184_v38, 2  ;;  %v4175_v42 = vmul.f32 0.001953125, %v4174_v39 }
0x136e   :  { %v4186_v41 = vadd.f32 %v4185_v40, %v4184_v38  ;;  %v4190_v45 = vmul.f32 %v4175_v42, %v4175_v42  ;;  %v5519_v38 = vld [vmem:[%s7755_s12 + $0x180] sm:$0xff] }
0x1370   :  { %v4187_v43 = vrot.slane %v4186_v41, 1 }
0x1372   :  { %v4188_v44 = vadd.f32 %v4187_v43, %v4186_v41  ;;  %v5440_v43 = vld [vmem:[%s7755_s12 + $0x88] sm:$0xff] }
0x1374   :  { %v4189_v46 = vmul.f32 0.001953125, %v4188_v44  ;;  %v5441_v44 = vld [vmem:[%s7755_s12 + $0x90] sm:$0xff] }
0x1376   :  { %v4191_v47 = vsub.f32 %v4189_v46, %v4190_v45 }
0x1378   :  { %v4194_v48 = vadd.f32 1e-05, %v4191_v47  ;;  %v5442_v47 = vld [vmem:[%s7755_s12 + $0x98] sm:$0xff] }
0x137a   :  { %6455 = vrsqrt.f32 %v4194_v48  ;;  %v5443_v48 = vld [vmem:[%s7755_s12 + $0xa0] sm:$0xff] }
0x1387   :  { %v6456_v51 = vpop.eup %6455 }
0x1388   :  { %v4196_v52 = vmul.f32 %v6456_v51, %v4193_v49 }
0x138a   :  { %v4199_v56 = vmul.f32 %v4196_v52, %v4175_v42  ;;  %v4205_v57 = vrot.slane %v4196_v52, %v7117_v50  ;;  %v5444_v52 = vld [vmem:[%s7755_s12 + $0xa8] sm:$0xff] }
0x138c   :  { %v4200_v58 = vsub.f32 %v4198_v53, %v4199_v56  ;;  %v4207_v59 = vmul.f32 %v4205_v57, %v7373_v54  ;;  %v4208_v62 = vmul.f32 %v4205_v57, %v7375_v55  ;;  %v4209_v2 = vmul.f32 %v4205_v57, %v7381_v60  ;;  %v5445_v56 = vld [vmem:[%s7755_s12 + $0xb0] sm:$0xff] }
0x138d   :  { %v4210_v3 = vmul.f32 %v4205_v57, %v7383_v61 }
0x138e   :  { %v4215_v4 = vrot.slane %v4200_v58, %v7117_v50  ;;  %v5446_v58 = vld [vmem:[%s7755_s12 + $0xb8] sm:$0xff] }
0x1390   :  { %v4217_v63 = vadd.f32 %v4215_v4, %v4207_v59  ;;  %v4218_v1 = vadd.f32 %v4215_v4, %v4208_v62  ;;  %v4219_v5 = vadd.f32 %v4215_v4, %v4209_v2  ;;  %v4220_v0 = vadd.f32 %v4215_v4, %v4210_v3  ;;  %v5447_v59 = vld [vmem:[%s7755_s12 + $0xc0] sm:$0xff]  ;;  %v5448_v3 = vld [vmem:[%s7755_s12 + $0xc8] sm:$0xff] }
0x1391   :  { %v5520_v4 = vld [vmem:[%s7755_s12 + $0x188] sm:$0xff] }
0x1392   :  { %v5431_v6 = vmul.f32 -1.442695, %v4217_v63  ;;  %v5432_v7 = vmul.f32 -1.442695, %v4218_v1  ;;  %v5433_v8 = vmul.f32 -1.442695, %v4219_v5 }
0x1393   :  { %v5434_v9 = vmul.f32 -1.442695, %v4220_v0  ;;  %v5449_v63 = vld [vmem:[%s7755_s12 + $0xd0] sm:$0xff]  ;;  %v5450_v5 = vld [vmem:[%s7755_s12 + $0xd8] sm:$0xff] }
0x1394   :  { %6457 = vpow2.f32 %v5431_v6  ;;  %v5521_v1 = vld [vmem:[%s7755_s12 + $0x190] sm:$0xff]  ;;  %v5522_v0 = vld [vmem:[%s7755_s12 + $0x198] sm:$0xff]  ;;  %v5451_v6 = vld [vmem:[%s7755_s12 + $0xe0] sm:$0xff] }
0x1395   :  { %6459 = vpow2.f32 %v5432_v7  ;;  %v5523_v7 = vld [vmem:[%s7755_s12 + $0x1a0] sm:$0xff] }
0x1396   :  { %6461 = vpow2.f32 %v5433_v8  ;;  %v5452_v8 = vld [vmem:[%s7755_s12 + $0xe8] sm:$0xff] }
0x1397   :  { %6463 = vpow2.f32 %v5434_v9  ;;  %v5524_v9 = vld [vmem:[%s7755_s12 + $0x1a8] sm:$0xff] }
0x13a1   :  { %v6458_v54 = vpop.eup %6457 }
0x13a2   :  { %v6460_v55 = vpop.eup %6459  ;;  %v4233_v10 = vadd.f32 1.0, %v6458_v54  ;;  %v5453_v54 = vld [vmem:[%s7755_s12 + $0xf0] sm:$0xff] }
0x13a3   :  { %v6462_v60 = vpop.eup %6461  ;;  %v4234_v11 = vadd.f32 1.0, %v6460_v55  ;;  %v5525_v55 = vld [vmem:[%s7755_s12 + $0x1b0] sm:$0xff] }
0x13a4   :  { %v6464_v61 = vpop.eup %6463  ;;  %v4235_v12 = vadd.f32 1.0, %v6462_v60  ;;  %6465 = vrcp.f32 %v4233_v10  ;;  %v5454_v10 = vld [vmem:[%s7755_s12 + $0xf8] sm:$0xff] }
0x13a5   :  { %v4236_v50 = vadd.f32 1.0, %v6464_v61  ;;  %6467 = vrcp.f32 %v4234_v11  ;;  %v5526_v60 = vld [vmem:[%s7755_s12 + $0x1b8] sm:$0xff]  ;;  %v5487_v11 = vld [vmem:[%s7755_s12 + $0x100] sm:$0xff] }
0x13a6   :  { %6469 = vrcp.f32 %v4235_v12  ;;  %v5527_v61 = vld [vmem:[%s7755_s12 + $0x1c0] sm:$0xff]  ;;  %v5488_v12 = vld [vmem:[%s7755_s12 + $0x108] sm:$0xff] }
0x13a7   :  { %6471 = vrcp.f32 %v4236_v50  ;;  %v5528_v50 = vld [vmem:[%s7755_s12 + $0x1c8] sm:$0xff] }
0x13b1   :  { %v6466_v13 = vpop.eup %6465 }
0x13b2   :  { %v6468_v14 = vpop.eup %6467  ;;  %6292 = vmatprep.mubr.msk.f32.mxu0 %vm886_vm1, %v6466_v13  ;;  %v5489_v13 = vld [vmem:[%s7755_s12 + $0x110] sm:$0xff] }
0x13b3   :  { %v6470_v15 = vpop.eup %6469  ;;  %6293 = vmatmul.mubr.msk.f32.vlgmr.msra.gmra.mxu0 %vm886_vm1, %v6468_v14  ;;  %v5529_v14 = vld [vmem:[%s7755_s12 + $0x1d0] sm:$0xff] }
0x13b4   :  { %6295 = vmatprep.mubr.msk.f32.mxu0 %vm886_vm1, %v6470_v15  ;;  %v6472_v16 = vpop.eup %6471  ;;  %v5490_v15 = vld [vmem:[%s7755_s12 + $0x118] sm:$0xff] }
0x13b7   :  { %6296 = vmatmul.mubr.msk.f32.gmra.mxu0 %vm886_vm1, %v6472_v16  ;;  %v5530_v16 = vld [vmem:[%s7755_s12 + $0x1d8] sm:$0xff] }
0x13b8   :  { %6306 = vmatprep.mubr.msk.f32.mxu0 %vm1009_vm2, %v5439_v17  ;;  %v5491_v17 = vld [vmem:[%s7755_s12 + $0x120] sm:$0xff] }
0x1473   :  { %v6294_v18 = vpop.f32.mrf.mxu0 }
0x1475   :  { %v4331_v20 = vpop.f32.mrf.mxu0 }
0x1477   :  { %v6297_v22 = vpop.f32.mrf.mxu0 }
0x1478   :  { %4393 = vrot.lane.b32.xlu0 %v6297_v22, %s6661_s9  ;;  %6330 = vmatprep.subr.mxu1 %v6297_v22 }
0x1479   :  { %v4341_v24 = vpop.f32.mrf.mxu0  ;;  %6331 = vmatpush3.msra.mxu1 %v6297_v22 }
0x147a   :  { %4391 = vrot.lane.b32.xlu1 %v4341_v24, %s6661_s9  ;;  %6332 = vmatprep.subr.mxu1 %v4341_v24 }
0x147b   :  { %6333 = vmatpush3.msra.mxu1 %v4341_v24 }
0x147c   :  { %4389 = vrot.lane.b32.xlu0 %v6294_v18, %s6661_s9  ;;  %6334 = vmatprep.subr.mxu1 %v6294_v18 }
0x147d   :  { %6335 = vmatpush3.msra.mxu1 %v6294_v18 }
0x147e   :  { %4387 = vrot.lane.b32.xlu1 %v4331_v20, %s6661_s9  ;;  %6336 = vmatprep.subr.mxu1 %v4331_v20 }
0x147f   :  { %6337 = vmatpush3.msra.mxu1 %v4331_v20 }
0x1480   :  { %4808 = vrot.lane.b32.xlu0 %v6297_v22, %s6660_s5  ;;  %6339 = vmatmul.mubr.msk.f32.vlgmr.msra.gmra.mxu1 %vm1009_vm2, %v4351_v26  ;;  %v5494_v26 = vld [vmem:[%s7755_s12 + $0x138] sm:$0xff] }
0x1481   :  { %6341 = vmatprep.mubr.msk.f32.mxu1 %vm1009_vm2, %v4352_v27  ;;  %v5534_v27 = vld [vmem:[%s7755_s12 + $0x1f8] sm:$0xff] }
0x1482   :  { %4804 = vrot.lane.b32.xlu1 %v6294_v18, %s6660_s5 }
0x1484   :  { %5046 = vrot.lane.b32.xlu0 %v6297_v22, %s6662_s1  ;;  %6342 = vmatmul.mubr.msk.f32.gmra.mxu1 %vm1009_vm2, %v4353_v25  ;;  %v5493_v22 = vld [vmem:[%s7755_s12 + $0x130] sm:$0xff]  ;;  %v5495_v25 = vld [vmem:[%s7755_s12 + $0x140] sm:$0xff] }
0x1485   :  { %6344 = vmatprep.mubr.msk.f32.mxu1 %vm1009_vm2, %v4354_v28  ;;  %v5496_v28 = vld [vmem:[%s7755_s12 + $0x148] sm:$0xff] }
0x1486   :  { %4806 = vrot.lane.b32.xlu1 %v4341_v24, %s6660_s5 }
0x1488   :  { %5044 = vrot.lane.b32.xlu0 %v4341_v24, %s6662_s1  ;;  %6345 = vmatmul.mubr.msk.f32.gmra.mxu1 %vm1009_vm2, %v4355_v23  ;;  %v5533_v24 = vld [vmem:[%s7755_s12 + $0x1f0] sm:$0xff] }
0x1489   :  { %6347 = vmatprep.mubr.msk.f32.mxu1 %vm1009_vm2, %v4356_v21  ;;  %v5497_v23 = vld [vmem:[%s7755_s12 + $0x150] sm:$0xff]  ;;  %v5498_v21 = vld [vmem:[%s7755_s12 + $0x158] sm:$0xff] }
0x148a   :  { %4802 = vrot.lane.b32.xlu1 %v4331_v20, %s6660_s5 }
0x148c   :  { %5042 = vrot.lane.b32.xlu0 %v6294_v18, %s6662_s1  ;;  %6348 = vmatmul.mubr.msk.f32.gmra.mxu1 %vm1009_vm2, %v4357_v29  ;;  %v5531_v18 = vld [vmem:[%s7755_s12 + $0x1e0] sm:$0xff] }
0x148d   :  { %6350 = vmatprep.mubr.msk.f32.mxu1 %vm1009_vm2, %v4358_v30  ;;  %v5499_v29 = vld [vmem:[%s7755_s12 + $0x160] sm:$0xff]  ;;  %v5500_v30 = vld [vmem:[%s7755_s12 + $0x168] sm:$0xff] }
0x148e   :  { %5040 = vrot.lane.b32.xlu1 %v4331_v20, %s6662_s1  ;;  %v5532_v20 = vld [vmem:[%s7755_s12 + $0x1e8] sm:$0xff] }
0x1490   :  { %6351 = vmatmul.mubr.msk.f32.gmra.mxu1 %vm1009_vm2, %v4359_v31  ;;  %v5501_v31 = vld [vmem:[%s7755_s12 + $0x170] sm:$0xff] }
0x1491   :  { %6353 = vmatprep.mubr.msk.f32.mxu1 %vm1009_vm2, %v4360_v32  ;;  %v5502_v32 = vld [vmem:[%s7755_s12 + $0x178] sm:$0xff]  ;;  %s6663_s12 = smov [#allocation14]  }
0x1492   :  { %s5282_s23 = sshll.u32 %s6663_s12, 4  ;;  %s5283_s23 = int_to_ptr.vmem [resolvable:$true] %s5282_s23 }
0x1493   :  { %s6613_s24 = scalar_lea.vmem %s5283_s23, 2048  ;;  %p6618_p8 = scmp.lt.s32.totalorder %s5283_s23, %s5283_s23 }
0x1494   :  { %6354 = vmatmul.mubr.msk.f32.gmra.mxu1 %vm1009_vm2, %v4361_v33  ;;  %p6614_p7 = scmp.ne.s32.totalorder %s5283_s23, %s6613_s24  ;;  %p6619_p9 = scmp.lt.s32.totalorder %s6613_s24, %s6613_s24 }
0x1495   :  { %6356 = vmatprep.mubr.msk.f32.mxu1 %vm1009_vm2, %v4362_v34 }
0x1496   :  { %p6620_p10 = por %p6619_p9, %p6618_p8 }
0x1498   :  { %6357 = vmatmul.mubr.msk.f32.gmra.mxu1 %vm1009_vm2, %v4363_v35  ;;  %p6621_p11 = pnand %p6620_p10, %p6614_p7 }
0x1499   :  { %6359 = vmatprep.mubr.msk.f32.mxu1 %vm1009_vm2, %v4364_v36 }
0x149c   :  { %6360 = vmatmul.mubr.msk.f32.gmra.mxu1 %vm1009_vm2, %v4365_v37 }
0x149d   :  { %6402 = vmatprep.mubr.msk.f32.mxu1 %vm1009_vm2, %v5519_v38 }
0x14ea   :  { %v4394_v39 = vpop.permute.xlu0 %4393 }
0x14eb   :  { %6298 = vmatprep.subr.mxu0 %v4394_v39 }
0x14ec   :  { %6299 = vmatpush3.msra.mxu0 %v4394_v39  ;;  %v4392_v40 = vpop.permute.xlu1 %4391 }
0x14ed   :  { %6300 = vmatprep.subr.mxu0 %v4392_v40 }
0x14ee   :  { %v4390_v41 = vpop.permute.xlu0 %4389  ;;  %6301 = vmatpush3.msra.mxu0 %v4392_v40 }
0x14ef   :  { %6302 = vmatprep.subr.mxu0 %v4390_v41 }
0x14f0   :  { %6303 = vmatpush3.msra.mxu0 %v4390_v41  ;;  %v4388_v42 = vpop.permute.xlu1 %4387 }
0x14f1   :  { %6304 = vmatprep.subr.mxu0 %v4388_v42 }
0x14f2   :  { %v4809_v45 = vpop.permute.xlu0 %4808  ;;  %6305 = vmatpush3.msra.mxu0 %v4388_v42 }
0x14f3   :  { %6307 = vmatmul.mubr.msk.f32.vlgmr.msra.gmra.mxu0 %vm1009_vm2, %v5440_v43  ;;  %6362 = vmatprep.subr.mxu0 %v4809_v45 }
0x14f4   :  { %6363 = vmatpush3.msra.mxu0 %v4809_v45  ;;  %v4805_v46 = vpop.permute.xlu1 %4804  ;;  %6309 = vmatprep.mubr.msk.f32.mxu0 %vm1009_vm2, %v5441_v44 }
0x14f6   :  { %v5047_v49 = vpop.permute.xlu0 %5046 }
0x14f7   :  { %6310 = vmatmul.mubr.msk.f32.gmra.mxu0 %vm1009_vm2, %v5442_v47  ;;  %6394 = vmatprep.subr.mxu1 %v5047_v49 }
0x14f8   :  { %v4807_v51 = vpop.permute.xlu1 %4806  ;;  %6395 = vmatpush3.msra.mxu1 %v5047_v49  ;;  %6312 = vmatprep.mubr.msk.f32.mxu0 %vm1009_vm2, %v5443_v48 }
0x14f9   :  { %6364 = vmatprep.subr.mxu0 %v4807_v51 }
0x14fa   :  { %v5045_v53 = vpop.permute.xlu0 %5044  ;;  %6365 = vmatpush3.msra.mxu0 %v4807_v51 }
0x14fb   :  { %6313 = vmatmul.mubr.msk.f32.gmra.mxu0 %vm1009_vm2, %v5444_v52  ;;  %6366 = vmatprep.subr.mxu0 %v4805_v46 }
0x14fc   :  { %6396 = vmatprep.subr.mxu1 %v5045_v53  ;;  %6367 = vmatpush3.msra.mxu0 %v4805_v46  ;;  %v4803_v57 = vpop.permute.xlu1 %4802 }
0x14fd   :  { %6397 = vmatpush3.msra.mxu1 %v5045_v53  ;;  %6368 = vmatprep.subr.mxu0 %v4803_v57 }
0x14fe   :  { %v5043_v62 = vpop.permute.xlu0 %5042  ;;  %6315 = vmatprep.mubr.msk.f32.mxu0 %vm1009_vm2, %v5445_v56  ;;  %6369 = vmatpush3.msra.mxu0 %v4803_v57 }
0x14ff   :  { %6316 = vmatmul.mubr.msk.f32.gmra.mxu0 %vm1009_vm2, %v5446_v58  ;;  %6398 = vmatprep.subr.mxu1 %v5043_v62 }
0x1500   :  { %v5041_v2 = vpop.permute.xlu1 %5040  ;;  %6399 = vmatpush3.msra.mxu1 %v5043_v62  ;;  %6318 = vmatprep.mubr.msk.f32.mxu0 %vm1009_vm2, %v5447_v59 }
0x1501   :  { %6400 = vmatprep.subr.mxu1 %v5041_v2 }
0x1502   :  { %6401 = vmatpush3.msra.mxu1 %v5041_v2 }
0x1503   :  { %6319 = vmatmul.mubr.msk.f32.gmra.mxu0 %vm1009_vm2, %v5448_v3  ;;  %6403 = vmatmul.mubr.msk.f32.vlgmr.msra.gmra.mxu1 %vm1009_vm2, %v5520_v4 }
0x1504   :  { %6321 = vmatprep.mubr.msk.f32.mxu0 %vm1009_vm2, %v5449_v63  ;;  %6405 = vmatprep.mubr.msk.f32.mxu1 %vm1009_vm2, %v5521_v1 }
0x1507   :  { %6322 = vmatmul.mubr.msk.f32.gmra.mxu0 %vm1009_vm2, %v5450_v5  ;;  %6406 = vmatmul.mubr.msk.f32.gmra.mxu1 %vm1009_vm2, %v5522_v0 }
0x1508   :  { %6324 = vmatprep.mubr.msk.f32.mxu0 %vm1009_vm2, %v5451_v6  ;;  %6408 = vmatprep.mubr.msk.f32.mxu1 %vm1009_vm2, %v5523_v7 }
0x150b   :  { %6325 = vmatmul.mubr.msk.f32.gmra.mxu0 %vm1009_vm2, %v5452_v8  ;;  %6409 = vmatmul.mubr.msk.f32.gmra.mxu1 %vm1009_vm2, %v5524_v9 }
0x150c   :  { %6327 = vmatprep.mubr.msk.f32.mxu0 %vm1009_vm2, %v5453_v54  ;;  %6411 = vmatprep.mubr.msk.f32.mxu1 %vm1009_vm2, %v5525_v55 }
0x150f   :  { %6328 = vmatmul.mubr.msk.f32.gmra.mxu0 %vm1009_vm2, %v5454_v10  ;;  %6412 = vmatmul.mubr.msk.f32.gmra.mxu1 %vm1009_vm2, %v5526_v60 }
0x1510   :  { %6370 = vmatprep.mubr.msk.f32.mxu0 %vm1009_vm2, %v5487_v11  ;;  %6414 = vmatprep.mubr.msk.f32.mxu1 %vm1009_vm2, %v5527_v61 }
0x1513   :  { %6371 = vmatmul.mubr.msk.f32.vlgmr.msra.gmra.mxu0 %vm1009_vm2, %v5488_v12  ;;  %6415 = vmatmul.mubr.msk.f32.gmra.mxu1 %vm1009_vm2, %v5528_v50 }
0x1514   :  { %6373 = vmatprep.mubr.msk.f32.mxu0 %vm1009_vm2, %v5489_v13  ;;  %6417 = vmatprep.mubr.msk.f32.mxu1 %vm1009_vm2, %v5529_v14 }
0x1517   :  { %6374 = vmatmul.mubr.msk.f32.gmra.mxu0 %vm1009_vm2, %v5490_v15  ;;  %6418 = vmatmul.mubr.msk.f32.gmra.mxu1 %vm1009_vm2, %v5530_v16 }
0x1518   :  { %6376 = vmatprep.mubr.msk.f32.mxu0 %vm1009_vm2, %v5491_v17  ;;  %6420 = vmatprep.mubr.msk.f32.mxu1 %vm1009_vm2, %v5531_v18 }
0x151b   :  { %6377 = vmatmul.mubr.msk.f32.gmra.mxu0 %vm1009_vm2, %v5492_v19  ;;  %6421 = vmatmul.mubr.msk.f32.gmra.mxu1 %vm1009_vm2, %v5532_v20 }
0x151c   :  { %6379 = vmatprep.mubr.msk.f32.mxu0 %vm1009_vm2, %v5493_v22  ;;  %6423 = vmatprep.mubr.msk.f32.mxu1 %vm1009_vm2, %v5533_v24 }
0x151f   :  { %6380 = vmatmul.mubr.msk.f32.gmra.mxu0 %vm1009_vm2, %v5494_v26  ;;  %6424 = vmatmul.mubr.msk.f32.gmra.mxu1 %vm1009_vm2, %v5534_v27 }
0x1520   :  { %6382 = vmatprep.mubr.msk.f32.mxu0 %vm1009_vm2, %v5495_v25 }
0x1523   :  { %6383 = vmatmul.mubr.msk.f32.gmra.mxu0 %vm1009_vm2, %v5496_v28 }
0x1524   :  { %6385 = vmatprep.mubr.msk.f32.mxu0 %vm1009_vm2, %v5497_v23 }
0x1527   :  { %6386 = vmatmul.mubr.msk.f32.gmra.mxu0 %vm1009_vm2, %v5498_v21 }
0x1528   :  { %6388 = vmatprep.mubr.msk.f32.mxu0 %vm1009_vm2, %v5499_v29 }
0x152b   :  { %6389 = vmatmul.mubr.msk.f32.gmra.mxu0 %vm1009_vm2, %v5500_v30 }
0x152c   :  { %6391 = vmatprep.mubr.msk.f32.mxu0 %vm1009_vm2, %v5501_v31 }
0x152f   :  { %6392 = vmatmul.mubr.msk.f32.gmra.mxu0 %vm1009_vm2, %v5502_v32 }
0x1540   :  { %v6340_v33 = vpop.f32.mrf.mxu1 }
0x1542   :  { %v4706_v34 = vpop.f32.mrf.mxu1 }
0x1544   :  { %v6343_v35 = vpop.f32.mrf.mxu1 }
0x1546   :  { %v4716_v36 = vpop.f32.mrf.mxu1 }
0x1548   :  { %v6346_v37 = vpop.f32.mrf.mxu1 }
0x154a   :  { %v4726_v38 = vpop.f32.mrf.mxu1 }
0x154c   :  { %v6349_v39 = vpop.f32.mrf.mxu1 }
0x154e   :  { %v7679_v40 = vpop.f32.mrf.mxu1 }
0x1550   :  { %v7681_v41 = vpop.f32.mrf.mxu1 }
0x1552   :  { %v7683_v42 = vpop.f32.mrf.mxu1 }
0x1554   :  { %v7685_v43 = vpop.f32.mrf.mxu1 }
0x1556   :  { %v7687_v44 = vpop.f32.mrf.mxu1 }
0x1558   :  { %v7689_v46 = vpop.f32.mrf.mxu1 }
0x155a   :  { %v7691_v49 = vpop.f32.mrf.mxu1 }
0x155c   :  { %v7693_v53 = vpop.f32.mrf.mxu1 }
0x155e   :  { %v7695_v58 = vpop.f32.mrf.mxu1 }
0x15b3   :  { %v6308_v45 = vpop.f32.mrf.mxu0 }
0x15b4   :  { %v4712_v60 = vadd.f32 %v6340_v33, %v6308_v45 }
0x15b5   :  { %v4513_v47 = vpop.f32.mrf.mxu0 }
0x15b6   :  { %v4707_v12 = vadd.f32 %v4706_v34, %v4513_v47 }
0x15b7   :  { %v6311_v48 = vpop.f32.mrf.mxu0 }
0x15b8   :  { %v4722_v14 = vadd.f32 %v6343_v35, %v6311_v48 }
0x15b9   :  { %v4523_v51 = vpop.f32.mrf.mxu0 }
0x15ba   :  { %v4717_v19 = vadd.f32 %v4716_v36, %v4523_v51 }
0x15bb   :  { %v6314_v52 = vpop.f32.mrf.mxu0 }
0x15bc   :  { %v4732_v26 = vadd.f32 %v6346_v37, %v6314_v52 }
0x15bd   :  { %v4533_v56 = vpop.f32.mrf.mxu0 }
0x15be   :  { %v4727_v21 = vadd.f32 %v4726_v38, %v4533_v56 }
0x15bf   :  { %v6317_v57 = vpop.f32.mrf.mxu0 }
0x15c0   :  { %v4742_v32 = vadd.f32 %v6349_v39, %v6317_v57 }
0x15c1   :  { %v4543_v59 = vpop.f32.mrf.mxu0 }
0x15c2   :  { %v4737_v37 = vadd.f32 %v7679_v40, %v4543_v59 }
0x15c3   :  { %v6320_v62 = vpop.f32.mrf.mxu0  ;;  %v6404_v2 = vpop.f32.mrf.mxu1 }
0x15c4   :  { %v4752_v38 = vadd.f32 %v7681_v41, %v6320_v62 }
0x15c5   :  { %v4553_v3 = vpop.f32.mrf.mxu0  ;;  %v5166_v4 = vpop.f32.mrf.mxu1 }
0x15c6   :  { %v4747_v57 = vadd.f32 %v7683_v42, %v4553_v3 }
0x15c7   :  { %v6323_v63 = vpop.f32.mrf.mxu0  ;;  %v6407_v1 = vpop.f32.mrf.mxu1 }
0x15c8   :  { %v4762_v59 = vadd.f32 %v7685_v43, %v6323_v63 }
0x15c9   :  { %v7697_v5 = vpop.f32.mrf.mxu0  ;;  %v5176_v0 = vpop.f32.mrf.mxu1 }
0x15cb   :  { %v7699_v6 = vpop.f32.mrf.mxu0  ;;  %v6410_v7 = vpop.f32.mrf.mxu1 }
0x15cd   :  { %v7701_v8 = vpop.f32.mrf.mxu0  ;;  %v5186_v9 = vpop.f32.mrf.mxu1 }
0x15cf   :  { %v7703_v54 = vpop.f32.mrf.mxu0  ;;  %v6413_v55 = vpop.f32.mrf.mxu1 }
0x15d1   :  { %v7705_v10 = vpop.f32.mrf.mxu0  ;;  %v5196_v61 = vpop.f32.mrf.mxu1 }
0x15d3   :  { %v6372_v11 = vpop.f32.mrf.mxu0  ;;  %v6416_v18 = vpop.f32.mrf.mxu1 }
0x15d4   :  { %v5008_v50 = vadd.f32 %v6372_v11, %v4712_v60 }
0x15d5   :  { %v4928_v13 = vpop.f32.mrf.mxu0  ;;  %v5206_v23 = vpop.f32.mrf.mxu1 }
0x15d6   :  { %v5007_v15 = vadd.f32 %v4928_v13, %v4707_v12  ;;  %v5246_v16 = vadd.f32 %v6404_v2, %v5008_v50  ;;  %v4782_v50 = vadd.f32 %v7693_v53, %v7703_v54 }
0x15d7   :  { %v6375_v17 = vpop.f32.mrf.mxu0  ;;  %v6419_v36 = vpop.f32.mrf.mxu1 }
0x15d8   :  { %5262 = vst.msk [vmem:[#allocation14 + $0x8] sm:$0xff] %vm165_vm0, %v5246_v16  ;;  %v5010_v20 = vadd.f32 %v6375_v17, %v4722_v14  ;;  %v5245_v22 = vadd.f32 %v5166_v4, %v5007_v15  ;;  %v4777_v15 = vadd.f32 %v7695_v58, %v7705_v10 }
0x15d9   :  { %v4938_v24 = vpop.f32.mrf.mxu0  ;;  %v5216_v56 = vpop.f32.mrf.mxu1 }
0x15da   :  { %5261 = vst.msk [vmem:[#allocation14] sm:$0xff] %vm165_vm0, %v5245_v22  ;;  %v5009_v27 = vadd.f32 %v4938_v24, %v4717_v19  ;;  %v5248_v25 = vadd.f32 %v6407_v1, %v5010_v20 }
0x15db   :  { %v6378_v28 = vpop.f32.mrf.mxu0  ;;  %v6422_v62 = vpop.f32.mrf.mxu1 }
0x15dc   :  { %5264 = vst.msk [vmem:[#allocation14 + $0x18] sm:$0xff] %vm165_vm0, %v5248_v25  ;;  %v5012_v29 = vadd.f32 %v6378_v28, %v4732_v26  ;;  %v5247_v30 = vadd.f32 %v5176_v0, %v5009_v27 }
0x15dd   :  { %v4948_v31 = vpop.f32.mrf.mxu0  ;;  %v5226_v11 = vpop.f32.mrf.mxu1 }
0x15de   :  { %5263 = vst.msk [vmem:[#allocation14 + $0x10] sm:$0xff] %vm165_vm0, %v5247_v30  ;;  %v5011_v33 = vadd.f32 %v4948_v31, %v4727_v21  ;;  %v5250_v34 = vadd.f32 %v6410_v7, %v5012_v29  ;;  %v4757_v7 = vadd.f32 %v7687_v44, %v7697_v5 }
0x15df   :  { %v6381_v35 = vpop.f32.mrf.mxu0  ;;  %v6425_v14 = vpop.f32.mrf.mxu1 }
0x15e0   :  { %5266 = vst.msk [vmem:[#allocation14 + $0x28] sm:$0xff] %vm165_vm0, %v5250_v34  ;;  %v5014_v45 = vadd.f32 %v6381_v35, %v4742_v32  ;;  %v5249_v47 = vadd.f32 %v5186_v9, %v5011_v33 }
0x15e1   :  { %v4958_v48 = vpop.f32.mrf.mxu0  ;;  %v5236_v54 = vpop.f32.mrf.mxu1 }
0x15e2   :  { %5265 = vst.msk [vmem:[#allocation14 + $0x20] sm:$0xff] %vm165_vm0, %v5249_v47  ;;  %v5013_v51 = vadd.f32 %v4958_v48, %v4737_v37  ;;  %v5252_v52 = vadd.f32 %v6413_v55, %v5014_v45  ;;  %v4772_v55 = vadd.f32 %v7689_v46, %v7699_v6 }
0x15e3   :  { %v6384_v39 = vpop.f32.mrf.mxu0 }
0x15e4   :  { %5268 = vst.msk [vmem:[#allocation14 + $0x38] sm:$0xff] %vm165_vm0, %v5252_v52  ;;  %v5016_v2 = vadd.f32 %v6384_v39, %v4752_v38  ;;  %v5251_v4 = vadd.f32 %v5196_v61, %v5013_v51  ;;  %v4767_v61 = vadd.f32 %v7691_v49, %v7701_v8 }
0x15e5   :  { %v4968_v40 = vpop.f32.mrf.mxu0 }
0x15e6   :  { %5267 = vst.msk [vmem:[#allocation14 + $0x30] sm:$0xff] %vm165_vm0, %v5251_v4  ;;  %v5015_v1 = vadd.f32 %v4968_v40, %v4747_v57  ;;  %v5254_v0 = vadd.f32 %v6416_v18, %v5016_v2 }
0x15e7   :  { %v6387_v41 = vpop.f32.mrf.mxu0 }
0x15e8   :  { %5270 = vst.msk [vmem:[#allocation14 + $0x48] sm:$0xff] %vm165_vm0, %v5254_v0  ;;  %v5018_v9 = vadd.f32 %v6387_v41, %v4762_v59  ;;  %v5253_v42 = vadd.f32 %v5206_v23, %v5015_v1 }
0x15e9   :  { %v4978_v3 = vpop.f32.mrf.mxu0 }
0x15ea   :  { %5269 = vst.msk [vmem:[#allocation14 + $0x40] sm:$0xff] %vm165_vm0, %v5253_v42  ;;  %v5017_v43 = vadd.f32 %v4978_v3, %v4757_v7  ;;  %v5256_v63 = vadd.f32 %v6419_v36, %v5018_v9 }
0x15eb   :  { %v6390_v60 = vpop.f32.mrf.mxu0 }
0x15ec   :  { %5272 = vst.msk [vmem:[#allocation14 + $0x58] sm:$0xff] %vm165_vm0, %v5256_v63  ;;  %v5020_v44 = vadd.f32 %v6390_v60, %v4772_v55  ;;  %v5255_v5 = vadd.f32 %v5216_v56, %v5017_v43 }
0x15ed   :  { %v4988_v12 = vpop.f32.mrf.mxu0 }
0x15ee   :  { %5271 = vst.msk [vmem:[#allocation14 + $0x50] sm:$0xff] %vm165_vm0, %v5255_v5  ;;  %v5019_v46 = vadd.f32 %v4988_v12, %v4767_v61  ;;  %v5258_v6 = vadd.f32 %v6422_v62, %v5020_v44 }
0x15ef   :  { %v6393_v13 = vpop.f32.mrf.mxu0 }
0x15f0   :  { %5274 = vst.msk [vmem:[#allocation14 + $0x68] sm:$0xff] %vm165_vm0, %v5258_v6  ;;  %v5022_v49 = vadd.f32 %v6393_v13, %v4782_v50  ;;  %v5257_v8 = vadd.f32 %v5226_v11, %v5019_v46 }
0x15f1   :  { %v4998_v16 = vpop.f32.mrf.mxu0 }
0x15f2   :  { %5273 = vst.msk [vmem:[#allocation14 + $0x60] sm:$0xff] %vm165_vm0, %v5257_v8  ;;  %v5021_v17 = vadd.f32 %v4998_v16, %v4777_v15  ;;  %v5260_v53 = vadd.f32 %v6425_v14, %v5022_v49 }
0x15f4   :  { %5276 = vst.msk [vmem:[#allocation14 + $0x78] sm:$0xff] %vm165_vm0, %v5260_v53  ;;  %v5259_v18 = vadd.f32 %v5236_v54, %v5021_v17 }
0x15f6   :  { %5275 = vst.msk [vmem:[#allocation14 + $0x70] sm:$0xff] %vm165_vm0, %v5259_v18 }
0x15f7   :  { %6624 = shalt.err (!%p6621_p11)
}
0x15f8   :  { %5288 = dma.vmem_to_hbm [thread:$0]  %s5283_s23, 2048, %s7757_s14, [#allocation4], %s6652_s26, %s6652_s26, %s6653_s27  }
0x15f9   :  { %6641 = dma.done.wait [#allocation4], 2048  }
0x15fa   :  { %6642 = vsyncadd [#allocation4], 4294965248 }
0x15fb   :  { %5296 = vsyncpa [#allocation3], 1 }
0x15fc   :  { %5297 = vsyncpa [#allocation6], 1 }
0x15fd   :  { %5298 = vsyncpa [#allocation9], 1 }
0x15fe   :  { %5299 = vsyncpa [#allocation12], 1 }
0x15ff   :  { %5300 = vsyncpa [#allocation4], 1 }

</bundles_post_ra>
